<compile_context>
chip_gen: v7x
topology: tpu7x:2x2x1
jax: 0.10.0
libtpu: 0.0.40
codegen_flags: <defaults>
</compile_context>

<pallas_src>
import jax
import jax.numpy as jnp
from jax.experimental import pallas as pl
from jax.experimental.pallas import tpu as pltpu

LN_EPS = 1e-5
BF16 = jnp.bfloat16
F32 = jnp.float32


def _layernorm(h, gamma, beta):
    mu = jnp.mean(h, axis=-1, keepdims=True)
    var = jnp.mean((h - mu) ** 2, axis=-1, keepdims=True)
    return (h - mu) * jax.lax.rsqrt(var + LN_EPS) * gamma + beta


def _mm(a, b):
    """bf16 MXU matmul with f32 accumulation (cast only at the matmul edge)."""
    return jnp.dot(a.astype(BF16), b.astype(BF16), preferred_element_type=F32)


def _make_kernel(num_heads, head_dim, embed, seq_len, seq_tile, kv_tile):
    scale = 1.0 / (head_dim ** 0.5)
    num_kv = seq_len // kv_tile

    def kernel(xq_ref, xf_ref,
               wq_ref, bq_ref, wkv_ref, bkv_ref, wo_ref, bo_ref,
               w1_ref, b1_ref, w2_ref, b2_ref,
               g1_ref, be1_ref, g2_ref, be2_ref,
               o_ref,
               k_sc, v_sc, h1_sc, acc_sc):
        qi = pl.program_id(1)
        f = pl.program_id(2)

        # ---- once per batch element: project K/V over the full sequence and
        #      cache head-major (H, S, D) bf16 in VMEM scratch. ----
        @pl.when(jnp.logical_and(qi == 0, f == 0))
        def _():
            xf = xf_ref[0]                                        # (S, E) f32
            kv = _mm(xf, wkv_ref[...]) + bkv_ref[...]             # (S, 2E) f32
            k = kv[:, :embed].reshape(seq_len, num_heads, head_dim)
            v = kv[:, embed:].reshape(seq_len, num_heads, head_dim)
            k_sc[...] = k.transpose(1, 0, 2).astype(BF16)
            v_sc[...] = v.transpose(1, 0, 2).astype(BF16)

        # ---- once per query tile: attention + residual + LayerNorm1 ----
        @pl.when(f == 0)
        def _():
            xq = xq_ref[0]                                        # (TQ, E) f32
            q = _mm(xq, wq_ref[...]) + bq_ref[...]                # (TQ, E) f32
            q = q * scale                                         # fold 1/sqrt(D) into q
            qh = (q.reshape(seq_tile, num_heads, head_dim)
                  .transpose(1, 0, 2).astype(BF16))               # (H, TQ, D)
            # TODO(synk): the q/ctx head relayouts could use pltpu.einshape
            # ("q(hd)->hqd") once its layout behaviour is validated on all gens.

            def kv_step(c, carry):
                m, l, acc = carry
                lo = c * kv_tile
                if not isinstance(lo, int):
                    lo = pl.multiple_of(lo, kv_tile)
                kc = k_sc[:, pl.ds(lo, kv_tile), :]               # (H, TK, D) bf16
                vc = v_sc[:, pl.ds(lo, kv_tile), :]
                s = jnp.einsum("hqd,hkd->hqk", qh, kc,
                               preferred_element_type=F32)        # (H, TQ, TK) f32
                m_new = jnp.maximum(m, jnp.max(s, axis=-1, keepdims=True))
                alpha = jnp.exp(m - m_new)
                p = jnp.exp(s - m_new)
                l_new = alpha * l + jnp.sum(p, axis=-1, keepdims=True)
                acc_new = alpha * acc + jnp.einsum(
                    "hqk,hkd->hqd", p.astype(BF16), vc,
                    preferred_element_type=F32)
                return m_new, l_new, acc_new

            init = (jnp.full((num_heads, seq_tile, 1), -jnp.inf, F32),
                    jnp.zeros((num_heads, seq_tile, 1), F32),
                    jnp.zeros((num_heads, seq_tile, head_dim), F32))
            if num_kv == 1:
                _, l, acc = kv_step(0, init)
            else:
                _, l, acc = jax.lax.fori_loop(0, num_kv, kv_step, init,
                                              unroll=True)

            ctx = acc * pl.reciprocal(l, approx=True)             # (H, TQ, D)
            attn = ctx.transpose(1, 0, 2).reshape(seq_tile, embed)
            attn = _mm(attn, wo_ref[...]) + bo_ref[...]           # fc_out
            h1_sc[...] = _layernorm(xq + attn, g1_ref[...], be1_ref[...])
            acc_sc[...] = jnp.zeros((seq_tile, embed), F32)

        # ---- every f step: one streamed MLP chunk (fc1 -> relu -> fc2 partial) ----
        hid = jnp.maximum(_mm(h1_sc[...], w1_ref[...]) + b1_ref[...], 0.0)
        acc_sc[...] = acc_sc[...] + _mm(hid, w2_ref[...])

        # ---- last f step: fc2 bias, residual + LayerNorm2, write output tile ----
        @pl.when(f == pl.num_programs(2) - 1)
        def _():
            mlp = acc_sc[...] + b2_ref[...]
            o_ref[0] = _layernorm(h1_sc[...] + mlp,
                                  g2_ref[...], be2_ref[...]).astype(o_ref.dtype)

    return kernel


def _vmem_capacity_bytes():
    try:
        info = pltpu.get_tpu_info()
        return int(getattr(info, "vmem_capacity_bytes", 64 * 1024 * 1024))
    except Exception:
        return 64 * 1024 * 1024


def prepare_params(p):
    """One-time prep (do NOT repeat per call): fuse K|V into one (E, 2E) matmul
    and pre-cast all matmul weights to bf16; biases / LN params stay f32."""
    return {
        "wq": p["wq"].astype(BF16), "bq": p["bq"],
        "wkv": jnp.concatenate([p["wk"], p["wv"]], axis=1).astype(BF16),
        "bkv": jnp.concatenate([p["bk"], p["bv"]], axis=1),
        "wo": p["wo"].astype(BF16), "bo": p["bo"],
        "w1": p["w1"].astype(BF16), "b1": p["b1"],
        "w2": p["w2"].astype(BF16), "b2": p["b2"],
        "gamma1": p["gamma1"], "beta1": p["beta1"],
        "gamma2": p["gamma2"], "beta2": p["beta2"],
    }


def transformer_layer(x, kparams, *, num_heads,
                      seq_tile=None, kv_tile=None, ff_chunk=None):
    """x: [B, S, E] float32; kparams: output of prepare_params(init_params(...))."""
    B, S, E = x.shape
    F = kparams["w1"].shape[1]
    D = E // num_heads

    # Per-generation VMEM budget / default tiles (v7x has 64 MiB per TC,
    # v5e/v6e have 128 MiB).
    cap = _vmem_capacity_bytes()
    small_vmem = cap <= 64 * 1024 * 1024
    if seq_tile is None:
        seq_tile = 128 if small_vmem else 256
    if kv_tile is None:
        kv_tile = 512
    if ff_chunk is None:
        ff_chunk = 512
    vmem_limit = int(max(32 * 1024 * 1024,
                         min(100 * 1024 * 1024, cap - 8 * 1024 * 1024)))

    tq = seq_tile if (S > seq_tile and S % seq_tile == 0) else S
    tk = kv_tile if (S > kv_tile and S % kv_tile == 0) else S
    fch = ff_chunk if (F > ff_chunk and F % ff_chunk == 0) else F
    n_q = S // tq
    n_f = F // fch

    kernel = _make_kernel(num_heads, D, E, S, tq, tk)

    def build_specs(single_buffer):
        const = {"pipeline_mode": pl.Buffered(1)} if single_buffer else {}
        fixed = lambda shape: pl.BlockSpec(shape, lambda b, qi, f: (0, 0), **const)
        return [
            # x query / residual tile
            pl.BlockSpec((1, tq, E), lambda b, qi, f: (b, qi, 0)),
            # full-sequence x (K/V source): only consumed at qi==0, single-buffered
            pl.BlockSpec((1, S, E), lambda b, qi, f: (b, 0, 0), **const),
            fixed((E, E)), fixed((1, E)),            # wq, bq
            fixed((E, 2 * E)), fixed((1, 2 * E)),    # wkv (K|V fused), bkv
            fixed((E, E)), fixed((1, E)),            # wo, bo
            # streamed MLP weight chunks (default double-buffer: DMA overlaps MXU)
            pl.BlockSpec((E, fch), lambda b, qi, f: (0, f)),   # w1 chunk
            pl.BlockSpec((1, fch), lambda b, qi, f: (0, f)),   # b1 chunk
            pl.BlockSpec((fch, E), lambda b, qi, f: (f, 0)),   # w2 chunk
            fixed((1, E)),                                     # b2
            fixed((1, E)), fixed((1, E)),                      # gamma1, beta1
            fixed((1, E)), fixed((1, E)),                      # gamma2, beta2
        ]

    out_spec = pl.BlockSpec((1, tq, E), lambda b, qi, f: (b, qi, 0))

    scratch = [
        pltpu.VMEM((num_heads, S, D), BF16),   # K cache (head-major, per batch)
        pltpu.VMEM((num_heads, S, D), BF16),   # V cache
        pltpu.VMEM((tq, E), F32),              # LN1 output (reused across f)
        pltpu.VMEM((tq, E), F32),              # fc2 accumulator
    ]

    # K/V projected exactly once per batch; streamed w1/w2 re-read once per
    # (b, qi) sweep — both reflected here.
    flops = B * (8 * S * E * E + 4 * S * S * E + 4 * S * E * F)
    bytes_accessed = (
        3 * B * S * E * 4                       # xq tiles + xf + output (f32)
        + 2 * 4 * E * E                         # wq/wkv/wo (bf16), read once
        + B * n_q * 2 * 2 * E * F               # streamed w1 + w2 (bf16) per sweep
        + 4 * (3 * E + F + 4 * E))              # biases + LN params (f32)
    cost = pl.CostEstimate(flops=int(flops),
                           transcendentals=int(B * num_heads * S * S),
                           bytes_accessed=int(bytes_accessed))

    args = (x, x,
            kparams["wq"], kparams["bq"], kparams["wkv"], kparams["bkv"],
            kparams["wo"], kparams["bo"],
            kparams["w1"], kparams["b1"], kparams["w2"], kparams["b2"],
            kparams["gamma1"], kparams["beta1"],
            kparams["gamma2"], kparams["beta2"])

    def run(single_buffer):
        return pl.pallas_call(
            kernel,
            out_shape=jax.ShapeDtypeStruct((B, S, E), x.dtype),
            grid_spec=pltpu.PrefetchScalarGridSpec(
                num_scalar_prefetch=0,
                grid=(B, n_q, n_f),
                in_specs=build_specs(single_buffer),
                out_specs=out_spec,
                scratch_shapes=scratch,
            ),
            compiler_params=pltpu.CompilerParams(
                # qi/f carry scratch state (K/V cache, MLP accumulator) so they
                # must be "arbitrary"; b stays "parallel" for megacore / 2-TC.
                dimension_semantics=("parallel", "arbitrary", "arbitrary"),
                vmem_limit_bytes=vmem_limit,
            ),
            cost_estimate=cost,
        )(*args)

    try:
        return run(True)
    except Exception:
        # Fallback if single-buffered weight blocks (pl.Buffered(1)) are not
        # supported by this JAX/Mosaic build; correctness is unaffected.
        return run(False)


def init_params(key, embed_size, ff_size):
    """Deterministic synthetic parameters. Linear weights stored as [in, out]
    (i.e. PyTorch weight.T), biases as [1, out]."""
    ks = jax.random.split(key, 10)
    scale = 0.05
    p = {}
    names_shapes = [
        ("wq", (embed_size, embed_size)), ("wk", (embed_size, embed_size)),
        ("wv", (embed_size, embed_size)), ("wo", (embed_size, embed_size)),
        ("w1", (embed_size, ff_size)), ("w2", (ff_size, embed_size)),
    ]
    for (name, shape), k in zip(names_shapes, ks[:6]):
        p[name] = scale * jax.random.normal(k, shape, dtype=jnp.float32)
    p["bq"] = scale * jax.random.normal(ks[6], (1, embed_size), dtype=jnp.float32)
    p["bk"] = scale * jax.random.normal(ks[7], (1, embed_size), dtype=jnp.float32)
    p["bv"] = scale * jax.random.normal(ks[8], (1, embed_size), dtype=jnp.float32)
    p["bo"] = jnp.zeros((1, embed_size), dtype=jnp.float32)
    p["b1"] = scale * jax.random.normal(ks[9], (1, ff_size), dtype=jnp.float32)
    p["b2"] = jnp.zeros((1, embed_size), dtype=jnp.float32)
    # nn.LayerNorm default init: weight=1, bias=0
    p["gamma1"] = jnp.ones((1, embed_size), dtype=jnp.float32)
    p["beta1"] = jnp.zeros((1, embed_size), dtype=jnp.float32)
    p["gamma2"] = jnp.ones((1, embed_size), dtype=jnp.float32)
    p["beta2"] = jnp.zeros((1, embed_size), dtype=jnp.float32)
    return p


def reference_forward(x, params, *, num_heads):
    """Pure-JAX reference matching the PyTorch module semantics, mirroring the
    kernel's bf16-at-the-matmul-edge policy so the comparison is tight."""
    B, S, E = x.shape
    D = E // num_heads

    def mm(a, b):
        return jnp.matmul(a.astype(BF16), b.astype(BF16), preferred_element_type=F32)

    q = mm(x, params["wq"]) + params["bq"]
    k = mm(x, params["wk"]) + params["bk"]
    v = mm(x, params["wv"]) + params["bv"]
    q = q.reshape(B, S, num_heads, D).transpose(0, 2, 1, 3)
    k = k.reshape(B, S, num_heads, D).transpose(0, 2, 1, 3)
    v = v.reshape(B, S, num_heads, D).transpose(0, 2, 1, 3)
    s = jnp.einsum("bhqd,bhkd->bhqk", q.astype(BF16), k.astype(BF16),
                   preferred_element_type=F32) / (D ** 0.5)
    p = jax.nn.softmax(s, axis=-1)
    ctx = jnp.einsum("bhqk,bhkd->bhqd", p.astype(BF16), v.astype(BF16),
                     preferred_element_type=F32)
    ao = ctx.transpose(0, 2, 1, 3).reshape(B, S, E)
    ao = mm(ao, params["wo"]) + params["bo"]
    h1 = _layernorm(x + ao, params["gamma1"], params["beta1"])
    ff = jnp.maximum(mm(h1, params["w1"]) + params["b1"], 0.0)
    ff = mm(ff, params["w2"]) + params["b2"]
    return _layernorm(h1 + ff, params["gamma2"], params["beta2"])


if __name__ == "__main__":
    B, S, E, H, F = 2, 8, 32, 4, 64
    key = jax.random.PRNGKey(0)
    kx, kp = jax.random.split(key)
    x = jax.random.normal(kx, (B, S, E), dtype=jnp.float32)
    params = init_params(kp, E, F)
    kparams = prepare_params(params)   # fuse K|V + bf16 casts once, not per call

    out = jax.block_until_ready(transformer_layer(x, kparams, num_heads=H))
    ref = reference_forward(x, params, num_heads=H)

    assert out.shape == (B, S, E)
    # Error budget: bf16 matmul edges are mirrored in the reference; kernel-only
    # approximations are the online-softmax reordering (exact in math) and the
    # EUP approx reciprocal, so 1e-2 tolerance has large margin.
    assert jnp.allclose(out, ref, atol=1e-2, rtol=1e-2), "mismatch vs JAX reference"
    print("KERNEL_OK")
</pallas_src>

<mosaic_0001>
module attributes {stable_mosaic.version = 11 : i64} {
  func.func @kernel(%arg0: i32, %arg1: i32, %arg2: i32, %arg3: memref<1x8x32xf32, #tpu.memory_space<vmem>>, %arg4: memref<1x8x32xf32, #tpu.memory_space<vmem>>, %arg5: memref<32x32xbf16, #tpu.memory_space<vmem>>, %arg6: memref<1x32xf32, #tpu.memory_space<vmem>>, %arg7: memref<32x64xbf16, #tpu.memory_space<vmem>>, %arg8: memref<1x64xf32, #tpu.memory_space<vmem>>, %arg9: memref<32x32xbf16, #tpu.memory_space<vmem>>, %arg10: memref<1x32xf32, #tpu.memory_space<vmem>>, %arg11: memref<32x64xbf16, #tpu.memory_space<vmem>>, %arg12: memref<1x64xf32, #tpu.memory_space<vmem>>, %arg13: memref<64x32xbf16, #tpu.memory_space<vmem>>, %arg14: memref<1x32xf32, #tpu.memory_space<vmem>>, %arg15: memref<1x32xf32, #tpu.memory_space<vmem>>, %arg16: memref<1x32xf32, #tpu.memory_space<vmem>>, %arg17: memref<1x32xf32, #tpu.memory_space<vmem>>, %arg18: memref<1x32xf32, #tpu.memory_space<vmem>>, %arg19: memref<1x8x32xf32, #tpu.memory_space<vmem>>, %arg20: memref<4x8x8xbf16, #tpu.memory_space<vmem>>, %arg21: memref<4x8x8xbf16, #tpu.memory_space<vmem>>, %arg22: memref<8x32xf32, #tpu.memory_space<vmem>>, %arg23: memref<8x32xf32, #tpu.memory_space<vmem>>) attributes {dimension_semantics = [#tpu.dimension_semantics<parallel>, #tpu.dimension_semantics<arbitrary>, #tpu.dimension_semantics<arbitrary>], iteration_bounds = array<i64: 2, 1, 1>, scalar_prefetch = 0 : i64, scratch_operands = 4 : i64, tpu.core_type = #tpu.core_type<tc>, window_params = [{transform_indices = @transform_0, window_bounds = array<i64: 1, 8, 32>}, {pipeline_mode = #tpu.pipeline_mode<synchronous>, transform_indices = @transform_1, window_bounds = array<i64: 1, 8, 32>}, {pipeline_mode = #tpu.pipeline_mode<synchronous>, transform_indices = @transform_2, window_bounds = array<i64: 32, 32>}, {pipeline_mode = #tpu.pipeline_mode<synchronous>, transform_indices = @transform_3, window_bounds = array<i64: 1, 32>}, {pipeline_mode = #tpu.pipeline_mode<synchronous>, transform_indices = @transform_4, window_bounds = array<i64: 32, 64>}, {pipeline_mode = #tpu.pipeline_mode<synchronous>, transform_indices = @transform_5, window_bounds = array<i64: 1, 64>}, {pipeline_mode = #tpu.pipeline_mode<synchronous>, transform_indices = @transform_6, window_bounds = array<i64: 32, 32>}, {pipeline_mode = #tpu.pipeline_mode<synchronous>, transform_indices = @transform_7, window_bounds = array<i64: 1, 32>}, {transform_indices = @transform_8, window_bounds = array<i64: 32, 64>}, {transform_indices = @transform_9, window_bounds = array<i64: 1, 64>}, {transform_indices = @transform_10, window_bounds = array<i64: 64, 32>}, {pipeline_mode = #tpu.pipeline_mode<synchronous>, transform_indices = @transform_11, window_bounds = array<i64: 1, 32>}, {pipeline_mode = #tpu.pipeline_mode<synchronous>, transform_indices = @transform_12, window_bounds = array<i64: 1, 32>}, {pipeline_mode = #tpu.pipeline_mode<synchronous>, transform_indices = @transform_13, window_bounds = array<i64: 1, 32>}, {pipeline_mode = #tpu.pipeline_mode<synchronous>, transform_indices = @transform_14, window_bounds = array<i64: 1, 32>}, {pipeline_mode = #tpu.pipeline_mode<synchronous>, transform_indices = @transform_15, window_bounds = array<i64: 1, 32>}, {transform_indices = @transform_16, window_bounds = array<i64: 1, 8, 32>}]} {
    %c0_i32 = arith.constant 0 : i32
    %0 = arith.cmpi eq, %arg1, %c0_i32 : i32
    %c0_i32_0 = arith.constant 0 : i32
    %1 = arith.cmpi eq, %arg2, %c0_i32_0 : i32
    %2 = arith.andi %0, %1 : i1
    %3 = arith.extui %2 : i1 to i32
    %c0_i32_1 = arith.constant 0 : i32
    %4 = arith.cmpi ne, %3, %c0_i32_1 : i32
    scf.if %4 {
      %c0_19 = arith.constant 0 : index
      %c0_20 = arith.constant 0 : index
      %c0_21 = arith.constant 0 : index
      %26 = vector.load %arg4[%c0_19, %c0_20, %c0_21] : memref<1x8x32xf32, #tpu.memory_space<vmem>>, vector<1x8x32xf32>
      %27 = vector.shape_cast %26 : vector<1x8x32xf32> to vector<8x32xf32>
      %c0_22 = arith.constant 0 : index
      %c0_23 = arith.constant 0 : index
      %28 = vector.load %arg7[%c0_22, %c0_23] : memref<32x64xbf16, #tpu.memory_space<vmem>>, vector<32x64xbf16>
      %29 = arith.truncf %27 : vector<8x32xf32> to vector<8x32xbf16>
      %cst_24 = arith.constant dense<0.000000e+00> : vector<8x64xf32>
      %30 = tpu.matmul %29, %28, %cst_24 {dimension_numbers = #tpu.dot_dimension_numbers<[1], [0], [0], [1], [0, 0, 1, 1], [], []>} : vector<8x32xbf16>, vector<32x64xbf16>, vector<8x64xf32> -> vector<8x64xf32>
      %c0_25 = arith.constant 0 : index
      %c0_26 = arith.constant 0 : index
      %31 = vector.load %arg8[%c0_25, %c0_26] : memref<1x64xf32, #tpu.memory_space<vmem>>, vector<1x64xf32>
      %32 = vector.broadcast %31 : vector<1x64xf32> to vector<8x64xf32>
      %33 = arith.addf %30, %32 : vector<8x64xf32>
      %34 = vector.extract_strided_slice %33 {offsets = [0, 0], sizes = [8, 32], strides = [1, 1]} : vector<8x64xf32> to vector<8x32xf32>
      %35 = vector.shape_cast %34 : vector<8x32xf32> to vector<8x4x8xf32>
      %36 = vector.extract_strided_slice %33 {offsets = [0, 32], sizes = [8, 32], strides = [1, 1]} : vector<8x64xf32> to vector<8x32xf32>
      %37 = vector.shape_cast %36 : vector<8x32xf32> to vector<8x4x8xf32>
      %38 = tpu.transpose %35, [1, 0, 2] : vector<8x4x8xf32> -> vector<4x8x8xf32>
      %39 = arith.truncf %38 : vector<4x8x8xf32> to vector<4x8x8xbf16>
      %c0_27 = arith.constant 0 : index
      %c0_28 = arith.constant 0 : index
      %c0_29 = arith.constant 0 : index
      %40 = vector.load %arg20[%c0_27, %c0_28, %c0_29] : memref<4x8x8xbf16, #tpu.memory_space<vmem>>, vector<4x8x8xbf16>
      tpu.vector_store %arg20[%c0_27, %c0_28, %c0_29], %39 {strides = array<i32>} : memref<4x8x8xbf16, #tpu.memory_space<vmem>>, vector<4x8x8xbf16>,
      %41 = tpu.transpose %37, [1, 0, 2] : vector<8x4x8xf32> -> vector<4x8x8xf32>
      %42 = arith.truncf %41 : vector<4x8x8xf32> to vector<4x8x8xbf16>
      %c0_30 = arith.constant 0 : index
      %c0_31 = arith.constant 0 : index
      %c0_32 = arith.constant 0 : index
      %43 = vector.load %arg21[%c0_30, %c0_31, %c0_32] : memref<4x8x8xbf16, #tpu.memory_space<vmem>>, vector<4x8x8xbf16>
      tpu.vector_store %arg21[%c0_30, %c0_31, %c0_32], %42 {strides = array<i32>} : memref<4x8x8xbf16, #tpu.memory_space<vmem>>, vector<4x8x8xbf16>,
    } else {
    }
    %c0_i32_2 = arith.constant 0 : i32
    %5 = arith.cmpi eq, %arg2, %c0_i32_2 : i32
    %6 = arith.extui %5 : i1 to i32
    %c0_i32_3 = arith.constant 0 : i32
    %7 = arith.cmpi ne, %6, %c0_i32_3 : i32
    scf.if %7 {
      %c0_19 = arith.constant 0 : index
      %c0_20 = arith.constant 0 : index
      %c0_21 = arith.constant 0 : index
      %26 = vector.load %arg3[%c0_19, %c0_20, %c0_21] : memref<1x8x32xf32, #tpu.memory_space<vmem>>, vector<1x8x32xf32>
      %27 = vector.shape_cast %26 : vector<1x8x32xf32> to vector<8x32xf32>
      %c0_22 = arith.constant 0 : index
      %c0_23 = arith.constant 0 : index
      %28 = vector.load %arg5[%c0_22, %c0_23] : memref<32x32xbf16, #tpu.memory_space<vmem>>, vector<32x32xbf16>
      %29 = arith.truncf %27 : vector<8x32xf32> to vector<8x32xbf16>
      %cst_24 = arith.constant dense<0.000000e+00> : vector<8x32xf32>
      %30 = tpu.matmul %29, %28, %cst_24 {dimension_numbers = #tpu.dot_dimension_numbers<[1], [0], [0], [1], [0, 0, 1, 1], [], []>} : vector<8x32xbf16>, vector<32x32xbf16>, vector<8x32xf32> -> vector<8x32xf32>
      %c0_25 = arith.constant 0 : index
      %c0_26 = arith.constant 0 : index
      %31 = vector.load %arg6[%c0_25, %c0_26] : memref<1x32xf32, #tpu.memory_space<vmem>>, vector<1x32xf32>
      %32 = vector.broadcast %31 : vector<1x32xf32> to vector<8x32xf32>
      %33 = arith.addf %30, %32 : vector<8x32xf32>
      %cst_27 = arith.constant 0.353553385 : f32
      %34 = vector.broadcast %cst_27 : f32 to vector<8x32xf32>
      %35 = arith.mulf %33, %34 : vector<8x32xf32>
      %36 = vector.shape_cast %35 : vector<8x32xf32> to vector<8x4x8xf32>
      %37 = tpu.transpose %36, [1, 0, 2] : vector<8x4x8xf32> -> vector<4x8x8xf32>
      %38 = arith.truncf %37 : vector<4x8x8xf32> to vector<4x8x8xbf16>
      %cst_28 = arith.constant 0xFF800000 : f32
      %39 = vector.broadcast %cst_28 : f32 to vector<4x8x1xf32>
      %cst_29 = arith.constant 0.000000e+00 : f32
      %40 = vector.broadcast %cst_29 : f32 to vector<4x8x1xf32>
      %cst_30 = arith.constant 0.000000e+00 : f32
      %41 = vector.broadcast %cst_30 : f32 to vector<4x8x8xf32>
      %c0_31 = arith.constant 0 : index
      %c0_32 = arith.constant 0 : index
      %c0_33 = arith.constant 0 : index
      %42 = vector.load %arg20[%c0_31, %c0_32, %c0_33] : memref<4x8x8xbf16, #tpu.memory_space<vmem>>, vector<4x8x8xbf16>
      %c0_34 = arith.constant 0 : index
      %c0_35 = arith.constant 0 : index
      %c0_36 = arith.constant 0 : index
      %43 = vector.load %arg21[%c0_34, %c0_35, %c0_36] : memref<4x8x8xbf16, #tpu.memory_space<vmem>>, vector<4x8x8xbf16>
      "tpu.trace_start"() <{level = 10 : i32, message = "hqd,hkd->hqk"}> : () -> ()
      %cst_37 = arith.constant dense<0.000000e+00> : vector<4x8x8xf32>
      %44 = tpu.matmul %38, %42, %cst_37 {dimension_numbers = #tpu.dot_dimension_numbers<[2], [2], [1], [1], [0, 0, 0, 1, 1, 1], [0], [0]>} : vector<4x8x8xbf16>, vector<4x8x8xbf16>, vector<4x8x8xf32> -> vector<4x8x8xf32>
      "tpu.trace_stop"() : () -> ()
      %cst_38 = arith.constant dense<0xFF800000> : vector<4x8xf32>
      %45 = vector.multi_reduction <maximumf>, %44, %cst_38 [2] : vector<4x8x8xf32> to vector<4x8xf32>
      %46 = vector.shape_cast %45 : vector<4x8xf32> to vector<4x8x1xf32>
      %47 = arith.maximumf %39, %46 : vector<4x8x1xf32>
      %48 = arith.subf %39, %47 : vector<4x8x1xf32>
      %49 = math.exp %48 : vector<4x8x1xf32>
      %50 = vector.broadcast %47 : vector<4x8x1xf32> to vector<4x8x8xf32>
      %51 = arith.subf %44, %50 : vector<4x8x8xf32>
      %52 = math.exp %51 : vector<4x8x8xf32>
      %53 = arith.mulf %49, %40 : vector<4x8x1xf32>
      %cst_39 = arith.constant dense<0.000000e+00> : vector<4x8xf32>
      %54 = vector.multi_reduction <add>, %52, %cst_39 [2] : vector<4x8x8xf32> to vector<4x8xf32>
      %55 = vector.shape_cast %54 : vector<4x8xf32> to vector<4x8x1xf32>
      %56 = arith.addf %53, %55 : vector<4x8x1xf32>
      %57 = vector.broadcast %49 : vector<4x8x1xf32> to vector<4x8x8xf32>
      %58 = arith.mulf %57, %41 : vector<4x8x8xf32>
      %59 = arith.truncf %52 : vector<4x8x8xf32> to vector<4x8x8xbf16>
      "tpu.trace_start"() <{level = 10 : i32, message = "hqk,hkd->hqd"}> : () -> ()
      %cst_40 = arith.constant dense<0.000000e+00> : vector<4x8x8xf32>
      %60 = tpu.matmul %59, %43, %cst_40 {dimension_numbers = #tpu.dot_dimension_numbers<[2], [1], [1], [2], [0, 0, 0, 1, 1, 2], [0], [0]>} : vector<4x8x8xbf16>, vector<4x8x8xbf16>, vector<4x8x8xf32> -> vector<4x8x8xf32>
      "tpu.trace_stop"() : () -> ()
      %61 = arith.addf %58, %60 : vector<4x8x8xf32>
      %62 = tpu.reciprocal %56 {approx = true} : vector<4x8x1xf32> -> vector<4x8x1xf32>
      %63 = vector.broadcast %62 : vector<4x8x1xf32> to vector<4x8x8xf32>
      %64 = arith.mulf %61, %63 : vector<4x8x8xf32>
      %65 = tpu.transpose %64, [1, 0, 2] : vector<4x8x8xf32> -> vector<8x4x8xf32>
      %66 = vector.shape_cast %65 : vector<8x4x8xf32> to vector<8x32xf32>
      %c0_41 = arith.constant 0 : index
      %c0_42 = arith.constant 0 : index
      %67 = vector.load %arg9[%c0_41, %c0_42] : memref<32x32xbf16, #tpu.memory_space<vmem>>, vector<32x32xbf16>
      %68 = arith.truncf %66 : vector<8x32xf32> to vector<8x32xbf16>
      %cst_43 = arith.constant dense<0.000000e+00> : vector<8x32xf32>
      %69 = tpu.matmul %68, %67, %cst_43 {dimension_numbers = #tpu.dot_dimension_numbers<[1], [0], [0], [1], [0, 0, 1, 1], [], []>} : vector<8x32xbf16>, vector<32x32xbf16>, vector<8x32xf32> -> vector<8x32xf32>
      %c0_44 = arith.constant 0 : index
      %c0_45 = arith.constant 0 : index
      %70 = vector.load %arg10[%c0_44, %c0_45] : memref<1x32xf32, #tpu.memory_space<vmem>>, vector<1x32xf32>
      %71 = vector.broadcast %70 : vector<1x32xf32> to vector<8x32xf32>
      %72 = arith.addf %69, %71 : vector<8x32xf32>
      %73 = arith.addf %27, %72 : vector<8x32xf32>
      %c0_46 = arith.constant 0 : index
      %c0_47 = arith.constant 0 : index
      %74 = vector.load %arg15[%c0_46, %c0_47] : memref<1x32xf32, #tpu.memory_space<vmem>>, vector<1x32xf32>
      %c0_48 = arith.constant 0 : index
      %c0_49 = arith.constant 0 : index
      %75 = vector.load %arg16[%c0_48, %c0_49] : memref<1x32xf32, #tpu.memory_space<vmem>>, vector<1x32xf32>
      %cst_50 = arith.constant dense<0.000000e+00> : vector<8xf32>
      %76 = vector.multi_reduction <add>, %73, %cst_50 [1] : vector<8x32xf32> to vector<8xf32>
      %77 = vector.shape_cast %76 : vector<8xf32> to vector<8x1xf32>
      %cst_51 = arith.constant 3.200000e+01 : f32
      %78 = vector.broadcast %cst_51 : f32 to vector<8x1xf32>
      %79 = arith.divf %77, %78 : vector<8x1xf32>
      %80 = vector.broadcast %79 : vector<8x1xf32> to vector<8x32xf32>
      %81 = arith.subf %73, %80 : vector<8x32xf32>
      %82 = arith.mulf %81, %81 : vector<8x32xf32>
      %cst_52 = arith.constant dense<0.000000e+00> : vector<8xf32>
      %83 = vector.multi_reduction <add>, %82, %cst_52 [1] : vector<8x32xf32> to vector<8xf32>
      %84 = vector.shape_cast %83 : vector<8xf32> to vector<8x1xf32>
      %cst_53 = arith.constant 3.200000e+01 : f32
      %85 = vector.broadcast %cst_53 : f32 to vector<8x1xf32>
      %86 = arith.divf %84, %85 : vector<8x1xf32>
      %87 = vector.broadcast %79 : vector<8x1xf32> to vector<8x32xf32>
      %88 = arith.subf %73, %87 : vector<8x32xf32>
      %cst_54 = arith.constant 9.99999974E-6 : f32
      %89 = vector.broadcast %cst_54 : f32 to vector<8x1xf32>
      %90 = arith.addf %86, %89 : vector<8x1xf32>
      %91 = math.rsqrt %90 : vector<8x1xf32>
      %92 = vector.broadcast %91 : vector<8x1xf32> to vector<8x32xf32>
      %93 = arith.mulf %88, %92 : vector<8x32xf32>
      %94 = vector.broadcast %74 : vector<1x32xf32> to vector<8x32xf32>
      %95 = arith.mulf %93, %94 : vector<8x32xf32>
      %96 = vector.broadcast %75 : vector<1x32xf32> to vector<8x32xf32>
      %97 = arith.addf %95, %96 : vector<8x32xf32>
      %c0_55 = arith.constant 0 : index
      %c0_56 = arith.constant 0 : index
      %98 = vector.load %arg22[%c0_55, %c0_56] : memref<8x32xf32, #tpu.memory_space<vmem>>, vector<8x32xf32>
      tpu.vector_store %arg22[%c0_55, %c0_56], %97 {strides = array<i32>} : memref<8x32xf32, #tpu.memory_space<vmem>>, vector<8x32xf32>,
      %cst_57 = arith.constant 0.000000e+00 : f32
      %99 = vector.broadcast %cst_57 : f32 to vector<8x32xf32>
      %c0_58 = arith.constant 0 : index
      %c0_59 = arith.constant 0 : index
      %100 = vector.load %arg23[%c0_58, %c0_59] : memref<8x32xf32, #tpu.memory_space<vmem>>, vector<8x32xf32>
      tpu.vector_store %arg23[%c0_58, %c0_59], %99 {strides = array<i32>} : memref<8x32xf32, #tpu.memory_space<vmem>>, vector<8x32xf32>,
    } else {
    }
    %c0 = arith.constant 0 : index
    %c0_4 = arith.constant 0 : index
    %8 = vector.load %arg22[%c0, %c0_4] : memref<8x32xf32, #tpu.memory_space<vmem>>, vector<8x32xf32>
    %c0_5 = arith.constant 0 : index
    %c0_6 = arith.constant 0 : index
    %9 = vector.load %arg11[%c0_5, %c0_6] : memref<32x64xbf16, #tpu.memory_space<vmem>>, vector<32x64xbf16>
    %10 = arith.truncf %8 : vector<8x32xf32> to vector<8x32xbf16>
    %cst = arith.constant dense<0.000000e+00> : vector<8x64xf32>
    %11 = tpu.matmul %10, %9, %cst {dimension_numbers = #tpu.dot_dimension_numbers<[1], [0], [0], [1], [0, 0, 1, 1], [], []>} : vector<8x32xbf16>, vector<32x64xbf16>, vector<8x64xf32> -> vector<8x64xf32>
    %c0_7 = arith.constant 0 : index
    %c0_8 = arith.constant 0 : index
    %12 = vector.load %arg12[%c0_7, %c0_8] : memref<1x64xf32, #tpu.memory_space<vmem>>, vector<1x64xf32>
    %13 = vector.broadcast %12 : vector<1x64xf32> to vector<8x64xf32>
    %14 = arith.addf %11, %13 : vector<8x64xf32>
    %cst_9 = arith.constant 0.000000e+00 : f32
    %15 = vector.broadcast %cst_9 : f32 to vector<8x64xf32>
    %16 = arith.maximumf %14, %15 : vector<8x64xf32>
    %c0_10 = arith.constant 0 : index
    %c0_11 = arith.constant 0 : index
    %17 = vector.load %arg23[%c0_10, %c0_11] : memref<8x32xf32, #tpu.memory_space<vmem>>, vector<8x32xf32>
    %c0_12 = arith.constant 0 : index
    %c0_13 = arith.constant 0 : index
    %18 = vector.load %arg13[%c0_12, %c0_13] : memref<64x32xbf16, #tpu.memory_space<vmem>>, vector<64x32xbf16>
    %19 = arith.truncf %16 : vector<8x64xf32> to vector<8x64xbf16>
    %cst_14 = arith.constant dense<0.000000e+00> : vector<8x32xf32>
    %20 = tpu.matmul %19, %18, %cst_14 {dimension_numbers = #tpu.dot_dimension_numbers<[1], [0], [0], [1], [0, 0, 1, 1], [], []>} : vector<8x64xbf16>, vector<64x32xbf16>, vector<8x32xf32> -> vector<8x32xf32>
    %21 = arith.addf %17, %20 : vector<8x32xf32>
    %c0_15 = arith.constant 0 : index
    %c0_16 = arith.constant 0 : index
    %22 = vector.load %arg23[%c0_15, %c0_16] : memref<8x32xf32, #tpu.memory_space<vmem>>, vector<8x32xf32>
    tpu.vector_store %arg23[%c0_15, %c0_16], %21 {strides = array<i32>} : memref<8x32xf32, #tpu.memory_space<vmem>>, vector<8x32xf32>,
    %c0_i32_17 = arith.constant 0 : i32
    %23 = arith.cmpi eq, %arg2, %c0_i32_17 : i32
    %24 = arith.extui %23 : i1 to i32
    %c0_i32_18 = arith.constant 0 : i32
    %25 = arith.cmpi ne, %24, %c0_i32_18 : i32
    scf.if %25 {
      %c0_19 = arith.constant 0 : index
      %c0_20 = arith.constant 0 : index
      %26 = vector.load %arg23[%c0_19, %c0_20] : memref<8x32xf32, #tpu.memory_space<vmem>>, vector<8x32xf32>
      %c0_21 = arith.constant 0 : index
      %c0_22 = arith.constant 0 : index
      %27 = vector.load %arg14[%c0_21, %c0_22] : memref<1x32xf32, #tpu.memory_space<vmem>>, vector<1x32xf32>
      %28 = vector.broadcast %27 : vector<1x32xf32> to vector<8x32xf32>
      %29 = arith.addf %26, %28 : vector<8x32xf32>
      %c0_23 = arith.constant 0 : index
      %c0_24 = arith.constant 0 : index
      %30 = vector.load %arg22[%c0_23, %c0_24] : memref<8x32xf32, #tpu.memory_space<vmem>>, vector<8x32xf32>
      %31 = arith.addf %30, %29 : vector<8x32xf32>
      %c0_25 = arith.constant 0 : index
      %c0_26 = arith.constant 0 : index
      %32 = vector.load %arg17[%c0_25, %c0_26] : memref<1x32xf32, #tpu.memory_space<vmem>>, vector<1x32xf32>
      %c0_27 = arith.constant 0 : index
      %c0_28 = arith.constant 0 : index
      %33 = vector.load %arg18[%c0_27, %c0_28] : memref<1x32xf32, #tpu.memory_space<vmem>>, vector<1x32xf32>
      %cst_29 = arith.constant dense<0.000000e+00> : vector<8xf32>
      %34 = vector.multi_reduction <add>, %31, %cst_29 [1] : vector<8x32xf32> to vector<8xf32>
      %35 = vector.shape_cast %34 : vector<8xf32> to vector<8x1xf32>
      %cst_30 = arith.constant 3.200000e+01 : f32
      %36 = vector.broadcast %cst_30 : f32 to vector<8x1xf32>
      %37 = arith.divf %35, %36 : vector<8x1xf32>
      %38 = vector.broadcast %37 : vector<8x1xf32> to vector<8x32xf32>
      %39 = arith.subf %31, %38 : vector<8x32xf32>
      %40 = arith.mulf %39, %39 : vector<8x32xf32>
      %cst_31 = arith.constant dense<0.000000e+00> : vector<8xf32>
      %41 = vector.multi_reduction <add>, %40, %cst_31 [1] : vector<8x32xf32> to vector<8xf32>
      %42 = vector.shape_cast %41 : vector<8xf32> to vector<8x1xf32>
      %cst_32 = arith.constant 3.200000e+01 : f32
      %43 = vector.broadcast %cst_32 : f32 to vector<8x1xf32>
      %44 = arith.divf %42, %43 : vector<8x1xf32>
      %45 = vector.broadcast %37 : vector<8x1xf32> to vector<8x32xf32>
      %46 = arith.subf %31, %45 : vector<8x32xf32>
      %cst_33 = arith.constant 9.99999974E-6 : f32
      %47 = vector.broadcast %cst_33 : f32 to vector<8x1xf32>
      %48 = arith.addf %44, %47 : vector<8x1xf32>
      %49 = math.rsqrt %48 : vector<8x1xf32>
      %50 = vector.broadcast %49 : vector<8x1xf32> to vector<8x32xf32>
      %51 = arith.mulf %46, %50 : vector<8x32xf32>
      %52 = vector.broadcast %32 : vector<1x32xf32> to vector<8x32xf32>
      %53 = arith.mulf %51, %52 : vector<8x32xf32>
      %54 = vector.broadcast %33 : vector<1x32xf32> to vector<8x32xf32>
      %55 = arith.addf %53, %54 : vector<8x32xf32>
      %c0_34 = arith.constant 0 : index
      %c0_35 = arith.constant 0 : index
      %c0_36 = arith.constant 0 : index
      %56 = vector.load %arg19[%c0_34, %c0_35, %c0_36] : memref<1x8x32xf32, #tpu.memory_space<vmem>>, vector<1x8x32xf32>
      %57 = vector.shape_cast %56 : vector<1x8x32xf32> to vector<8x32xf32>
      %58 = vector.shape_cast %55 : vector<8x32xf32> to vector<1x8x32xf32>
      tpu.vector_store %arg19[%c0_34, %c0_35, %c0_36], %58 {strides = array<i32>} : memref<1x8x32xf32, #tpu.memory_space<vmem>>, vector<1x8x32xf32>,
    } else {
    }
    return
  }
  func.func @transform_0(%arg0: i32, %arg1: i32, %arg2: i32) -> (i32, i32, i32) {
    %c0_i32 = arith.constant 0 : i32
    %c0_i32_0 = arith.constant 0 : i32
    return %arg0, %arg1, %c0_i32 : i32, i32, i32
  }
  func.func @transform_1(%arg0: i32, %arg1: i32, %arg2: i32) -> (i32, i32, i32) {
    %c0_i32 = arith.constant 0 : i32
    %c0_i32_0 = arith.constant 0 : i32
    %c0_i32_1 = arith.constant 0 : i32
    return %arg0, %c0_i32, %c0_i32_0 : i32, i32, i32
  }
  func.func @transform_2(%arg0: i32, %arg1: i32, %arg2: i32) -> (i32, i32) {
    %c0_i32 = arith.constant 0 : i32
    %c0_i32_0 = arith.constant 0 : i32
    %c0_i32_1 = arith.constant 0 : i32
    return %c0_i32, %c0_i32_0 : i32, i32
  }
  func.func @transform_3(%arg0: i32, %arg1: i32, %arg2: i32) -> (i32, i32) {
    %c0_i32 = arith.constant 0 : i32
    %c0_i32_0 = arith.constant 0 : i32
    %c0_i32_1 = arith.constant 0 : i32
    return %c0_i32, %c0_i32_0 : i32, i32
  }
  func.func @transform_4(%arg0: i32, %arg1: i32, %arg2: i32) -> (i32, i32) {
    %c0_i32 = arith.constant 0 : i32
    %c0_i32_0 = arith.constant 0 : i32
    %c0_i32_1 = arith.constant 0 : i32
    return %c0_i32, %c0_i32_0 : i32, i32
  }
  func.func @transform_5(%arg0: i32, %arg1: i32, %arg2: i32) -> (i32, i32) {
    %c0_i32 = arith.constant 0 : i32
    %c0_i32_0 = arith.constant 0 : i32
    %c0_i32_1 = arith.constant 0 : i32
    return %c0_i32, %c0_i32_0 : i32, i32
  }
  func.func @transform_6(%arg0: i32, %arg1: i32, %arg2: i32) -> (i32, i32) {
    %c0_i32 = arith.constant 0 : i32
    %c0_i32_0 = arith.constant 0 : i32
    %c0_i32_1 = arith.constant 0 : i32
    return %c0_i32, %c0_i32_0 : i32, i32
  }
  func.func @transform_7(%arg0: i32, %arg1: i32, %arg2: i32) -> (i32, i32) {
    %c0_i32 = arith.constant 0 : i32
    %c0_i32_0 = arith.constant 0 : i32
    %c0_i32_1 = arith.constant 0 : i32
    return %c0_i32, %c0_i32_0 : i32, i32
  }
  func.func @transform_8(%arg0: i32, %arg1: i32, %arg2: i32) -> (i32, i32) {
    %c0_i32 = arith.constant 0 : i32
    %c0_i32_0 = arith.constant 0 : i32
    return %c0_i32, %arg2 : i32, i32
  }
  func.func @transform_9(%arg0: i32, %arg1: i32, %arg2: i32) -> (i32, i32) {
    %c0_i32 = arith.constant 0 : i32
    %c0_i32_0 = arith.constant 0 : i32
    return %c0_i32, %arg2 : i32, i32
  }
  func.func @transform_10(%arg0: i32, %arg1: i32, %arg2: i32) -> (i32, i32) {
    %c0_i32 = arith.constant 0 : i32
    %c0_i32_0 = arith.constant 0 : i32
    return %arg2, %c0_i32 : i32, i32
  }
  func.func @transform_11(%arg0: i32, %arg1: i32, %arg2: i32) -> (i32, i32) {
    %c0_i32 = arith.constant 0 : i32
    %c0_i32_0 = arith.constant 0 : i32
    %c0_i32_1 = arith.constant 0 : i32
    return %c0_i32, %c0_i32_0 : i32, i32
  }
  func.func @transform_12(%arg0: i32, %arg1: i32, %arg2: i32) -> (i32, i32) {
    %c0_i32 = arith.constant 0 : i32
    %c0_i32_0 = arith.constant 0 : i32
    %c0_i32_1 = arith.constant 0 : i32
    return %c0_i32, %c0_i32_0 : i32, i32
  }
  func.func @transform_13(%arg0: i32, %arg1: i32, %arg2: i32) -> (i32, i32) {
    %c0_i32 = arith.constant 0 : i32
    %c0_i32_0 = arith.constant 0 : i32
    %c0_i32_1 = arith.constant 0 : i32
    return %c0_i32, %c0_i32_0 : i32, i32
  }
  func.func @transform_14(%arg0: i32, %arg1: i32, %arg2: i32) -> (i32, i32) {
    %c0_i32 = arith.constant 0 : i32
    %c0_i32_0 = arith.constant 0 : i32
    %c0_i32_1 = arith.constant 0 : i32
    return %c0_i32, %c0_i32_0 : i32, i32
  }
  func.func @transform_15(%arg0: i32, %arg1: i32, %arg2: i32) -> (i32, i32) {
    %c0_i32 = arith.constant 0 : i32
    %c0_i32_0 = arith.constant 0 : i32
    %c0_i32_1 = arith.constant 0 : i32
    return %c0_i32, %c0_i32_0 : i32, i32
  }
  func.func @transform_16(%arg0: i32, %arg1: i32, %arg2: i32) -> (i32, i32, i32) {
    %c0_i32 = arith.constant 0 : i32
    %c0_i32_0 = arith.constant 0 : i32
    return %arg0, %arg1, %c0_i32 : i32, i32, i32
  }
}

module attributes {stable_mosaic.version = 11 : i64} {
  func.func @kernel(%arg0: i32, %arg1: i32, %arg2: i32, %arg3: memref<1x8x32xf32, #tpu.memory_space<vmem>>, %arg4: memref<1x8x32xf32, #tpu.memory_space<vmem>>, %arg5: memref<32x32xbf16, #tpu.memory_space<vmem>>, %arg6: memref<1x32xf32, #tpu.memory_space<vmem>>, %arg7: memref<32x64xbf16, #tpu.memory_space<vmem>>, %arg8: memref<1x64xf32, #tpu.memory_space<vmem>>, %arg9: memref<32x32xbf16, #tpu.memory_space<vmem>>, %arg10: memref<1x32xf32, #tpu.memory_space<vmem>>, %arg11: memref<32x64xbf16, #tpu.memory_space<vmem>>, %arg12: memref<1x64xf32, #tpu.memory_space<vmem>>, %arg13: memref<64x32xbf16, #tpu.memory_space<vmem>>, %arg14: memref<1x32xf32, #tpu.memory_space<vmem>>, %arg15: memref<1x32xf32, #tpu.memory_space<vmem>>, %arg16: memref<1x32xf32, #tpu.memory_space<vmem>>, %arg17: memref<1x32xf32, #tpu.memory_space<vmem>>, %arg18: memref<1x32xf32, #tpu.memory_space<vmem>>, %arg19: memref<1x8x32xf32, #tpu.memory_space<vmem>>, %arg20: memref<4x8x8xbf16, #tpu.memory_space<vmem>>, %arg21: memref<4x8x8xbf16, #tpu.memory_space<vmem>>, %arg22: memref<8x32xf32, #tpu.memory_space<vmem>>, %arg23: memref<8x32xf32, #tpu.memory_space<vmem>>) attributes {dimension_semantics = [#tpu.dimension_semantics<parallel>, #tpu.dimension_semantics<arbitrary>, #tpu.dimension_semantics<arbitrary>], iteration_bounds = array<i64: 2, 1, 1>, scalar_prefetch = 0 : i64, scratch_operands = 4 : i64, tpu.core_type = #tpu.core_type<tc>, window_params = [{transform_indices = @transform_0, window_bounds = array<i64: 1, 8, 32>}, {transform_indices = @transform_1, window_bounds = array<i64: 1, 8, 32>}, {pipeline_mode = #tpu.pipeline_mode<synchronous>, transform_indices = @transform_2, window_bounds = array<i64: 32, 32>}, {pipeline_mode = #tpu.pipeline_mode<synchronous>, transform_indices = @transform_3, window_bounds = array<i64: 1, 32>}, {pipeline_mode = #tpu.pipeline_mode<synchronous>, transform_indices = @transform_4, window_bounds = array<i64: 32, 64>}, {pipeline_mode = #tpu.pipeline_mode<synchronous>, transform_indices = @transform_5, window_bounds = array<i64: 1, 64>}, {pipeline_mode = #tpu.pipeline_mode<synchronous>, transform_indices = @transform_6, window_bounds = array<i64: 32, 32>}, {pipeline_mode = #tpu.pipeline_mode<synchronous>, transform_indices = @transform_7, window_bounds = array<i64: 1, 32>}, {transform_indices = @transform_8, window_bounds = array<i64: 32, 64>}, {transform_indices = @transform_9, window_bounds = array<i64: 1, 64>}, {transform_indices = @transform_10, window_bounds = array<i64: 64, 32>}, {pipeline_mode = #tpu.pipeline_mode<synchronous>, transform_indices = @transform_11, window_bounds = array<i64: 1, 32>}, {pipeline_mode = #tpu.pipeline_mode<synchronous>, transform_indices = @transform_12, window_bounds = array<i64: 1, 32>}, {pipeline_mode = #tpu.pipeline_mode<synchronous>, transform_indices = @transform_13, window_bounds = array<i64: 1, 32>}, {pipeline_mode = #tpu.pipeline_mode<synchronous>, transform_indices = @transform_14, window_bounds = array<i64: 1, 32>}, {pipeline_mode = #tpu.pipeline_mode<synchronous>, transform_indices = @transform_15, window_bounds = array<i64: 1, 32>}, {transform_indices = @transform_16, window_bounds = array<i64: 1, 8, 32>}]} {
    %c0_i32 = arith.constant 0 : i32
    %0 = arith.cmpi eq, %arg1, %c0_i32 : i32
    %c0_i32_0 = arith.constant 0 : i32
    %1 = arith.cmpi eq, %arg2, %c0_i32_0 : i32
    %2 = arith.andi %0, %1 : i1
    %3 = arith.extui %2 : i1 to i32
    %c0_i32_1 = arith.constant 0 : i32
    %4 = arith.cmpi ne, %3, %c0_i32_1 : i32
    scf.if %4 {
      %c0_19 = arith.constant 0 : index
      %c0_20 = arith.constant 0 : index
      %c0_21 = arith.constant 0 : index
      %26 = vector.load %arg4[%c0_19, %c0_20, %c0_21] : memref<1x8x32xf32, #tpu.memory_space<vmem>>, vector<1x8x32xf32>
      %27 = vector.shape_cast %26 : vector<1x8x32xf32> to vector<8x32xf32>
      %c0_22 = arith.constant 0 : index
      %c0_23 = arith.constant 0 : index
      %28 = vector.load %arg7[%c0_22, %c0_23] : memref<32x64xbf16, #tpu.memory_space<vmem>>, vector<32x64xbf16>
      %29 = arith.truncf %27 : vector<8x32xf32> to vector<8x32xbf16>
      %cst_24 = arith.constant dense<0.000000e+00> : vector<8x64xf32>
      %30 = tpu.matmul %29, %28, %cst_24 {dimension_numbers = #tpu.dot_dimension_numbers<[1], [0], [0], [1], [0, 0, 1, 1], [], []>} : vector<8x32xbf16>, vector<32x64xbf16>, vector<8x64xf32> -> vector<8x64xf32>
      %c0_25 = arith.constant 0 : index
      %c0_26 = arith.constant 0 : index
      %31 = vector.load %arg8[%c0_25, %c0_26] : memref<1x64xf32, #tpu.memory_space<vmem>>, vector<1x64xf32>
      %32 = vector.broadcast %31 : vector<1x64xf32> to vector<8x64xf32>
      %33 = arith.addf %30, %32 : vector<8x64xf32>
      %34 = vector.extract_strided_slice %33 {offsets = [0, 0], sizes = [8, 32], strides = [1, 1]} : vector<8x64xf32> to vector<8x32xf32>
      %35 = vector.shape_cast %34 : vector<8x32xf32> to vector<8x4x8xf32>
      %36 = vector.extract_strided_slice %33 {offsets = [0, 32], sizes = [8, 32], strides = [1, 1]} : vector<8x64xf32> to vector<8x32xf32>
      %37 = vector.shape_cast %36 : vector<8x32xf32> to vector<8x4x8xf32>
      %38 = tpu.transpose %35, [1, 0, 2] : vector<8x4x8xf32> -> vector<4x8x8xf32>
      %39 = arith.truncf %38 : vector<4x8x8xf32> to vector<4x8x8xbf16>
      %c0_27 = arith.constant 0 : index
      %c0_28 = arith.constant 0 : index
      %c0_29 = arith.constant 0 : index
      %40 = vector.load %arg20[%c0_27, %c0_28, %c0_29] : memref<4x8x8xbf16, #tpu.memory_space<vmem>>, vector<4x8x8xbf16>
      tpu.vector_store %arg20[%c0_27, %c0_28, %c0_29], %39 {strides = array<i32>} : memref<4x8x8xbf16, #tpu.memory_space<vmem>>, vector<4x8x8xbf16>,
      %41 = tpu.transpose %37, [1, 0, 2] : vector<8x4x8xf32> -> vector<4x8x8xf32>
      %42 = arith.truncf %41 : vector<4x8x8xf32> to vector<4x8x8xbf16>
      %c0_30 = arith.constant 0 : index
      %c0_31 = arith.constant 0 : index
      %c0_32 = arith.constant 0 : index
      %43 = vector.load %arg21[%c0_30, %c0_31, %c0_32] : memref<4x8x8xbf16, #tpu.memory_space<vmem>>, vector<4x8x8xbf16>
      tpu.vector_store %arg21[%c0_30, %c0_31, %c0_32], %42 {strides = array<i32>} : memref<4x8x8xbf16, #tpu.memory_space<vmem>>, vector<4x8x8xbf16>,
    } else {
    }
    %c0_i32_2 = arith.constant 0 : i32
    %5 = arith.cmpi eq, %arg2, %c0_i32_2 : i32
    %6 = arith.extui %5 : i1 to i32
    %c0_i32_3 = arith.constant 0 : i32
    %7 = arith.cmpi ne, %6, %c0_i32_3 : i32
    scf.if %7 {
      %c0_19 = arith.constant 0 : index
      %c0_20 = arith.constant 0 : index
      %c0_21 = arith.constant 0 : index
      %26 = vector.load %arg3[%c0_19, %c0_20, %c0_21] : memref<1x8x32xf32, #tpu.memory_space<vmem>>, vector<1x8x32xf32>
      %27 = vector.shape_cast %26 : vector<1x8x32xf32> to vector<8x32xf32>
      %c0_22 = arith.constant 0 : index
      %c0_23 = arith.constant 0 : index
      %28 = vector.load %arg5[%c0_22, %c0_23] : memref<32x32xbf16, #tpu.memory_space<vmem>>, vector<32x32xbf16>
      %29 = arith.truncf %27 : vector<8x32xf32> to vector<8x32xbf16>
      %cst_24 = arith.constant dense<0.000000e+00> : vector<8x32xf32>
      %30 = tpu.matmul %29, %28, %cst_24 {dimension_numbers = #tpu.dot_dimension_numbers<[1], [0], [0], [1], [0, 0, 1, 1], [], []>} : vector<8x32xbf16>, vector<32x32xbf16>, vector<8x32xf32> -> vector<8x32xf32>
      %c0_25 = arith.constant 0 : index
      %c0_26 = arith.constant 0 : index
      %31 = vector.load %arg6[%c0_25, %c0_26] : memref<1x32xf32, #tpu.memory_space<vmem>>, vector<1x32xf32>
      %32 = vector.broadcast %31 : vector<1x32xf32> to vector<8x32xf32>
      %33 = arith.addf %30, %32 : vector<8x32xf32>
      %cst_27 = arith.constant 0.353553385 : f32
      %34 = vector.broadcast %cst_27 : f32 to vector<8x32xf32>
      %35 = arith.mulf %33, %34 : vector<8x32xf32>
      %36 = vector.shape_cast %35 : vector<8x32xf32> to vector<8x4x8xf32>
      %37 = tpu.transpose %36, [1, 0, 2] : vector<8x4x8xf32> -> vector<4x8x8xf32>
      %38 = arith.truncf %37 : vector<4x8x8xf32> to vector<4x8x8xbf16>
      %cst_28 = arith.constant 0xFF800000 : f32
      %39 = vector.broadcast %cst_28 : f32 to vector<4x8x1xf32>
      %cst_29 = arith.constant 0.000000e+00 : f32
      %40 = vector.broadcast %cst_29 : f32 to vector<4x8x1xf32>
      %cst_30 = arith.constant 0.000000e+00 : f32
      %41 = vector.broadcast %cst_30 : f32 to vector<4x8x8xf32>
      %c0_31 = arith.constant 0 : index
      %c0_32 = arith.constant 0 : index
      %c0_33 = arith.constant 0 : index
      %42 = vector.load %arg20[%c0_31, %c0_32, %c0_33] : memref<4x8x8xbf16, #tpu.memory_space<vmem>>, vector<4x8x8xbf16>
      %c0_34 = arith.constant 0 : index
      %c0_35 = arith.constant 0 : index
      %c0_36 = arith.constant 0 : index
      %43 = vector.load %arg21[%c0_34, %c0_35, %c0_36] : memref<4x8x8xbf16, #tpu.memory_space<vmem>>, vector<4x8x8xbf16>
      "tpu.trace_start"() <{level = 10 : i32, message = "hqd,hkd->hqk"}> : () -> ()
      %cst_37 = arith.constant dense<0.000000e+00> : vector<4x8x8xf32>
      %44 = tpu.matmul %38, %42, %cst_37 {dimension_numbers = #tpu.dot_dimension_numbers<[2], [2], [1], [1], [0, 0, 0, 1, 1, 1], [0], [0]>} : vector<4x8x8xbf16>, vector<4x8x8xbf16>, vector<4x8x8xf32> -> vector<4x8x8xf32>
      "tpu.trace_stop"() : () -> ()
      %cst_38 = arith.constant dense<0xFF800000> : vector<4x8xf32>
      %45 = vector.multi_reduction <maximumf>, %44, %cst_38 [2] : vector<4x8x8xf32> to vector<4x8xf32>
      %46 = vector.shape_cast %45 : vector<4x8xf32> to vector<4x8x1xf32>
      %47 = arith.maximumf %39, %46 : vector<4x8x1xf32>
      %48 = arith.subf %39, %47 : vector<4x8x1xf32>
      %49 = math.exp %48 : vector<4x8x1xf32>
      %50 = vector.broadcast %47 : vector<4x8x1xf32> to vector<4x8x8xf32>
      %51 = arith.subf %44, %50 : vector<4x8x8xf32>
      %52 = math.exp %51 : vector<4x8x8xf32>
      %53 = arith.mulf %49, %40 : vector<4x8x1xf32>
      %cst_39 = arith.constant dense<0.000000e+00> : vector<4x8xf32>
      %54 = vector.multi_reduction <add>, %52, %cst_39 [2] : vector<4x8x8xf32> to vector<4x8xf32>
      %55 = vector.shape_cast %54 : vector<4x8xf32> to vector<4x8x1xf32>
      %56 = arith.addf %53, %55 : vector<4x8x1xf32>
      %57 = vector.broadcast %49 : vector<4x8x1xf32> to vector<4x8x8xf32>
      %58 = arith.mulf %57, %41 : vector<4x8x8xf32>
      %59 = arith.truncf %52 : vector<4x8x8xf32> to vector<4x8x8xbf16>
      "tpu.trace_start"() <{level = 10 : i32, message = "hqk,hkd->hqd"}> : () -> ()
      %cst_40 = arith.constant dense<0.000000e+00> : vector<4x8x8xf32>
      %60 = tpu.matmul %59, %43, %cst_40 {dimension_numbers = #tpu.dot_dimension_numbers<[2], [1], [1], [2], [0, 0, 0, 1, 1, 2], [0], [0]>} : vector<4x8x8xbf16>, vector<4x8x8xbf16>, vector<4x8x8xf32> -> vector<4x8x8xf32>
      "tpu.trace_stop"() : () -> ()
      %61 = arith.addf %58, %60 : vector<4x8x8xf32>
      %62 = tpu.reciprocal %56 {approx = true} : vector<4x8x1xf32> -> vector<4x8x1xf32>
      %63 = vector.broadcast %62 : vector<4x8x1xf32> to vector<4x8x8xf32>
      %64 = arith.mulf %61, %63 : vector<4x8x8xf32>
      %65 = tpu.transpose %64, [1, 0, 2] : vector<4x8x8xf32> -> vector<8x4x8xf32>
      %66 = vector.shape_cast %65 : vector<8x4x8xf32> to vector<8x32xf32>
      %c0_41 = arith.constant 0 : index
      %c0_42 = arith.constant 0 : index
      %67 = vector.load %arg9[%c0_41, %c0_42] : memref<32x32xbf16, #tpu.memory_space<vmem>>, vector<32x32xbf16>
      %68 = arith.truncf %66 : vector<8x32xf32> to vector<8x32xbf16>
      %cst_43 = arith.constant dense<0.000000e+00> : vector<8x32xf32>
      %69 = tpu.matmul %68, %67, %cst_43 {dimension_numbers = #tpu.dot_dimension_numbers<[1], [0], [0], [1], [0, 0, 1, 1], [], []>} : vector<8x32xbf16>, vector<32x32xbf16>, vector<8x32xf32> -> vector<8x32xf32>
      %c0_44 = arith.constant 0 : index
      %c0_45 = arith.constant 0 : index
      %70 = vector.load %arg10[%c0_44, %c0_45] : memref<1x32xf32, #tpu.memory_space<vmem>>, vector<1x32xf32>
      %71 = vector.broadcast %70 : vector<1x32xf32> to vector<8x32xf32>
      %72 = arith.addf %69, %71 : vector<8x32xf32>
      %73 = arith.addf %27, %72 : vector<8x32xf32>
      %c0_46 = arith.constant 0 : index
      %c0_47 = arith.constant 0 : index
      %74 = vector.load %arg15[%c0_46, %c0_47] : memref<1x32xf32, #tpu.memory_space<vmem>>, vector<1x32xf32>
      %c0_48 = arith.constant 0 : index
      %c0_49 = arith.constant 0 : index
      %75 = vector.load %arg16[%c0_48, %c0_49] : memref<1x32xf32, #tpu.memory_space<vmem>>, vector<1x32xf32>
      %cst_50 = arith.constant dense<0.000000e+00> : vector<8xf32>
      %76 = vector.multi_reduction <add>, %73, %cst_50 [1] : vector<8x32xf32> to vector<8xf32>
      %77 = vector.shape_cast %76 : vector<8xf32> to vector<8x1xf32>
      %cst_51 = arith.constant 3.200000e+01 : f32
      %78 = vector.broadcast %cst_51 : f32 to vector<8x1xf32>
      %79 = arith.divf %77, %78 : vector<8x1xf32>
      %80 = vector.broadcast %79 : vector<8x1xf32> to vector<8x32xf32>
      %81 = arith.subf %73, %80 : vector<8x32xf32>
      %82 = arith.mulf %81, %81 : vector<8x32xf32>
      %cst_52 = arith.constant dense<0.000000e+00> : vector<8xf32>
      %83 = vector.multi_reduction <add>, %82, %cst_52 [1] : vector<8x32xf32> to vector<8xf32>
      %84 = vector.shape_cast %83 : vector<8xf32> to vector<8x1xf32>
      %cst_53 = arith.constant 3.200000e+01 : f32
      %85 = vector.broadcast %cst_53 : f32 to vector<8x1xf32>
      %86 = arith.divf %84, %85 : vector<8x1xf32>
      %87 = vector.broadcast %79 : vector<8x1xf32> to vector<8x32xf32>
      %88 = arith.subf %73, %87 : vector<8x32xf32>
      %cst_54 = arith.constant 9.99999974E-6 : f32
      %89 = vector.broadcast %cst_54 : f32 to vector<8x1xf32>
      %90 = arith.addf %86, %89 : vector<8x1xf32>
      %91 = math.rsqrt %90 : vector<8x1xf32>
      %92 = vector.broadcast %91 : vector<8x1xf32> to vector<8x32xf32>
      %93 = arith.mulf %88, %92 : vector<8x32xf32>
      %94 = vector.broadcast %74 : vector<1x32xf32> to vector<8x32xf32>
      %95 = arith.mulf %93, %94 : vector<8x32xf32>
      %96 = vector.broadcast %75 : vector<1x32xf32> to vector<8x32xf32>
      %97 = arith.addf %95, %96 : vector<8x32xf32>
      %c0_55 = arith.constant 0 : index
      %c0_56 = arith.constant 0 : index
      %98 = vector.load %arg22[%c0_55, %c0_56] : memref<8x32xf32, #tpu.memory_space<vmem>>, vector<8x32xf32>
      tpu.vector_store %arg22[%c0_55, %c0_56], %97 {strides = array<i32>} : memref<8x32xf32, #tpu.memory_space<vmem>>, vector<8x32xf32>,
      %cst_57 = arith.constant 0.000000e+00 : f32
      %99 = vector.broadcast %cst_57 : f32 to vector<8x32xf32>
      %c0_58 = arith.constant 0 : index
      %c0_59 = arith.constant 0 : index
      %100 = vector.load %arg23[%c0_58, %c0_59] : memref<8x32xf32, #tpu.memory_space<vmem>>, vector<8x32xf32>
      tpu.vector_store %arg23[%c0_58, %c0_59], %99 {strides = array<i32>} : memref<8x32xf32, #tpu.memory_space<vmem>>, vector<8x32xf32>,
    } else {
    }
    %c0 = arith.constant 0 : index
    %c0_4 = arith.constant 0 : index
    %8 = vector.load %arg22[%c0, %c0_4] : memref<8x32xf32, #tpu.memory_space<vmem>>, vector<8x32xf32>
    %c0_5 = arith.constant 0 : index
    %c0_6 = arith.constant 0 : index
    %9 = vector.load %arg11[%c0_5, %c0_6] : memref<32x64xbf16, #tpu.memory_space<vmem>>, vector<32x64xbf16>
    %10 = arith.truncf %8 : vector<8x32xf32> to vector<8x32xbf16>
    %cst = arith.constant dense<0.000000e+00> : vector<8x64xf32>
    %11 = tpu.matmul %10, %9, %cst {dimension_numbers = #tpu.dot_dimension_numbers<[1], [0], [0], [1], [0, 0, 1, 1], [], []>} : vector<8x32xbf16>, vector<32x64xbf16>, vector<8x64xf32> -> vector<8x64xf32>
    %c0_7 = arith.constant 0 : index
    %c0_8 = arith.constant 0 : index
    %12 = vector.load %arg12[%c0_7, %c0_8] : memref<1x64xf32, #tpu.memory_space<vmem>>, vector<1x64xf32>
    %13 = vector.broadcast %12 : vector<1x64xf32> to vector<8x64xf32>
    %14 = arith.addf %11, %13 : vector<8x64xf32>
    %cst_9 = arith.constant 0.000000e+00 : f32
    %15 = vector.broadcast %cst_9 : f32 to vector<8x64xf32>
    %16 = arith.maximumf %14, %15 : vector<8x64xf32>
    %c0_10 = arith.constant 0 : index
    %c0_11 = arith.constant 0 : index
    %17 = vector.load %arg23[%c0_10, %c0_11] : memref<8x32xf32, #tpu.memory_space<vmem>>, vector<8x32xf32>
    %c0_12 = arith.constant 0 : index
    %c0_13 = arith.constant 0 : index
    %18 = vector.load %arg13[%c0_12, %c0_13] : memref<64x32xbf16, #tpu.memory_space<vmem>>, vector<64x32xbf16>
    %19 = arith.truncf %16 : vector<8x64xf32> to vector<8x64xbf16>
    %cst_14 = arith.constant dense<0.000000e+00> : vector<8x32xf32>
    %20 = tpu.matmul %19, %18, %cst_14 {dimension_numbers = #tpu.dot_dimension_numbers<[1], [0], [0], [1], [0, 0, 1, 1], [], []>} : vector<8x64xbf16>, vector<64x32xbf16>, vector<8x32xf32> -> vector<8x32xf32>
    %21 = arith.addf %17, %20 : vector<8x32xf32>
    %c0_15 = arith.constant 0 : index
    %c0_16 = arith.constant 0 : index
    %22 = vector.load %arg23[%c0_15, %c0_16] : memref<8x32xf32, #tpu.memory_space<vmem>>, vector<8x32xf32>
    tpu.vector_store %arg23[%c0_15, %c0_16], %21 {strides = array<i32>} : memref<8x32xf32, #tpu.memory_space<vmem>>, vector<8x32xf32>,
    %c0_i32_17 = arith.constant 0 : i32
    %23 = arith.cmpi eq, %arg2, %c0_i32_17 : i32
    %24 = arith.extui %23 : i1 to i32
    %c0_i32_18 = arith.constant 0 : i32
    %25 = arith.cmpi ne, %24, %c0_i32_18 : i32
    scf.if %25 {
      %c0_19 = arith.constant 0 : index
      %c0_20 = arith.constant 0 : index
      %26 = vector.load %arg23[%c0_19, %c0_20] : memref<8x32xf32, #tpu.memory_space<vmem>>, vector<8x32xf32>
      %c0_21 = arith.constant 0 : index
      %c0_22 = arith.constant 0 : index
      %27 = vector.load %arg14[%c0_21, %c0_22] : memref<1x32xf32, #tpu.memory_space<vmem>>, vector<1x32xf32>
      %28 = vector.broadcast %27 : vector<1x32xf32> to vector<8x32xf32>
      %29 = arith.addf %26, %28 : vector<8x32xf32>
      %c0_23 = arith.constant 0 : index
      %c0_24 = arith.constant 0 : index
      %30 = vector.load %arg22[%c0_23, %c0_24] : memref<8x32xf32, #tpu.memory_space<vmem>>, vector<8x32xf32>
      %31 = arith.addf %30, %29 : vector<8x32xf32>
      %c0_25 = arith.constant 0 : index
      %c0_26 = arith.constant 0 : index
      %32 = vector.load %arg17[%c0_25, %c0_26] : memref<1x32xf32, #tpu.memory_space<vmem>>, vector<1x32xf32>
      %c0_27 = arith.constant 0 : index
      %c0_28 = arith.constant 0 : index
      %33 = vector.load %arg18[%c0_27, %c0_28] : memref<1x32xf32, #tpu.memory_space<vmem>>, vector<1x32xf32>
      %cst_29 = arith.constant dense<0.000000e+00> : vector<8xf32>
      %34 = vector.multi_reduction <add>, %31, %cst_29 [1] : vector<8x32xf32> to vector<8xf32>
      %35 = vector.shape_cast %34 : vector<8xf32> to vector<8x1xf32>
      %cst_30 = arith.constant 3.200000e+01 : f32
      %36 = vector.broadcast %cst_30 : f32 to vector<8x1xf32>
      %37 = arith.divf %35, %36 : vector<8x1xf32>
      %38 = vector.broadcast %37 : vector<8x1xf32> to vector<8x32xf32>
      %39 = arith.subf %31, %38 : vector<8x32xf32>
      %40 = arith.mulf %39, %39 : vector<8x32xf32>
      %cst_31 = arith.constant dense<0.000000e+00> : vector<8xf32>
      %41 = vector.multi_reduction <add>, %40, %cst_31 [1] : vector<8x32xf32> to vector<8xf32>
      %42 = vector.shape_cast %41 : vector<8xf32> to vector<8x1xf32>
      %cst_32 = arith.constant 3.200000e+01 : f32
      %43 = vector.broadcast %cst_32 : f32 to vector<8x1xf32>
      %44 = arith.divf %42, %43 : vector<8x1xf32>
      %45 = vector.broadcast %37 : vector<8x1xf32> to vector<8x32xf32>
      %46 = arith.subf %31, %45 : vector<8x32xf32>
      %cst_33 = arith.constant 9.99999974E-6 : f32
      %47 = vector.broadcast %cst_33 : f32 to vector<8x1xf32>
      %48 = arith.addf %44, %47 : vector<8x1xf32>
      %49 = math.rsqrt %48 : vector<8x1xf32>
      %50 = vector.broadcast %49 : vector<8x1xf32> to vector<8x32xf32>
      %51 = arith.mulf %46, %50 : vector<8x32xf32>
      %52 = vector.broadcast %32 : vector<1x32xf32> to vector<8x32xf32>
      %53 = arith.mulf %51, %52 : vector<8x32xf32>
      %54 = vector.broadcast %33 : vector<1x32xf32> to vector<8x32xf32>
      %55 = arith.addf %53, %54 : vector<8x32xf32>
      %c0_34 = arith.constant 0 : index
      %c0_35 = arith.constant 0 : index
      %c0_36 = arith.constant 0 : index
      %56 = vector.load %arg19[%c0_34, %c0_35, %c0_36] : memref<1x8x32xf32, #tpu.memory_space<vmem>>, vector<1x8x32xf32>
      %57 = vector.shape_cast %56 : vector<1x8x32xf32> to vector<8x32xf32>
      %58 = vector.shape_cast %55 : vector<8x32xf32> to vector<1x8x32xf32>
      tpu.vector_store %arg19[%c0_34, %c0_35, %c0_36], %58 {strides = array<i32>} : memref<1x8x32xf32, #tpu.memory_space<vmem>>, vector<1x8x32xf32>,
    } else {
    }
    return
  }
  func.func @transform_0(%arg0: i32, %arg1: i32, %arg2: i32) -> (i32, i32, i32) {
    %c0_i32 = arith.constant 0 : i32
    %c0_i32_0 = arith.constant 0 : i32
    return %arg0, %arg1, %c0_i32 : i32, i32, i32
  }
  func.func @transform_1(%arg0: i32, %arg1: i32, %arg2: i32) -> (i32, i32, i32) {
    %c0_i32 = arith.constant 0 : i32
    %c0_i32_0 = arith.constant 0 : i32
    %c0_i32_1 = arith.constant 0 : i32
    return %arg0, %c0_i32, %c0_i32_0 : i32, i32, i32
  }
  func.func @transform_2(%arg0: i32, %arg1: i32, %arg2: i32) -> (i32, i32) {
    %c0_i32 = arith.constant 0 : i32
    %c0_i32_0 = arith.constant 0 : i32
    %c0_i32_1 = arith.constant 0 : i32
    return %c0_i32, %c0_i32_0 : i32, i32
  }
  func.func @transform_3(%arg0: i32, %arg1: i32, %arg2: i32) -> (i32, i32) {
    %c0_i32 = arith.constant 0 : i32
    %c0_i32_0 = arith.constant 0 : i32
    %c0_i32_1 = arith.constant 0 : i32
    return %c0_i32, %c0_i32_0 : i32, i32
  }
  func.func @transform_4(%arg0: i32, %arg1: i32, %arg2: i32) -> (i32, i32) {
    %c0_i32 = arith.constant 0 : i32
    %c0_i32_0 = arith.constant 0 : i32
    %c0_i32_1 = arith.constant 0 : i32
    return %c0_i32, %c0_i32_0 : i32, i32
  }
  func.func @transform_5(%arg0: i32, %arg1: i32, %arg2: i32) -> (i32, i32) {
    %c0_i32 = arith.constant 0 : i32
    %c0_i32_0 = arith.constant 0 : i32
    %c0_i32_1 = arith.constant 0 : i32
    return %c0_i32, %c0_i32_0 : i32, i32
  }
  func.func @transform_6(%arg0: i32, %arg1: i32, %arg2: i32) -> (i32, i32) {
    %c0_i32 = arith.constant 0 : i32
    %c0_i32_0 = arith.constant 0 : i32
    %c0_i32_1 = arith.constant 0 : i32
    return %c0_i32, %c0_i32_0 : i32, i32
  }
  func.func @transform_7(%arg0: i32, %arg1: i32, %arg2: i32) -> (i32, i32) {
    %c0_i32 = arith.constant 0 : i32
    %c0_i32_0 = arith.constant 0 : i32
    %c0_i32_1 = arith.constant 0 : i32
    return %c0_i32, %c0_i32_0 : i32, i32
  }
  func.func @transform_8(%arg0: i32, %arg1: i32, %arg2: i32) -> (i32, i32) {
    %c0_i32 = arith.constant 0 : i32
    %c0_i32_0 = arith.constant 0 : i32
    return %c0_i32, %arg2 : i32, i32
  }
  func.func @transform_9(%arg0: i32, %arg1: i32, %arg2: i32) -> (i32, i32) {
    %c0_i32 = arith.constant 0 : i32
    %c0_i32_0 = arith.constant 0 : i32
    return %c0_i32, %arg2 : i32, i32
  }
  func.func @transform_10(%arg0: i32, %arg1: i32, %arg2: i32) -> (i32, i32) {
    %c0_i32 = arith.constant 0 : i32
    %c0_i32_0 = arith.constant 0 : i32
    return %arg2, %c0_i32 : i32, i32
  }
  func.func @transform_11(%arg0: i32, %arg1: i32, %arg2: i32) -> (i32, i32) {
    %c0_i32 = arith.constant 0 : i32
    %c0_i32_0 = arith.constant 0 : i32
    %c0_i32_1 = arith.constant 0 : i32
    return %c0_i32, %c0_i32_0 : i32, i32
  }
  func.func @transform_12(%arg0: i32, %arg1: i32, %arg2: i32) -> (i32, i32) {
    %c0_i32 = arith.constant 0 : i32
    %c0_i32_0 = arith.constant 0 : i32
    %c0_i32_1 = arith.constant 0 : i32
    return %c0_i32, %c0_i32_0 : i32, i32
  }
  func.func @transform_13(%arg0: i32, %arg1: i32, %arg2: i32) -> (i32, i32) {
    %c0_i32 = arith.constant 0 : i32
    %c0_i32_0 = arith.constant 0 : i32
    %c0_i32_1 = arith.constant 0 : i32
    return %c0_i32, %c0_i32_0 : i32, i32
  }
  func.func @transform_14(%arg0: i32, %arg1: i32, %arg2: i32) -> (i32, i32) {
    %c0_i32 = arith.constant 0 : i32
    %c0_i32_0 = arith.constant 0 : i32
    %c0_i32_1 = arith.constant 0 : i32
    return %c0_i32, %c0_i32_0 : i32, i32
  }
  func.func @transform_15(%arg0: i32, %arg1: i32, %arg2: i32) -> (i32, i32) {
    %c0_i32 = arith.constant 0 : i32
    %c0_i32_0 = arith.constant 0 : i32
    %c0_i32_1 = arith.constant 0 : i32
    return %c0_i32, %c0_i32_0 : i32, i32
  }
  func.func @transform_16(%arg0: i32, %arg1: i32, %arg2: i32) -> (i32, i32, i32) {
    %c0_i32 = arith.constant 0 : i32
    %c0_i32_0 = arith.constant 0 : i32
    return %arg0, %arg1, %c0_i32 : i32, i32, i32
  }
}

</mosaic_0001>

<bundles_post_ra>
// kernel: tpu_custom_call.1
= control target key start
LH: loop header
LB: loop body
LE: loop exit
PB: predicated region body
PF: predicated region fallthrough
CT: control target
= control target key end

     0   :  { %s3345_s0 = inlined_call_operand.vmem [shape: f32[2,8,32], index: 0, kind: input, shape index: {}]   ;;  %s3346_s1 = inlined_call_operand.vmem [shape: f32[2,8,32], index: 1, kind: input, shape index: {}]   ;;  %s3347_s2 = inlined_call_operand.vmem [shape: bf16[32,32], index: 2, kind: input, shape index: {}]   ;;  %s3348_s3 = inlined_call_operand.vmem [shape: f32[1,32], index: 3, kind: input, shape index: {}]   ;;  %s3349_s4 = inlined_call_operand.hbm [shape: bf16[32,64], index: 4, kind: input, shape index: {}]   ;;  %s3350_s5 = inlined_call_operand.vmem [shape: f32[1,64], index: 5, kind: input, shape index: {}]   ;;  %s3351_s6 = inlined_call_operand.hbm [shape: bf16[32,32], index: 6, kind: input, shape index: {}]   ;;  %s3352_s7 = inlined_call_operand.vmem [shape: f32[1,32], index: 7, kind: input, shape index: {}]   ;;  %s3353_s8 = inlined_call_operand.hbm [shape: bf16[32,64], index: 8, kind: input, shape index: {}]   ;;  %s3354_s9 = inlined_call_operand.vmem [shape: f32[1,64], index: 9, kind: input, shape index: {}]   ;;  %s3355_s10 = inlined_call_operand.vmem [shape: bf16[64,32], index: 10, kind: input, shape index: {}]   ;;  %s3356_s11 = inlined_call_operand.vmem [shape: f32[1,32], index: 11, kind: input, shape index: {}]   ;;  %s3357_s12 = inlined_call_operand.vmem [shape: f32[1,32], index: 12, kind: input, shape index: {}]   ;;  %s3358_s13 = inlined_call_operand.vmem [shape: f32[1,32], index: 13, kind: input, shape index: {}]   ;;  %s3359_s14 = inlined_call_operand.vmem [shape: f32[1,32], index: 14, kind: input, shape index: {}]   ;;  %s3360_s15 = inlined_call_operand.vmem [shape: f32[1,32], index: 15, kind: input, shape index: {}]   ;;  %s3361_s16 = inlined_call_operand.hbm [shape: f32[2,8,32], index: 16, kind: output, shape index: {}]  }
   0x1   :  { %3377 = sst [smem:[#allocation25_spill]] %s3345_s0 }
   0x2   :  { %3378 = sst [smem:[#allocation26_spill]] %s3351_s6 }
   0x3   :  { %3379 = sst [smem:[#allocation27_spill]] %s3359_s14 }
   0x4   :  { %3380 = sst [smem:[#allocation28_spill]] %s3360_s15 }
   0x5   :  { %3381 = sst [smem:[#allocation29_spill]] %s3361_s16 }
   0x6   :  { %21 = vsyncpa [#allocation7], 0 }
   0x7   :  { %22 = vsyncpa [#allocation10], 0 }
   0x8   :  { %23 = vsyncpa [#allocation8], 0 }
   0x9   :  { %25 = vsyncpa [#allocation8 + $0x1], 0  ;;  %s2925_s21 = smov 0   ;;  %s2927_s22 = smov 0  }
   0xa   :  { %s2929_s23 = smov 0   ;;  %s2931_s24 = smov 0  }
   0xb   :  { %s2933_s25 = smov 0   ;;  %s2935_s26 = smov 0  }
   0xc LB: > { %3382 = sst [smem:[#allocation16_spill]] %s2801_s21  ;;  %s2325_s27 = sadd.s32 4294967295, %s2821_s26   ;;  %s2821_s26 = sphi %s2935_s26, %s31_s26   ;;  %s2817_s25 = sphi %s2933_s25, %s3415_s25   ;;  %s2813_s24 = sphi %s2931_s24, %s3414_s24   ;;  %s2809_s23 = sphi %s2929_s23, %s3413_s23   ;;  %s2805_s22 = sphi %s2927_s22, %s3412_s22   ;;  %s2801_s21 = sphi %s2925_s21, %s3411_s21  }
   0xd   : > { %3383 = sst [smem:[#allocation17_spill]] %s2805_s22  ;;  %s2326_s28 = sadd.s32 4294967294, %s2821_s26  }
   0xe   : > { %3384 = sst [smem:[#allocation18_spill]] %s2809_s23  ;;  %s50_s29 = sadd.s32 1, %s2817_s25 }
   0xf   : > { %3385 = sst [smem:[#allocation19_spill]] %s2817_s25  ;;  %s422_s30 = sadd.s32 1, %s2809_s23 }
  0x10   : > { %3386 = sst [smem:[#allocation20_spill]] %s2821_s26  ;;  %p52_p0 = scmp.ge.s32.totalorder %s50_s29, 2 }
  0x11   : > { %p432_p1 = scmp.ne.s32.totalorder %s2809_s23, %s2805_s22  ;;  %p433_p2 = scmp.eq.s32.totalorder %s2325_s27, 1 }
  0x12   : > { %p438_p3 = scmp.ne.s32.totalorder %s2805_s22, %s2801_s21  ;;  %s3417_s29 = smov (%p52_p0, %s50_s29), 0 }
  0x13   : > { %3387 = sst [smem:[#allocation21_spill]] %s3417_s29  ;;  %p2965_p4 = por %p433_p2, %p432_p1 }
  0x14   : > { %p439_p5 = scmp.eq.s32.totalorder %s2326_s28, 1  ;;  %s417_s17 = ssub.s32 %s2817_s25, %s3417_s29 }
  0x15   : > { %s3388_s0 = scalar_select %p2965_p4, 1, 0 }
  0x16   : > { %p2327_p6 = scmp.ge.s32.totalorder %s2821_s26, 1  ;;  %p420_p7 = scmp.eq.s32.totalorder %s417_s17, 0 }
  0x17   : > { %3389 = sst [smem:[#allocation22_spill]] %s3388_s0  ;;  %p2972_p8 = por %p439_p5, %p438_p3 }
  0x18   : > { %p446_p9 = scmp.lt.s32.totalorder %s2821_s26, 3  ;;  %p2984_p11 = scmp.eq.s32.totalorder %s2325_s27, 0 }
  0x19   : > { %s3390_s18 = scalar_select %p2972_p8, 1, 0 }
  0x1a   : > { %s2978_s19 = scalar_select %p420_p7, %s2809_s23, %s422_s30  }
  0x1b   : > { %3391 = sst [smem:[#allocation23_spill]] %s3390_s18  ;;  %p2980_p10 = pnand %p2327_p6, %p446_p9 }
  0x1c   : > { %3392 = sst [smem:[#allocation24_spill]] %s2978_s19  ;;  %s2823_s28 = smov [#allocation9]  }
  0x1d   : > { %s3393_s20 = scalar_select %p2980_p10, 1, 0 }
  0x1e   : > { %s3394_s21 = scalar_select %p2984_p11, 1, 0 }
  0x1f   : > { %p2526_p12 = pneg %p2980_p10  ;;  %s487_s17 = sshll.u32 %s2823_s28, 4  ;;  %s488_s17 = int_to_ptr.vmem [resolvable:$true] %s487_s17 }
  0x20   : > { %s2824_s30 = smov [#allocation6]   ;;  %s3396_s6 = sld [smem:[#allocation26_spill]] }
  0x21   : > { %p2992_p13 = pnand %p2984_p11, %p2526_p12  ;;  %s471_s25 = sshll.u32 %s2824_s30, 4  ;;  %s472_s25 = int_to_ptr.vmem [resolvable:$true] %s471_s25 }
  0x23   : > { %p3004_p1 = pneg %p2992_p13 }
  0x26   : > { %s2651_s27 = scalar_lea.hbm %s3396_s6, 256 }
  0x27   : > { %p2652_p0 = scmp.ne.s32.totalorder %s3396_s6, %s2651_s27  ;;  %p2658_p5 = scmp.lt.u32.totalorder %s2651_s27, %s3396_s6 }
  0x29   : > { %p2654_p2 = pnand %p3004_p1, %p2652_p0 }
  0x2b   : > { %p2655_p3 = pneg %p2654_p2 }
  0x2d   : > { %p2660_p6 = pnand %p2658_p5, %p2655_p3 }
  0x2f   : > { %2663 = shalt.err (!%p2660_p6)
}
  0x30   : > { %s2664_s23 = scalar_lea.vmem %s488_s17, 256  ;;  %p2672_p8 = scmp.lt.s32.totalorder %s488_s17, %s488_s17 }
  0x31   : > { %p2665_p7 = scmp.ne.s32.totalorder %s488_s17, %s2664_s23  ;;  %p2673_p4 = scmp.lt.s32.totalorder %s2664_s23, %s2664_s23 }
  0x33   : > { %p2667_p9 = pnand %p2665_p7, %p3004_p1  ;;  %p2674_p11 = por %p2673_p4, %p2672_p8 }
  0x35   : > { %p2668_p12 = pneg %p2667_p9 }
  0x37   : > { %p2675_p10 = pnand %p2674_p11, %p2668_p12 }
  0x39   : > { %2678 = shalt.err (!%p2675_p10)
}
  0x3a   : > { %s2825_s26 = smov 64   ;;  %s2826_s18 = smov 4  }
  0x3b   : > { %2532 = dma.hbm_to_vmem [thread:$0]  (!%p2992_p13), %s3396_s6, 256, %s488_s17, [#allocation10], %s2825_s26, %s2825_s26, %s2826_s18  }
  0x3c   : > { %s2679_s27 = scalar_lea.hbm %s3349_s4, 256 }
  0x3d   : > { %p2680_p4 = scmp.ne.s32.totalorder %s3349_s4, %s2679_s27  ;;  %p2686_p11 = scmp.lt.u32.totalorder %s2679_s27, %s3349_s4 }
  0x3f   : > { %p2682_p8 = pnand %p2680_p4, %p3004_p1 }
  0x41   : > { %p2683_p10 = pneg %p2682_p8 }
  0x43   : > { %p2688_p0 = pnand %p2686_p11, %p2683_p10 }
  0x45   : > { %2691 = shalt.err (!%p2688_p0)
}
  0x46   : > { %s2692_s15 = scalar_lea.vmem %s472_s25, 256  ;;  %p2700_p6 = scmp.lt.s32.totalorder %s472_s25, %s472_s25 }
  0x47   : > { %p2693_p2 = scmp.ne.s32.totalorder %s472_s25, %s2692_s15  ;;  %p2701_p7 = scmp.lt.s32.totalorder %s2692_s15, %s2692_s15 }
  0x49   : > { %p2695_p3 = pnand %p2693_p2, %p3004_p1  ;;  %p2702_p9 = por %p2701_p7, %p2700_p6 }
  0x4b   : > { %p2696_p5 = pneg %p2695_p3 }
  0x4d   : > { %p2703_p12 = pnand %p2702_p9, %p2696_p5 }
  0x4f   : > { %2706 = shalt.err (!%p2703_p12)
}
  0x50   : > { %2529 = dma.hbm_to_vmem [thread:$0]  (!%p2992_p13), %s3349_s4, 256, %s472_s25, [#allocation7], %s2825_s26, %s2825_s26, %s2826_s18  }
  0x51   : > { %s2827_s0 = smov [#allocation11]   ;;  %s2707_s30 = scalar_lea.hbm %s3353_s8, 256 }
  0x52   : > { %s505_s17 = sshll.u32 %s2827_s0, 4  ;;  %p2708_p4 = scmp.ne.s32.totalorder %s3353_s8, %s2707_s30  ;;  %s506_s17 = int_to_ptr.vmem [resolvable:$true] %s505_s17 }
  0x53   : > { %p2714_p11 = scmp.lt.u32.totalorder %s2707_s30, %s3353_s8 }
  0x54   : > { %p2710_p8 = pnand %p2708_p4, %p3004_p1 }
  0x56   : > { %p2711_p10 = pneg %p2710_p8 }
  0x58   : > { %p2716_p0 = pnand %p2714_p11, %p2711_p10 }
  0x5a   : > { %2719 = shalt.err (!%p2716_p0)
}
  0x5b   : > { %s2720_s25 = scalar_lea.vmem %s506_s17, 256  ;;  %p2728_p6 = scmp.lt.s32.totalorder %s506_s17, %s506_s17 }
  0x5c   : > { %p2721_p2 = scmp.ne.s32.totalorder %s506_s17, %s2720_s25  ;;  %p2729_p7 = scmp.lt.s32.totalorder %s2720_s25, %s2720_s25 }
  0x5e   : > { %p2723_p3 = pnand %p2721_p2, %p3004_p1  ;;  %p2730_p9 = por %p2729_p7, %p2728_p6 }
  0x60   : > { %p2724_p5 = pneg %p2723_p3 }
  0x62   : > { %p2731_p12 = pnand %p2730_p9, %p2724_p5 }
  0x64   : > { %2734 = shalt.err (!%p2731_p12)
}
  0x65   : > { %2535 = dma.hbm_to_vmem [thread:$0]  (!%p2992_p13), %s3353_s8, 256, %s506_s17, [#allocation10], %s2825_s26, %s2825_s26, %s2826_s18  }
  0x66   : > { %p3398_p4 = scmp.ne.s32.totalorder %s3393_s20, 0 }
  0x67   : > { %p3399_p1 = scmp.ne.s32.totalorder (!%p3398_p4), %s3394_s21, 0 }
  0x68   : > { %561 = sbr.rel (%p3398_p4) target bundleno = 2543 (0x9ef), region = 84 }
  0x6f   : > { %2788 = dma.done.wait (%p3399_p1), [#allocation7], 256  }
  0x70   : > { %2790 = vsyncadd (%p3399_p1), [#allocation7], 4294967040 }
  0x71   : > { %2792 = dma.done.wait (%p3399_p1), [#allocation10], 512  }
  0x72   : > { %2794 = vsyncadd (%p3399_p1), [#allocation10], 4294966784  ;;  %p633_p8 = scmp.lt.s32.totalorder %s2813_s24, 1  ;;  %vm685_vm0 = vcmask 261120   ;;  %v2828_v0 = vmov 0.0   ;;  %vm2829_vm1 = vmmov 0   ;;  %v744_v24 = vlaneseq }
  0x73   : > { %2420 = vmatprep.subr.bf16.mxu1 %v2828_v0  ;;  %2424 = vmatprep.mubr.msk.bf16.mxu1 %vm2829_vm1, %v2828_v0  ;;  %1965 = vst.msk [vmem:[#allocation5] sm:$0xff] %vm685_vm0, %v2828_v0  ;;  %v2611_v1 = vld [vmem:[#allocation6] sm:$0xff]   ;;  %v2612_v2 = vld [vmem:[#allocation6 + $0x8] sm:$0xff]   ;;  %v2613_v4 = vld [vmem:[%s3347_s2] sm:$0xff]   ;;  %s3400_s16 = sld [smem:[#allocation25_spill]]  ;;  %s2830_s25 = smov 104  }
  0x74   : > { %s634_s29 = scalar_select %p633_p8, %s2813_s24, 1  ;;  %2436 = vmatprep.subr.bf16.mxu0 %v2828_v0  ;;  %2438 = vmatprep.mubr.msk.bf16.mxu0 %vm2829_vm1, %v2828_v0  ;;  %v2614_v7 = vld [vmem:[%s3347_s2 + $0x8] sm:$0xff]   ;;  %v2341_v9 = vld [vmem:[%s3350_s5] ss:$0 sm:$0xff]  ;;  %v2834_v22 = vmov 1983009808  }
  0x75   : > { %2421 = vmatpush3.bf16.msra.mxu1 %v2611_v1  ;;  %s2831_s6 = smov 120   ;;  %v2349_v15 = vld [vmem:[%s3348_s3] ss:$0 sm:$0xff]  ;;  %s2833_s20 = smov 96   ;;  %v742_v23 = vunpack.c.l.s4 %v2834_v22  ;;  %v2835_v25 = vmov 1934713408  }
  0x76   : > { %s2339_s21 = sshll.u32 %s634_s29, 3  ;;  %2422 = vmatprep.subr.bf16.mxu1 %v2828_v0  ;;  %v774_v26 = vunpack.c.l.s4 %v2835_v25  ;;  %v745_v28 = vshrl.u32 %v744_v24, 7  ;;  %vm959_vm2 = vcmask 60416   ;;  %vm1271_vm3 = vcmask 64512   ;;  %s2836_s28 = smov 16  }
  0x77   : > { %s643_s26 = scalar_lea.vmem %s3346_s1, %s2339_s21  ;;  %v743_v27 = vunpack.c.0.s8 %v742_v23  ;;  %vm1519_vm4 = vcmask 1043456   ;;  %s2838_s18 = smov 24   ;;  %vm1862_vm5 = vcmask 130048   ;;  %vm1864_vm6 = vcmask 195584  }
  0x78   : > { %v660_v3 = vld [vmem:[%s643_s26] sm:$0xff]  ;;  %v775_v31 = vunpack.c.0.s8 %v774_v26  ;;  %s2837_s26 = smov 8   ;;  %vm2070_vm7 = vcmask 523264   ;;  %s3401_s22 = sld [smem:[#allocation17_spill]] }
  0x79   : > { %v665_v5 = vpack.c.bf16 %v660_v3, %v660_v3  ;;  %2423 = vmatpush3.bf16.msra.mxu1 %v2612_v2  ;;  %s639_s19 = scalar_lea.vmem %s3400_s16, %s2339_s21  ;;  %s2832_s21 = smov 112   ;;  %v3117_v32 = vsub.s32 %v743_v27, %v745_v28 }
  0x7a   : > { %2428 = vmatprep.subr.bf16.mxu1 %v2828_v0  ;;  %v3097_v6 = vld [vmem:[%s639_s19] sm:$0xff]  ;;  %v3119_v38 = vsub.s32 %v775_v31, %v745_v28  ;;  %s3402_s16 = sld [smem:[#allocation22_spill]]  ;;  %s3403_s27 = sld [smem:[#allocation27_spill]] }
  0x7b   : > { %v1048_v8 = vpack.c.bf16 %v3097_v6, %v3097_v6 }
  0x7c   : > { %2425 = vmatmul.mubr.msk.bf16.vlgmr.msra.gmra.mrb[0].mxu1 %vm685_vm0, %v665_v5 }
  0x7d   : > { %2429 = vmatpush3.bf16.msra.mxu1 %v2613_v4  ;;  %2432 = vmatprep.mubr.msk.bf16.mxu1 %vm2829_vm1, %v2828_v0 }
  0x7e   : > { %2430 = vmatprep.subr.bf16.mxu1 %v2828_v0  ;;  %s630_s0 = sand.u32 1, %s3401_s22  }
  0x7f   : > { %s2338_s17 = sshll.u32 %s630_s0, 3 }
  0x80   : > { %s632_s14 = scalar_lea.vmem [#allocation12], %s2338_s17  ;;  %p3406_p10 = scmp.ne.s32.totalorder %s3402_s16, 0 }
  0x81   : > { %2431 = vmatpush3.bf16.msra.mxu1 %v2614_v7  ;;  %s2176_s29 = sshll.u32 %s632_s14, 4  ;;  %s3299_s29 = int_to_ptr.vmem [resolvable:$true] %s2176_s29 }
  0x82   : > { %2442 = vmatprep.subr.bf16.mxu1 %v2828_v0  ;;  %s2735_s22 = scalar_lea.vmem %s3299_s29, 128 }
  0x83   : > { %p2736_p13 = scmp.ne.s32.totalorder %s3299_s29, %s2735_s22 }
  0x84   : > { %2433 = vmatmul.mubr.msk.bf16.vlgmr.msra.gmra.mrb[4].mxu1 %vm685_vm0, %v1048_v8 }
  0x85   : > { %2444 = vmatprep.mubr.msk.bf16.mxu1 %vm2829_vm1, %v2828_v0  ;;  %p2737_p11 = pnand %p2736_p13, %p3406_p10 }
  0x87   : > { %p2738_p0 = pneg %p2737_p11 }
 0x14f   : > { %v723_v10 = vpop.f32.mrb[0].mxu1 }
 0x150   : > { %v724_v11 = vadd.f32 %v2341_v9, %v723_v10  ;;  %v2426_v12 = vpop.f32.mrb[1].mxu1 }
 0x151   : > { %v726_v13 = vpop.f32.mrb[2].mxu1 }
 0x152   : > { %736 = vrot.lane.b32.xlu1 %v724_v11, %s2830_s25  ;;  %730 = vrot.lane.b32.xlu0 %v724_v11, %s2831_s6  ;;  %v2427_v14 = vpop.f32.mrb[3].mxu1 }
 0x156   : > { %733 = vrot.lane.b32.xlu0 %v724_v11, %s2832_s21 }
 0x157   : > { %v1106_v16 = vpop.f32.mrb[4].mxu1 }
 0x158   : > { %v1107_v17 = vadd.f32 %v2349_v15, %v1106_v16  ;;  %v2434_v18 = vpop.f32.mrb[5].mxu1 }
 0x159   : > { %v1109_v19 = vpop.f32.mrb[6].mxu1 }
 0x15a   : > { %v1112_v20 = vmul.f32 0.35355338, %v1107_v17  ;;  %v2435_v21 = vpop.f32.mrb[7].mxu1 }
 0x15c   : > { %1117 = vrot.lane.b32.xlu0 %v1112_v20, %s2832_s21  ;;  %1114 = vrot.lane.b32.xlu1 %v1112_v20, %s2831_s6  ;;  %s2384_s6 = sshll.u32 %s2813_s24, 7  ;;  %s2839_s24 = smov [#allocation12]  }
 0x15d   : > { %s2739_s17 = sshll.u32 %s2839_s24, 4  ;;  %s2740_s17 = int_to_ptr.vmem [resolvable:$false] %s2739_s17 }
 0x15e   : > { %s2741_s19 = scalar_lea.vmem %s2740_s17, 256  ;;  %p2742_p2 = scmp.lt.s32.totalorder %s3299_s29, %s2740_s17 }
 0x15f   : > { %p2743_p3 = scmp.lt.s32.totalorder %s2741_s19, %s2735_s22 }
 0x160   : > { %807 = vrot.lane.b32.xlu0 %v724_v11, %s2833_s20  ;;  %1120 = vrot.lane.b32.xlu1 %v1112_v20, %s2830_s25  ;;  %s3404_s25 = sld [smem:[#allocation28_spill]] }
 0x161   : > { %p2744_p5 = por %p2743_p3, %p2742_p2 }
 0x163   : > { %p2745_p6 = pnand %p2744_p5, %p2738_p0 }
 0x1c4   : > { %v737_v29 = vpop.permute.xlu1 %736  ;;  %v731_v30 = vpop.permute.xlu0 %730 }
 0x1c5   : > { %809 = vrot.lane.b32.xlu1 %v731_v30, %s2833_s20  ;;  %v755_v33 = vcombine.low %v731_v30, %v737_v29  ;;  %v756_v34 = vcombine.high %v731_v30, %v737_v29 }
 0x1c7   : > { %v763_v39 = vrot.slane %v755_v33, %v3117_v32  ;;  %v770_v40 = vrot.slane %v756_v34, %v3117_v32 }
 0x1c8   : > { %v734_v35 = vpop.permute.xlu0 %733 }
 0x1c9   : > { %v739_v36 = vcombine.low %v724_v11, %v734_v35  ;;  %v740_v37 = vcombine.high %v724_v11, %v734_v35  ;;  %811 = vrot.lane.b32.xlu0 %v734_v35, %s2833_s20  ;;  %813 = vrot.lane.b32.xlu1 %v737_v29, %s2833_s20 }
 0x1cb   : > { %v747_v41 = vrot.slane %v739_v36, %v3117_v32  ;;  %v754_v42 = vrot.slane %v740_v37, %v3117_v32 }
 0x1cd   : > { %v771_v43 = vcombine.low %v747_v41, %v763_v39  ;;  %v772_v44 = vcombine.high %v747_v41, %v763_v39  ;;  %v787_v45 = vcombine.low %v754_v42, %v770_v40  ;;  %v788_v46 = vcombine.high %v754_v42, %v770_v40 }
 0x1ce   : > { %v1115_v47 = vpop.permute.xlu1 %1114  ;;  %v1118_v52 = vpop.permute.xlu0 %1117 }
 0x1cf   : > { %v779_v48 = vrot.slane %v771_v43, %v3119_v38  ;;  %v786_v49 = vrot.slane %v772_v44, %v3119_v38  ;;  %v795_v50 = vrot.slane %v787_v45, %v3119_v38  ;;  %v802_v51 = vrot.slane %v788_v46, %v3119_v38 }
 0x1d0   : > { %v1123_v57 = vcombine.low %v1112_v20, %v1118_v52  ;;  %v1124_v58 = vcombine.high %v1112_v20, %v1118_v52 }
 0x1d1   : > { %v887_v53 = vcombine.low %v779_v48, %v786_v49  ;;  %v2345_v54 = vcombine.high %v779_v48, %v786_v49  ;;  %v903_v55 = vcombine.low %v795_v50, %v802_v51  ;;  %v2346_v56 = vcombine.high %v795_v50, %v802_v51 }
 0x1d2   : > { %v1121_v59 = vpop.permute.xlu1 %1120  ;;  %v1131_v8 = vrot.slane %v1123_v57, %v3117_v32  ;;  %v1138_v9 = vrot.slane %v1124_v58, %v3117_v32 }
 0x1d3   : > { %v894_v60 = vrot.slane %v887_v53, %v3117_v32  ;;  %v902_v61 = vrot.slane %v2345_v54, %v3117_v32  ;;  %v910_v62 = vrot.slane %v903_v55, %v3117_v32  ;;  %v918_v63 = vrot.slane %v2346_v56, %v3117_v32 }
 0x1d4   : > { %v1139_v1 = vcombine.low %v1115_v47, %v1121_v59  ;;  %v1140_v2 = vcombine.high %v1115_v47, %v1121_v59 }
 0x1d5   : > { %v919_v3 = vcombine.low %v894_v60, %v902_v61  ;;  %v920_v4 = vcombine.high %v894_v60, %v902_v61  ;;  %v935_v5 = vcombine.low %v910_v62, %v918_v63  ;;  %v936_v7 = vcombine.high %v910_v62, %v918_v63 }
 0x1d6   : > { %v1147_v10 = vrot.slane %v1139_v1, %v3117_v32  ;;  %v1154_v11 = vrot.slane %v1140_v2, %v3117_v32 }
 0x1d7   : > { %v927_v12 = vrot.slane %v919_v3, %v3119_v38  ;;  %v934_v13 = vrot.slane %v920_v4, %v3119_v38  ;;  %v943_v14 = vrot.slane %v935_v5, %v3119_v38  ;;  %v950_v15 = vrot.slane %v936_v7, %v3119_v38  ;;  %v808_v3 = vpop.permute.xlu0 %807 }
 0x1d8   : > { %v1155_v16 = vcombine.low %v1131_v8, %v1147_v10  ;;  %v1156_v17 = vcombine.high %v1131_v8, %v1147_v10  ;;  %v1171_v18 = vcombine.low %v1138_v9, %v1154_v11  ;;  %v1172_v19 = vcombine.high %v1138_v9, %v1154_v11 }
 0x1d9   : > { %v951_v20 = vcombine.low %v927_v12, %v943_v14  ;;  %v952_v21 = vcombine.high %v927_v12, %v943_v14  ;;  %v953_v22 = vcombine.low %v934_v13, %v950_v15  ;;  %v954_v23 = vcombine.high %v934_v13, %v950_v15 }
 0x1da   : > { %v1163_v24 = vrot.slane %v1155_v16, %v3119_v38  ;;  %v1170_v25 = vrot.slane %v1156_v17, %v3119_v38  ;;  %v1179_v26 = vrot.slane %v1171_v18, %v3119_v38  ;;  %v1186_v27 = vrot.slane %v1172_v19, %v3119_v38 }
 0x1db   : > { %v955_v28 = vpack.c.bf16 %v951_v20, %v951_v20  ;;  %v956_v29 = vpack.c.bf16 %v952_v21, %v952_v21  ;;  %v957_v30 = vpack.c.bf16 %v953_v22, %v953_v22  ;;  %v958_v31 = vpack.c.bf16 %v954_v23, %v954_v23 }
 0x1dc   : > { %v1191_v33 = vcombine.low %v1163_v24, %v1170_v25  ;;  %v2353_v34 = vcombine.high %v1163_v24, %v1170_v25  ;;  %v1207_v35 = vcombine.low %v1179_v26, %v1186_v27  ;;  %v2354_v36 = vcombine.high %v1179_v26, %v1186_v27 }
 0x1dd   : > { %960 = vst.msk [vmem:[#allocation2] sm:$0xf] %vm959_vm2, %v955_v28  ;;  %961 = vst.msk [vmem:[#allocation2 + $0x4] sm:$0xf] %vm959_vm2, %v956_v29 }
 0x1de   : > { %962 = vst.msk [vmem:[#allocation2 + $0x8] sm:$0xf] %vm959_vm2, %v957_v30  ;;  %963 = vst.msk [vmem:[#allocation2 + $0xc] sm:$0xf] %vm959_vm2, %v958_v31  ;;  %v1198_v37 = vrot.slane %v1191_v33, %v3117_v32  ;;  %v1206_v39 = vrot.slane %v2353_v34, %v3117_v32  ;;  %v1214_v40 = vrot.slane %v1207_v35, %v3117_v32 }
 0x1df   : > { %v1222_v41 = vrot.slane %v2354_v36, %v3117_v32 }
 0x1e0   : > { %v1223_v42 = vcombine.low %v1198_v37, %v1206_v39  ;;  %v1224_v50 = vcombine.high %v1198_v37, %v1206_v39 }
 0x1e1   : > { %v1239_v43 = vcombine.low %v1214_v40, %v1222_v41  ;;  %v1240_v51 = vcombine.high %v1214_v40, %v1222_v41 }
 0x1e2   : > { %v1231_v44 = vrot.slane %v1223_v42, %v3119_v38  ;;  %v1238_v58 = vrot.slane %v1224_v50, %v3119_v38 }
 0x1e3   : > { %v1247_v45 = vrot.slane %v1239_v43, %v3119_v38  ;;  %v1254_v59 = vrot.slane %v1240_v51, %v3119_v38 }
 0x1e4   : > { %v1263_v46 = vld [vmem:[#allocation2] sm:$0xf]  ;;  %v1264_v47 = vld [vmem:[#allocation2 + $0x4] sm:$0xf] }
 0x1e5   : > { %v1276_v48 = vsel %vm1271_vm3, %v1263_v46, 0  ;;  %v1322_v49 = vsel %vm1271_vm3, %v1264_v47, 0  ;;  %v1255_v52 = vcombine.low %v1231_v44, %v1247_v45  ;;  %v1256_v53 = vcombine.high %v1231_v44, %v1247_v45  ;;  %v1265_v54 = vld [vmem:[#allocation2 + $0x8] sm:$0xf]  ;;  %v1266_v55 = vld [vmem:[#allocation2 + $0xc] sm:$0xf] }
 0x1e6   : > { %2437 = vmatpush3.bf16.xpose.msra.mxu0 %v1276_v48  ;;  %2443 = vmatpush3.bf16.xpose.msra.mxu1 %v1322_v49  ;;  %v1368_v60 = vsel %vm1271_vm3, %v1265_v54, 0  ;;  %v1414_v61 = vsel %vm1271_vm3, %v1266_v55, 0  ;;  %v1257_v62 = vcombine.low %v1238_v58, %v1254_v59  ;;  %v1258_v63 = vcombine.high %v1238_v58, %v1254_v59 }
 0x1e7   : > { %2448 = vmatprep.subr.bf16.mxu0 %v2828_v0  ;;  %2454 = vmatprep.subr.bf16.mxu1 %v2828_v0  ;;  %v1259_v56 = vpack.c.bf16 %v1255_v52, %v1255_v52  ;;  %v1260_v57 = vpack.c.bf16 %v1256_v53, %v1256_v53 }
 0x1e8   : > { %v1261_v1 = vpack.c.bf16 %v1257_v62, %v1257_v62  ;;  %v1262_v2 = vpack.c.bf16 %v1258_v63, %v1258_v63 }
 0x1ed   : > { %2439 = vmatmul.mubr.msk.bf16.vlgmr.msra.gmra.mrb[0].mxu0 %vm1271_vm3, %v1259_v56  ;;  %2445 = vmatmul.mubr.msk.bf16.vlgmr.msra.gmra.mrb[8].mxu1 %vm1271_vm3, %v1260_v57 }
 0x1ee   : > { %2449 = vmatpush3.bf16.xpose.msra.mxu0 %v1368_v60  ;;  %2455 = vmatpush3.bf16.xpose.msra.mxu1 %v1414_v61 }
 0x1ef   : > { %2450 = vmatprep.mubr.msk.bf16.mxu0 %vm2829_vm1, %v2828_v0  ;;  %2456 = vmatprep.mubr.msk.bf16.mxu1 %vm2829_vm1, %v2828_v0 }
 0x1f0   : > { %2460 = vmatprep.subr.bf16.mxu0 %v2828_v0  ;;  %2466 = vmatprep.subr.bf16.mxu1 %v2828_v0 }
 0x1f5   : > { %2451 = vmatmul.mubr.msk.bf16.vlgmr.msra.gmra.mrb[4].mxu0 %vm1271_vm3, %v1261_v1  ;;  %2457 = vmatmul.mubr.msk.bf16.vlgmr.msra.gmra.mrb[12].mxu1 %vm1271_vm3, %v1262_v2 }
 0x1f6   : > { %2462 = vmatprep.mubr.msk.bf16.mxu0 %vm2829_vm1, %v2828_v0  ;;  %2468 = vmatprep.mubr.msk.bf16.mxu1 %vm2829_vm1, %v2828_v0 }
 0x237   : > { %v810_v4 = vpop.permute.xlu1 %809 }
 0x23b   : > { %v812_v5 = vpop.permute.xlu0 %811  ;;  %v814_v7 = vpop.permute.xlu1 %813 }
 0x23c   : > { %v819_v8 = vcombine.low %v808_v3, %v812_v5  ;;  %v820_v9 = vcombine.high %v808_v3, %v812_v5  ;;  %v835_v10 = vcombine.low %v810_v4, %v814_v7  ;;  %v836_v11 = vcombine.high %v810_v4, %v814_v7 }
 0x23e   : > { %v827_v12 = vrot.slane %v819_v8, %v3117_v32  ;;  %v834_v13 = vrot.slane %v820_v9, %v3117_v32  ;;  %v843_v14 = vrot.slane %v835_v10, %v3117_v32  ;;  %v850_v15 = vrot.slane %v836_v11, %v3117_v32 }
 0x240   : > { %v851_v16 = vcombine.low %v827_v12, %v843_v14  ;;  %v852_v17 = vcombine.high %v827_v12, %v843_v14  ;;  %v867_v18 = vcombine.low %v834_v13, %v850_v15  ;;  %v868_v19 = vcombine.high %v834_v13, %v850_v15 }
 0x242   : > { %v859_v20 = vrot.slane %v851_v16, %v3119_v38  ;;  %v866_v21 = vrot.slane %v852_v17, %v3119_v38  ;;  %v875_v22 = vrot.slane %v867_v18, %v3119_v38  ;;  %v882_v23 = vrot.slane %v868_v19, %v3119_v38 }
 0x244   : > { %v964_v24 = vcombine.low %v859_v20, %v866_v21  ;;  %v2347_v25 = vcombine.high %v859_v20, %v866_v21  ;;  %v980_v26 = vcombine.low %v875_v22, %v882_v23  ;;  %v2348_v27 = vcombine.high %v875_v22, %v882_v23 }
 0x246   : > { %v971_v28 = vrot.slane %v964_v24, %v3117_v32  ;;  %v979_v29 = vrot.slane %v2347_v25, %v3117_v32  ;;  %v987_v30 = vrot.slane %v980_v26, %v3117_v32  ;;  %v995_v31 = vrot.slane %v2348_v27, %v3117_v32 }
 0x248   : > { %v996_v33 = vcombine.low %v971_v28, %v979_v29  ;;  %v997_v34 = vcombine.high %v971_v28, %v979_v29  ;;  %v1012_v35 = vcombine.low %v987_v30, %v995_v31  ;;  %v1013_v36 = vcombine.high %v987_v30, %v995_v31 }
 0x24a   : > { %v1004_v37 = vrot.slane %v996_v33, %v3119_v38  ;;  %v1011_v39 = vrot.slane %v997_v34, %v3119_v38  ;;  %v1020_v40 = vrot.slane %v1012_v35, %v3119_v38  ;;  %v1027_v41 = vrot.slane %v1013_v36, %v3119_v38 }
 0x24c   : > { %v1028_v42 = vcombine.low %v1004_v37, %v1020_v40  ;;  %v1029_v43 = vcombine.high %v1004_v37, %v1020_v40  ;;  %v1030_v44 = vcombine.low %v1011_v39, %v1027_v41  ;;  %v1031_v45 = vcombine.high %v1011_v39, %v1027_v41 }
 0x24e   : > { %v1032_v46 = vpack.c.bf16 %v1028_v42, %v1028_v42  ;;  %v1033_v47 = vpack.c.bf16 %v1029_v43, %v1029_v43  ;;  %v1034_v48 = vpack.c.bf16 %v1030_v44, %v1030_v44  ;;  %v1035_v49 = vpack.c.bf16 %v1031_v45, %v1031_v45 }
 0x250   : > { %1036 = vst.msk [vmem:[#allocation3] sm:$0xf] %vm959_vm2, %v1032_v46  ;;  %1037 = vst.msk [vmem:[#allocation3 + $0x4] sm:$0xf] %vm959_vm2, %v1033_v47 }
 0x251   : > { %1038 = vst.msk [vmem:[#allocation3 + $0x8] sm:$0xf] %vm959_vm2, %v1034_v48  ;;  %1039 = vst.msk [vmem:[#allocation3 + $0xc] sm:$0xf] %vm959_vm2, %v1035_v49 }
 0x257   : > { %v1267_v50 = vld [vmem:[#allocation3] sm:$0xf]  ;;  %v1268_v51 = vld [vmem:[#allocation3 + $0x4] sm:$0xf] }
 0x258   : > { %v1521_v52 = vsel %vm1519_vm4, %v1267_v50, 0  ;;  %v1567_v53 = vsel %vm1519_vm4, %v1268_v51, 0  ;;  %v1269_v25 = vld [vmem:[#allocation3 + $0x8] sm:$0xf]  ;;  %v1270_v29 = vld [vmem:[#allocation3 + $0xc] sm:$0xf] }
 0x259   : > { %2461 = vmatpush3.bf16.msra.mxu0 %v1521_v52  ;;  %2467 = vmatpush3.bf16.msra.mxu1 %v1567_v53  ;;  %v1613_v33 = vsel %vm1519_vm4, %v1269_v25, 0  ;;  %v1659_v34 = vsel %vm1519_vm4, %v1270_v29, 0 }
 0x25a   : > { %2472 = vmatprep.subr.bf16.mxu0 %v2828_v0  ;;  %2478 = vmatprep.subr.bf16.mxu1 %v2828_v0 }
 0x2c0   : > { %v1312_v54 = vpop.f32.mrb[0].mxu0  ;;  %v1358_v55 = vpop.f32.mrb[8].mxu1 }
 0x2c1   : > { %v2440_v56 = vpop.f32.mrb[1].mxu0  ;;  %v2446_v57 = vpop.f32.mrb[9].mxu1  ;;  %v1456_v58 = vsel %vm1271_vm3, %v1312_v54, -inf  ;;  %v1459_v59 = vsel %vm1271_vm3, %v1358_v55, -inf }
 0x2c2   : > { %1457 = vmax.xlane.f32.xlu0 %v1456_v58  ;;  %v1315_v60 = vpop.f32.mrb[2].mxu0  ;;  %1460 = vmax.xlane.f32.xlu1 %v1459_v59  ;;  %v1361_v61 = vpop.f32.mrb[10].mxu1 }
 0x2c3   : > { %v2441_v62 = vpop.f32.mrb[3].mxu0  ;;  %v2447_v63 = vpop.f32.mrb[11].mxu1 }
 0x2c8   : > { %v1404_v1 = vpop.f32.mrb[4].mxu0  ;;  %v1450_v2 = vpop.f32.mrb[12].mxu1 }
 0x2c9   : > { %v2452_v3 = vpop.f32.mrb[5].mxu0  ;;  %v2458_v4 = vpop.f32.mrb[13].mxu1  ;;  %v1462_v5 = vsel %vm1271_vm3, %v1404_v1, -inf  ;;  %v1465_v11 = vsel %vm1271_vm3, %v1450_v2, -inf }
 0x2ca   : > { %1463 = vmax.xlane.f32.xlu0 %v1462_v5  ;;  %v1407_v7 = vpop.f32.mrb[6].mxu0  ;;  %v1453_v8 = vpop.f32.mrb[14].mxu1 }
 0x2cb   : > { %v2453_v9 = vpop.f32.mrb[7].mxu0  ;;  %v2459_v10 = vpop.f32.mrb[15].mxu1 }
 0x2ce   : > { %1466 = vmax.xlane.f32.xlu0 %v1465_v11 }
 0x34f   : > { %v1458_v12 = vpop.xlane.xlu0 %1457  ;;  %v1461_v13 = vpop.xlane.xlu1 %1460 }
 0x350   : > { %v1480_v14 = vsub.f32 %v1312_v54, %v1458_v12  ;;  %v1481_v15 = vsub.f32 %v1358_v55, %v1461_v13  ;;  %v1468_v42 = vsub.f32 -inf, %v1458_v12  ;;  %v1469_v45 = vsub.f32 -inf, %v1461_v13 }
 0x352   : > { %v1484_v16 = vmul.f32 1.442695, %v1480_v14  ;;  %v1486_v17 = vmul.f32 1.442695, %v1481_v15  ;;  %v1472_v43 = vmul.f32 1.442695, %v1468_v42 }
 0x353   : > { %v1474_v48 = vmul.f32 1.442695, %v1469_v45 }
 0x354   : > { %2623 = vpow2.f32 %v1484_v16 }
 0x355   : > { %2625 = vpow2.f32 %v1486_v17 }
 0x357   : > { %v1464_v18 = vpop.xlane.xlu0 %1463 }
 0x358   : > { %v1482_v19 = vsub.f32 %v1404_v1, %v1464_v18  ;;  %v1470_v44 = vsub.f32 -inf, %v1464_v18 }
 0x35a   : > { %v1488_v20 = vmul.f32 1.442695, %v1482_v19  ;;  %v1476_v46 = vmul.f32 1.442695, %v1470_v44 }
 0x35b   : > { %v1467_v21 = vpop.xlane.xlu0 %1466 }
 0x35c   : > { %v1483_v22 = vsub.f32 %v1450_v2, %v1467_v21  ;;  %2627 = vpow2.f32 %v1488_v20  ;;  %v1471_v47 = vsub.f32 -inf, %v1467_v21 }
 0x35e   : > { %v1490_v23 = vmul.f32 1.442695, %v1483_v22  ;;  %v2624_v24 = vpop.eup %2623  ;;  %v1478_v49 = vmul.f32 1.442695, %v1471_v47 }
 0x35f   : > { %v1496_v26 = vsel %vm1271_vm3, %v2624_v24, 0.0  ;;  %v1512_v27 = vpack.c.bf16 %v2624_v24, %v2624_v24  ;;  %v2626_v28 = vpop.eup %2625 }
 0x360   : > { %2629 = vpow2.f32 %v1490_v23  ;;  %1497 = vadd.xlane.f32.xlu1 %v1496_v26  ;;  %v1499_v30 = vsel %vm1271_vm3, %v2626_v28, 0.0  ;;  %v1513_v31 = vpack.c.bf16 %v2626_v28, %v2626_v28 }
 0x361   : > { %2463 = vmatmul.mubr.msk.bf16.vlgmr.msra.gmra.mrb[8].mxu0 %vm1271_vm3, %v1512_v27  ;;  %1500 = vadd.xlane.f32.xlu0 %v1499_v30  ;;  %2631 = vpow2.f32 %v1472_v43 }
 0x362   : > { %2473 = vmatpush3.bf16.msra.mxu0 %v1613_v33  ;;  %2469 = vmatmul.mubr.msk.bf16.vlgmr.msra.gmra.mrb[16].mxu1 %vm1271_vm3, %v1513_v31  ;;  %2633 = vpow2.f32 %v1476_v46  ;;  %v2615_v46 = vld [vmem:[#allocation9] sm:$0xff]  }
 0x363   : > { %2474 = vmatprep.mubr.msk.bf16.mxu0 %vm2829_vm1, %v2828_v0  ;;  %2479 = vmatpush3.bf16.msra.mxu1 %v1659_v34  ;;  %2635 = vpow2.f32 %v1474_v48 }
 0x364   : > { %2480 = vmatprep.mubr.msk.bf16.mxu1 %vm2829_vm1, %v2828_v0  ;;  %2484 = vmatprep.subr.bf16.mxu0 %v2828_v0  ;;  %2637 = vpow2.f32 %v1478_v49 }
 0x365   : > { %2492 = vmatprep.subr.bf16.mxu1 %v2828_v0 }
 0x366   : > { %v2628_v35 = vpop.eup %2627 }
 0x367   : > { %v1502_v36 = vsel %vm1271_vm3, %v2628_v35, 0.0  ;;  %v1514_v37 = vpack.c.bf16 %v2628_v35, %v2628_v35 }
 0x368   : > { %1503 = vadd.xlane.f32.xlu1 %v1502_v36 }
 0x369   : > { %2475 = vmatmul.mubr.msk.bf16.vlgmr.msra.gmra.mrb[12].mxu0 %vm1271_vm3, %v1514_v37 }
 0x36a   : > { %v2630_v39 = vpop.eup %2629  ;;  %2488 = vmatprep.mubr.msk.bf16.mxu0 %vm2829_vm1, %v2828_v0  ;;  %2485 = vmatpush3.bf16.msra.mxu0 %v2615_v46  ;;  %v2371_v46 = vld [vmem:[%s3354_s9] ss:$0 sm:$0xff] }
 0x36b   : > { %v1505_v40 = vsel %vm1271_vm3, %v2630_v39, 0.0  ;;  %v1515_v41 = vpack.c.bf16 %v2630_v39, %v2630_v39  ;;  %v2632_v50 = vpop.eup %2631  ;;  %2486 = vmatprep.subr.bf16.mxu0 %v2828_v0 }
 0x36c   : > { %1506 = vadd.xlane.f32.xlu0 %v1505_v40  ;;  %v1492_v52 = vmul.f32 0.0, %v2632_v50  ;;  %v2634_v54 = vpop.eup %2633 }
 0x36d   : > { %2481 = vmatmul.mubr.msk.bf16.vlgmr.msra.gmra.mrb[20].mxu1 %vm1271_vm3, %v1515_v41  ;;  %v2636_v57 = vpop.eup %2635  ;;  %v1494_v58 = vmul.f32 0.0, %v2634_v54 }
 0x36e   : > { %2496 = vmatprep.mubr.msk.bf16.mxu1 %vm2829_vm1, %v2828_v0  ;;  %v2638_v59 = vpop.eup %2637  ;;  %v1493_v61 = vmul.f32 0.0, %v2636_v57 }
 0x36f   : > { %v1495_v63 = vmul.f32 0.0, %v2638_v59  ;;  %v2616_v59 = vld [vmem:[#allocation9 + $0x8] sm:$0xff]  }
 0x370   : > { %2487 = vmatpush3.bf16.msra.mxu0 %v2616_v59  ;;  %v2380_v59 = vld [vmem:[%s3356_s11] ss:$0 sm:$0xff] }
 0x371   : > { %2500 = vmatprep.subr.bf16.mxu0 %v2828_v0 }
 0x3ed   : > { %v1498_v51 = vpop.xlane.xlu1 %1497 }
 0x3ee   : > { %v1508_v53 = vadd.f32 %v1498_v51, %v1492_v52  ;;  %v1501_v55 = vpop.xlane.xlu0 %1500 }
 0x3ef   : > { %v1509_v1 = vadd.f32 %v1501_v55, %v1493_v61 }
 0x3f0   : > { %2639 = vrcp.f32 %v1508_v53 }
 0x3f5   : > { %v1504_v56 = vpop.xlane.xlu1 %1503 }
 0x3f6   : > { %v1510_v60 = vadd.f32 %v1504_v56, %v1494_v58 }
 0x3f8   : > { %2641 = vrcp.f32 %v1510_v60 }
 0x3f9   : > { %v1507_v62 = vpop.xlane.xlu0 %1506  ;;  %2643 = vrcp.f32 %v1509_v1 }
 0x3fa   : > { %v1511_v2 = vadd.f32 %v1507_v62, %v1495_v63  ;;  %v2640_v7 = vpop.eup %2639 }
 0x3fc   : > { %2645 = vrcp.f32 %v1511_v2 }
 0x402   : > { %v2642_v18 = vpop.eup %2641 }
 0x403   : > { %v2644_v24 = vpop.eup %2643 }
 0x406   : > { %v2646_v29 = vpop.eup %2645 }
 0x434   : > { %v1557_v3 = vpop.f32.mrb[8].mxu0 }
 0x435   : > { %v1701_v4 = vadd.f32 %v1557_v3, %v1492_v52  ;;  %v2464_v5 = vpop.f32.mrb[9].mxu0  ;;  %v1603_v8 = vpop.f32.mrb[16].mxu1 }
 0x436   : > { %v1560_v9 = vpop.f32.mrb[10].mxu0  ;;  %v2470_v11 = vpop.f32.mrb[17].mxu1  ;;  %v1702_v20 = vadd.f32 %v1603_v8, %v1493_v61 }
 0x437   : > { %v1709_v10 = vmul.f32 %v2640_v7, %v1701_v4  ;;  %v2465_v12 = vpop.f32.mrb[11].mxu0  ;;  %v1606_v13 = vpop.f32.mrb[18].mxu1 }
 0x438   : > { %v2471_v14 = vpop.f32.mrb[19].mxu1  ;;  %v1710_v31 = vmul.f32 %v2644_v24, %v1702_v20 }
 0x43c   : > { %v1649_v15 = vpop.f32.mrb[12].mxu0 }
 0x43d   : > { %v1703_v16 = vadd.f32 %v1649_v15, %v1494_v58  ;;  %v2476_v17 = vpop.f32.mrb[13].mxu0  ;;  %v2365_v15 = vld [vmem:[%s3352_s7] ss:$0 sm:$0xff] }
 0x43e   : > { %v1652_v19 = vpop.f32.mrb[14].mxu0 }
 0x43f   : > { %v1711_v21 = vmul.f32 %v2642_v18, %v1703_v16  ;;  %v2477_v22 = vpop.f32.mrb[15].mxu0 }
 0x440   : > { %v1695_v23 = vpop.f32.mrb[20].mxu1 }
 0x441   : > { %v1713_v25 = vcombine.low %v1709_v10, %v1711_v21  ;;  %v1714_v26 = vcombine.high %v1709_v10, %v1711_v21  ;;  %v1704_v27 = vadd.f32 %v1695_v23, %v1495_v63  ;;  %v2482_v28 = vpop.f32.mrb[21].mxu1 }
 0x442   : > { %v1698_v30 = vpop.f32.mrb[22].mxu1  ;;  %v2617_v28 = vld [vmem:[#allocation11] sm:$0xff]  }
 0x443   : > { %v1712_v33 = vmul.f32 %v2646_v29, %v1704_v27  ;;  %v2483_v34 = vpop.f32.mrb[23].mxu1  ;;  %v1721_v37 = vrot.slane %v1713_v25, %v3117_v32  ;;  %v1728_v39 = vrot.slane %v1714_v26, %v3117_v32  ;;  %2493 = vmatpush3.bf16.msra.mxu1 %v2617_v28  ;;  %v2618_v29 = vld [vmem:[#allocation11 + $0x8] sm:$0xff]   ;;  %v2620_v30 = vld [vmem:[%s3355_s10 + $0x8] sm:$0xff]  }
 0x444   : > { %2494 = vmatprep.subr.bf16.mxu1 %v2828_v0 }
 0x445   : > { %v1729_v35 = vcombine.low %v1710_v31, %v1712_v33  ;;  %v1730_v36 = vcombine.high %v1710_v31, %v1712_v33 }
 0x447   : > { %v1737_v40 = vrot.slane %v1729_v35, %v3117_v32  ;;  %v1744_v41 = vrot.slane %v1730_v36, %v3117_v32  ;;  %2495 = vmatpush3.bf16.msra.mxu1 %v2618_v29  ;;  %v2369_v36 = vld [vmem:[%s3357_s12] ss:$0 sm:$0xff] }
 0x449   : > { %v1745_v42 = vcombine.low %v1721_v37, %v1737_v40  ;;  %v1746_v43 = vcombine.high %v1721_v37, %v1737_v40  ;;  %v1761_v44 = vcombine.low %v1728_v39, %v1744_v41  ;;  %v1762_v45 = vcombine.high %v1728_v39, %v1744_v41  ;;  %v2370_v39 = vld [vmem:[%s3358_s13] ss:$0 sm:$0xff] }
 0x44b   : > { %v1753_v47 = vrot.slane %v1745_v42, %v3119_v38  ;;  %v1760_v48 = vrot.slane %v1746_v43, %v3119_v38  ;;  %v1769_v49 = vrot.slane %v1761_v44, %v3119_v38  ;;  %v1776_v50 = vrot.slane %v1762_v45, %v3119_v38  ;;  %v2621_v44 = vld [vmem:[%s3355_s10 + $0x10] sm:$0xff]   ;;  %v2622_v45 = vld [vmem:[%s3355_s10 + $0x18] sm:$0xff]  }
 0x44d   : > { %v1781_v51 = vcombine.low %v1753_v47, %v1760_v48  ;;  %v2363_v52 = vcombine.high %v1753_v47, %v1760_v48  ;;  %v1797_v53 = vcombine.low %v1769_v49, %v1776_v50  ;;  %v2364_v54 = vcombine.high %v1769_v49, %v1776_v50 }
 0x44f   : > { %v1788_v55 = vrot.slane %v1781_v51, %v3117_v32  ;;  %v1796_v56 = vrot.slane %v2363_v52, %v3117_v32  ;;  %v1804_v57 = vrot.slane %v1797_v53, %v3117_v32  ;;  %v1812_v58 = vrot.slane %v2364_v54, %v3117_v32  ;;  %v2036_v54 = vld [vmem:[#allocation5] sm:$0xff] }
 0x451   : > { %v1814_v60 = vcombine.high %v1788_v55, %v1796_v56  ;;  %v1830_v61 = vcombine.high %v1804_v57, %v1812_v58  ;;  %v1813_v62 = vcombine.low %v1788_v55, %v1796_v56  ;;  %v1829_v63 = vcombine.low %v1804_v57, %v1812_v58 }
 0x453   : > { %v1828_v1 = vrot.slane %v1814_v60, %v3119_v38  ;;  %v1844_v2 = vrot.slane %v1830_v61, %v3119_v38  ;;  %v1821_v3 = vrot.slane %v1813_v62, %v3119_v38  ;;  %v1837_v4 = vrot.slane %v1829_v63, %v3119_v38 }
 0x455   : > { %v1847_v5 = vcombine.low %v1828_v1, %v1844_v2  ;;  %v1846_v7 = vcombine.high %v1821_v3, %v1837_v4  ;;  %v1848_v8 = vcombine.high %v1828_v1, %v1844_v2  ;;  %v1845_v32 = vcombine.low %v1821_v3, %v1837_v4 }
 0x457   : > { %1854 = vrot.lane.b32.xlu0 %v1847_v5, %s2836_s28  ;;  %1850 = vrot.lane.b32.xlu1 %v1846_v7, %s2837_s26  ;;  %s3405_s28 = sld [smem:[#allocation29_spill]] }
 0x45b   : > { %1858 = vrot.lane.b32.xlu1 %v1848_v8, %s2838_s18  ;;  %s2162_s18 = scalar_lea.sflag [#allocation8], %s630_s0 }
 0x45d   : > { %s3297_s26 = scalar_lea.hbm %s3405_s28, %s2384_s6 }
 0x4c9   : > { %v1851_v9 = vpop.permute.xlu1 %1850  ;;  %v1855_v10 = vpop.permute.xlu0 %1854 }
 0x4ca   : > { %v1861_v11 = vsel %vm1271_vm3, %v1845_v32, %v1851_v9 }
 0x4cb   : > { %v1863_v13 = vsel %vm1862_vm5, %v1861_v11, %v1855_v10  ;;  %v2381_v10 = vld [vmem:[%s3403_s27] ss:$0 sm:$0xff] }
 0x4cd   : > { %v1859_v12 = vpop.permute.xlu1 %1858 }
 0x4ce   : > { %v1865_v14 = vsel %vm1864_vm6, %v1863_v13, %v1859_v12  ;;  %v2382_v12 = vld [vmem:[%s3404_s25] ss:$0 sm:$0xff] }
 0x4cf   : > { %v1870_v38 = vpack.c.bf16 %v1865_v14, %v1865_v14 }
 0x4d1   : > { %2489 = vmatmul.mubr.msk.bf16.vlgmr.msra.gmra.mrb[16].mxu0 %vm685_vm0, %v1870_v38 }
 0x4d2   : > { %2508 = vmatprep.mubr.msk.bf16.mxu0 %vm2829_vm1, %v2828_v0 }
 0x5a4   : > { %v1927_v16 = vpop.f32.mrb[16].mxu0 }
 0x5a5   : > { %v1928_v17 = vadd.f32 %v2365_v15, %v1927_v16  ;;  %v2490_v18 = vpop.f32.mrb[17].mxu0 }
 0x5a6   : > { %v1930_v19 = vpop.f32.mrb[18].mxu0 }
 0x5a7   : > { %v2491_v20 = vpop.f32.mrb[19].mxu0  ;;  %v1933_v21 = vadd.f32 %v1928_v17, %v3097_v6  ;;  %v2619_v6 = vld [vmem:[%s3355_s10] sm:$0xff]  }
 0x5a8   : > { %2501 = vmatpush3.bf16.msra.mxu0 %v2619_v6 }
 0x5a9   : > { %v1936_v22 = vsel %vm685_vm0, %v1933_v21, 0.0  ;;  %2502 = vmatprep.subr.bf16.mxu0 %v2828_v0 }
 0x5aa   : > { %1937 = vadd.xlane.f32.xlu1 %v1936_v22 }
 0x5ac   : > { %2503 = vmatpush3.bf16.msra.mxu0 %v2620_v30 }
 0x5ad   : > { %2504 = vmatprep.subr.bf16.mxu0 %v2828_v0 }
 0x5b0   : > { %2505 = vmatpush3.bf16.msra.mxu0 %v2621_v44 }
 0x5b1   : > { %2506 = vmatprep.subr.bf16.mxu0 %v2828_v0 }
 0x5b4   : > { %2507 = vmatpush3.bf16.msra.mxu0 %v2622_v45 }
 0x637   : > { %v1938_v23 = vpop.xlane.xlu1 %1937 }
 0x638   : > { %v1940_v24 = vmul.f32 0.03125, %v1938_v23 }
 0x63a   : > { %v1941_v25 = vsub.f32 %v1933_v21, %v1940_v24 }
 0x63c   : > { %v1942_v26 = vmul.f32 %v1941_v25, %v1941_v25 }
 0x63e   : > { %v1943_v27 = vsel %vm685_vm0, %v1942_v26, 0.0 }
 0x63f   : > { %1944 = vadd.xlane.f32.xlu0 %v1943_v27 }
 0x6cc   : > { %v1945_v31 = vpop.xlane.xlu0 %1944 }
 0x6cd   : > { %v1946_v33 = vmul.f32 0.03125, %v1945_v31 }
 0x6cf   : > { %v1947_v34 = vadd.f32 1e-05, %v1946_v33 }
 0x6d1   : > { %2647 = vrsqrt.f32 %v1947_v34 }
 0x6db   : > { %v2648_v35 = vpop.eup %2647 }
 0x6dc   : > { %v1949_v37 = vmul.f32 %v2648_v35, %v1941_v25 }
 0x6de   : > { %v1956_v40 = vmul.f32 %v2369_v36, %v1949_v37 }
 0x6e0   : > { %v1963_v41 = vadd.f32 %v2370_v39, %v1956_v40 }
 0x6e2   : > { %1964 = vst.msk [vmem:[#allocation4] sm:$0xff] %vm685_vm0, %v1963_v41 }
 0x6e9   : > { %v1966_v42 = vld [vmem:[#allocation4] sm:$0xff] }
 0x6ea   : > { %v1971_v43 = vpack.c.bf16 %v1966_v42, %v1966_v42 }
 0x6ec   : > { %2497 = vmatmul.mubr.msk.bf16.vlgmr.msra.gmra.mrb[24].mxu1 %vm685_vm0, %v1971_v43 }
 0x7bf   : > { %v2029_v47 = vpop.f32.mrb[24].mxu1 }
 0x7c0   : > { %v2030_v48 = vadd.f32 %v2371_v46, %v2029_v47  ;;  %v2498_v49 = vpop.f32.mrb[25].mxu1 }
 0x7c1   : > { %v2032_v50 = vpop.f32.mrb[26].mxu1 }
 0x7c2   : > { %v2035_v51 = vmax.f32 %v2030_v48, 0.0  ;;  %v2499_v52 = vpop.f32.mrb[27].mxu1 }
 0x7c4   : > { %v2045_v53 = vpack.c.bf16 %v2035_v51, %v2035_v51 }
 0x7c6   : > { %2509 = vmatmul.mubr.msk.bf16.vlgmr.msra.gmra.mrb[20].mxu0 %vm2070_vm7, %v2045_v53 }
 0x899   : > { %v2108_v0 = vpop.f32.mrb[20].mxu0 }
 0x89a   : > { %v2114_v55 = vadd.f32 %v2108_v0, %v2036_v54  ;;  %v2510_v56 = vpop.f32.mrb[21].mxu0 }
 0x89b   : > { %v2111_v57 = vpop.f32.mrb[22].mxu0 }
 0x89c   : > { %2115 = vst.msk [vmem:[#allocation5] sm:$0xff] %vm685_vm0, %v2114_v55  ;;  %v2511_v58 = vpop.f32.mrb[23].mxu0 }
 0x8a3   : > { %v2119_v60 = vld [vmem:[#allocation5] sm:$0xff] }
 0x8a4   : > { %v2127_v61 = vadd.f32 %v2380_v59, %v2119_v60 }
 0x8a6   : > { %v2129_v62 = vadd.f32 %v2127_v61, %v1966_v42 }
 0x8a8   : > { %v2132_v63 = vsel %vm685_vm0, %v2129_v62, 0.0 }
 0x8a9   : > { %2133 = vadd.xlane.f32.xlu0 %v2132_v63 }
 0x936   : > { %v2134_v1 = vpop.xlane.xlu0 %2133 }
 0x937   : > { %v2136_v2 = vmul.f32 0.03125, %v2134_v1 }
 0x939   : > { %v2137_v3 = vsub.f32 %v2129_v62, %v2136_v2 }
 0x93b   : > { %v2138_v4 = vmul.f32 %v2137_v3, %v2137_v3 }
 0x93d   : > { %v2139_v5 = vsel %vm685_vm0, %v2138_v4, 0.0 }
 0x93e   : > { %2140 = vadd.xlane.f32.xlu1 %v2139_v5 }
 0x9cb   : > { %v2141_v7 = vpop.xlane.xlu1 %2140 }
 0x9cc   : > { %v2142_v8 = vmul.f32 0.03125, %v2141_v7 }
 0x9ce   : > { %v2143_v32 = vadd.f32 1e-05, %v2142_v8 }
 0x9d0   : > { %2649 = vrsqrt.f32 %v2143_v32 }
 0x9da   : > { %v2650_v9 = vpop.eup %2649 }
 0x9db   : > { %v2145_v11 = vmul.f32 %v2650_v9, %v2137_v3 }
 0x9dd   : > { %v2152_v13 = vmul.f32 %v2381_v10, %v2145_v11 }
 0x9df   : > { %v2159_v14 = vadd.f32 %v2382_v12, %v2152_v13 }
 0x9e1   : > { %2160 = vst.msk [vmem:[%s632_s14] sm:$0xff] %vm685_vm0, %v2159_v14 }
 0x9e2   : > { %2748 = shalt.err (!%p2745_p6)
}
 0x9e3   : > { %s2749_s0 = scalar_lea.hbm %s3297_s26, 128  ;;  %s2753_s23 = scalar_lea.hbm %s3405_s28, 256 }
 0x9e4   : > { %p2750_p7 = scmp.ne.s32.totalorder %s3297_s26, %s2749_s0  ;;  %p2754_p4 = scmp.lt.u32.totalorder %s3297_s26, %s3405_s28 }
 0x9e5   : > { %p2755_p1 = scmp.lt.u32.totalorder %s2753_s23, %s2749_s0  ;;  %p2757_p13 = scmp.lt.u32.totalorder %s2749_s0, %s3297_s26 }
 0x9e6   : > { %p2751_p9 = pnand %p2750_p7, %p3406_p10 }
 0x9e7   : > { %p2756_p8 = por %p2755_p1, %p2754_p4 }
 0x9e8   : > { %p2752_p12 = pneg %p2751_p9 }
 0x9e9   : > { %p2758_p11 = por %p2757_p13, %p2756_p8 }
 0x9eb   : > { %p2759_p0 = pnand %p2758_p11, %p2752_p12 }
 0x9ed   : > { %2762 = shalt.err (!%p2759_p0)
}
 0x9ee   : > { %2524 = dma.vmem_to_hbm [thread:$0]  (%p3406_p10), %s3299_s29, 128, %s3297_s26, %s2162_s18  }
 0x9ef PF: > { %s3407_s6 = sld [smem:[#allocation20_spill]]  ;;  %s3408_s14 = sld [smem:[#allocation16_spill]] }
 0x9f0   : > { %s3409_s21 = sld [smem:[#allocation23_spill]] }
 0x9f5   : > { %p2546_p2 = scmp.ge.s32.totalorder %s3407_s6, 2  ;;  %s2188_s20 = sand.u32 1, %s3408_s14  }
 0x9f6   : > { %p3410_p3 = scmp.ne.s32.totalorder %s3409_s21, 0  ;;  %s2189_s22 = scalar_lea.sflag [#allocation8], %s2188_s20 }
 0x9f8   : > { %p2537_p5 = pnand %p2546_p2, %p3410_p3 }
 0x9fa   : > { %2796 = dma.done.wait (!%p2537_p5), %s2189_s22, 128  }
 0x9fb   : > { %2798 = vsyncadd (!%p2537_p5), %s2189_s22, 4294967168  ;;  %s31_s26 = sadd.s32 1, %s3407_s6   ;;  %s3411_s21 = sld [smem:[#allocation17_spill]] }
 0x9fc   : > { %p28_p6 = scmp.ge.s32.totalorder %s31_s26, 4   ;;  %s3412_s22 = sld [smem:[#allocation18_spill]] }
 0x9fd   : > { %s3413_s23 = sld [smem:[#allocation24_spill]]  ;;  %s3414_s24 = sld [smem:[#allocation19_spill]] }
 0x9fe   : > { %s3415_s25 = sld [smem:[#allocation21_spill]]  ;;  %30 = sbr.rel (!%p28_p6) target bundleno = 12 (0xc), region = 154 }
 0xa05   :  { %2194 = vsyncpa [#allocation7], 1 }
 0xa06   :  { %2196 = vsyncpa [#allocation7 + $0x1], 1 }
 0xa07   :  { %2197 = vsyncpa [#allocation10], 1 }
 0xa08   :  { %2198 = vsyncpa [#allocation8], 1 }
 0xa09   :  { %2200 = vsyncpa [#allocation8 + $0x1], 1 }

// kernel: tpu_custom_call.1
= control target key start
LH: loop header
LB: loop body
LE: loop exit
PB: predicated region body
PF: predicated region fallthrough
CT: control target
= control target key end

     0   :  { %s3342_s0 = inlined_call_operand.vmem [shape: f32[2,8,32], index: 0, kind: input, shape index: {}]   ;;  %s3343_s1 = inlined_call_operand.vmem [shape: f32[2,8,32], index: 1, kind: input, shape index: {}]   ;;  %s3344_s2 = inlined_call_operand.vmem [shape: bf16[32,32], index: 2, kind: input, shape index: {}]   ;;  %s3345_s3 = inlined_call_operand.vmem [shape: f32[1,32], index: 3, kind: input, shape index: {}]   ;;  %s3346_s4 = inlined_call_operand.hbm [shape: bf16[32,64], index: 4, kind: input, shape index: {}]   ;;  %s3347_s5 = inlined_call_operand.vmem [shape: f32[1,64], index: 5, kind: input, shape index: {}]   ;;  %s3348_s6 = inlined_call_operand.hbm [shape: bf16[32,32], index: 6, kind: input, shape index: {}]   ;;  %s3349_s7 = inlined_call_operand.vmem [shape: f32[1,32], index: 7, kind: input, shape index: {}]   ;;  %s3350_s8 = inlined_call_operand.hbm [shape: bf16[32,64], index: 8, kind: input, shape index: {}]   ;;  %s3351_s9 = inlined_call_operand.vmem [shape: f32[1,64], index: 9, kind: input, shape index: {}]   ;;  %s3352_s10 = inlined_call_operand.vmem [shape: bf16[64,32], index: 10, kind: input, shape index: {}]   ;;  %s3353_s11 = inlined_call_operand.vmem [shape: f32[1,32], index: 11, kind: input, shape index: {}]   ;;  %s3354_s12 = inlined_call_operand.vmem [shape: f32[1,32], index: 12, kind: input, shape index: {}]   ;;  %s3355_s13 = inlined_call_operand.vmem [shape: f32[1,32], index: 13, kind: input, shape index: {}]   ;;  %s3356_s14 = inlined_call_operand.vmem [shape: f32[1,32], index: 14, kind: input, shape index: {}]   ;;  %s3357_s15 = inlined_call_operand.vmem [shape: f32[1,32], index: 15, kind: input, shape index: {}]   ;;  %s3358_s16 = inlined_call_operand.hbm [shape: f32[2,8,32], index: 16, kind: output, shape index: {}]  }
   0x1   :  { %3374 = sst [smem:[#allocation25_spill]] %s3342_s0 }
   0x2   :  { %3375 = sst [smem:[#allocation26_spill]] %s3348_s6 }
   0x3   :  { %3376 = sst [smem:[#allocation27_spill]] %s3356_s14 }
   0x4   :  { %3377 = sst [smem:[#allocation28_spill]] %s3357_s15 }
   0x5   :  { %3378 = sst [smem:[#allocation29_spill]] %s3358_s16 }
   0x6   :  { %21 = vsyncpa [#allocation7], 0 }
   0x7   :  { %22 = vsyncpa [#allocation10], 0 }
   0x8   :  { %23 = vsyncpa [#allocation8], 0 }
   0x9   :  { %25 = vsyncpa [#allocation8 + $0x1], 0  ;;  %s2922_s21 = smov 0   ;;  %s2924_s22 = smov 0  }
   0xa   :  { %s2926_s23 = smov 0   ;;  %s2928_s24 = smov 0  }
   0xb   :  { %s2930_s25 = smov 0   ;;  %s2932_s26 = smov 0  }
   0xc LB: > { %3379 = sst [smem:[#allocation16_spill]] %s2798_s21  ;;  %s2322_s27 = sadd.s32 4294967295, %s2818_s26   ;;  %s2818_s26 = sphi %s2932_s26, %s31_s26   ;;  %s2814_s25 = sphi %s2930_s25, %s3412_s25   ;;  %s2810_s24 = sphi %s2928_s24, %s3411_s24   ;;  %s2806_s23 = sphi %s2926_s23, %s3410_s23   ;;  %s2802_s22 = sphi %s2924_s22, %s3409_s22   ;;  %s2798_s21 = sphi %s2922_s21, %s3408_s21  }
   0xd   : > { %3380 = sst [smem:[#allocation17_spill]] %s2802_s22  ;;  %s2323_s28 = sadd.s32 4294967294, %s2818_s26  }
   0xe   : > { %3381 = sst [smem:[#allocation18_spill]] %s2806_s23  ;;  %s50_s29 = sadd.s32 1, %s2814_s25 }
   0xf   : > { %3382 = sst [smem:[#allocation19_spill]] %s2814_s25  ;;  %s422_s30 = sadd.s32 1, %s2806_s23 }
  0x10   : > { %3383 = sst [smem:[#allocation20_spill]] %s2818_s26  ;;  %p52_p0 = scmp.ge.s32.totalorder %s50_s29, 2 }
  0x11   : > { %p432_p1 = scmp.ne.s32.totalorder %s2806_s23, %s2802_s22  ;;  %p433_p2 = scmp.eq.s32.totalorder %s2322_s27, 1 }
  0x12   : > { %p438_p3 = scmp.ne.s32.totalorder %s2802_s22, %s2798_s21  ;;  %s3414_s29 = smov (%p52_p0, %s50_s29), 0 }
  0x13   : > { %3384 = sst [smem:[#allocation21_spill]] %s3414_s29  ;;  %p2962_p4 = por %p433_p2, %p432_p1 }
  0x14   : > { %p439_p5 = scmp.eq.s32.totalorder %s2323_s28, 1  ;;  %s417_s17 = ssub.s32 %s2814_s25, %s3414_s29 }
  0x15   : > { %s3385_s0 = scalar_select %p2962_p4, 1, 0 }
  0x16   : > { %p2324_p6 = scmp.ge.s32.totalorder %s2818_s26, 1  ;;  %p420_p7 = scmp.eq.s32.totalorder %s417_s17, 0 }
  0x17   : > { %3386 = sst [smem:[#allocation22_spill]] %s3385_s0  ;;  %p2969_p8 = por %p439_p5, %p438_p3 }
  0x18   : > { %p446_p9 = scmp.lt.s32.totalorder %s2818_s26, 3  ;;  %p2981_p11 = scmp.eq.s32.totalorder %s2322_s27, 0 }
  0x19   : > { %s3387_s18 = scalar_select %p2969_p8, 1, 0 }
  0x1a   : > { %s2975_s19 = scalar_select %p420_p7, %s2806_s23, %s422_s30  }
  0x1b   : > { %3388 = sst [smem:[#allocation23_spill]] %s3387_s18  ;;  %p2977_p10 = pnand %p2324_p6, %p446_p9 }
  0x1c   : > { %3389 = sst [smem:[#allocation24_spill]] %s2975_s19  ;;  %s2820_s28 = smov [#allocation9]  }
  0x1d   : > { %s3390_s20 = scalar_select %p2977_p10, 1, 0 }
  0x1e   : > { %s3391_s21 = scalar_select %p2981_p11, 1, 0 }
  0x1f   : > { %p2523_p12 = pneg %p2977_p10  ;;  %s480_s17 = sshll.u32 %s2820_s28, 4  ;;  %s481_s17 = int_to_ptr.vmem [resolvable:$true] %s480_s17 }
  0x20   : > { %s2821_s30 = smov [#allocation6]   ;;  %s3393_s6 = sld [smem:[#allocation26_spill]] }
  0x21   : > { %p2989_p13 = pnand %p2981_p11, %p2523_p12  ;;  %s464_s25 = sshll.u32 %s2821_s30, 4  ;;  %s465_s25 = int_to_ptr.vmem [resolvable:$true] %s464_s25 }
  0x23   : > { %p3001_p1 = pneg %p2989_p13 }
  0x26   : > { %s2648_s27 = scalar_lea.hbm %s3393_s6, 256 }
  0x27   : > { %p2649_p0 = scmp.ne.s32.totalorder %s3393_s6, %s2648_s27  ;;  %p2655_p5 = scmp.lt.u32.totalorder %s2648_s27, %s3393_s6 }
  0x29   : > { %p2651_p2 = pnand %p3001_p1, %p2649_p0 }
  0x2b   : > { %p2652_p3 = pneg %p2651_p2 }
  0x2d   : > { %p2657_p6 = pnand %p2655_p5, %p2652_p3 }
  0x2f   : > { %2660 = shalt.err (!%p2657_p6)
}
  0x30   : > { %s2661_s23 = scalar_lea.vmem %s481_s17, 256  ;;  %p2669_p8 = scmp.lt.s32.totalorder %s481_s17, %s481_s17 }
  0x31   : > { %p2662_p7 = scmp.ne.s32.totalorder %s481_s17, %s2661_s23  ;;  %p2670_p4 = scmp.lt.s32.totalorder %s2661_s23, %s2661_s23 }
  0x33   : > { %p2664_p9 = pnand %p2662_p7, %p3001_p1  ;;  %p2671_p11 = por %p2670_p4, %p2669_p8 }
  0x35   : > { %p2665_p12 = pneg %p2664_p9 }
  0x37   : > { %p2672_p10 = pnand %p2671_p11, %p2665_p12 }
  0x39   : > { %2675 = shalt.err (!%p2672_p10)
}
  0x3a   : > { %s2822_s26 = smov 64   ;;  %s2823_s18 = smov 4  }
  0x3b   : > { %2529 = dma.hbm_to_vmem [thread:$0]  (!%p2989_p13), %s3393_s6, 256, %s481_s17, [#allocation10], %s2822_s26, %s2822_s26, %s2823_s18  }
  0x3c   : > { %s2676_s27 = scalar_lea.hbm %s3346_s4, 256 }
  0x3d   : > { %p2677_p4 = scmp.ne.s32.totalorder %s3346_s4, %s2676_s27  ;;  %p2683_p11 = scmp.lt.u32.totalorder %s2676_s27, %s3346_s4 }
  0x3f   : > { %p2679_p8 = pnand %p2677_p4, %p3001_p1 }
  0x41   : > { %p2680_p10 = pneg %p2679_p8 }
  0x43   : > { %p2685_p0 = pnand %p2683_p11, %p2680_p10 }
  0x45   : > { %2688 = shalt.err (!%p2685_p0)
}
  0x46   : > { %s2689_s15 = scalar_lea.vmem %s465_s25, 256  ;;  %p2697_p6 = scmp.lt.s32.totalorder %s465_s25, %s465_s25 }
  0x47   : > { %p2690_p2 = scmp.ne.s32.totalorder %s465_s25, %s2689_s15  ;;  %p2698_p7 = scmp.lt.s32.totalorder %s2689_s15, %s2689_s15 }
  0x49   : > { %p2692_p3 = pnand %p2690_p2, %p3001_p1  ;;  %p2699_p9 = por %p2698_p7, %p2697_p6 }
  0x4b   : > { %p2693_p5 = pneg %p2692_p3 }
  0x4d   : > { %p2700_p12 = pnand %p2699_p9, %p2693_p5 }
  0x4f   : > { %2703 = shalt.err (!%p2700_p12)
}
  0x50   : > { %2526 = dma.hbm_to_vmem [thread:$0]  (!%p2989_p13), %s3346_s4, 256, %s465_s25, [#allocation7], %s2822_s26, %s2822_s26, %s2823_s18  }
  0x51   : > { %s2824_s0 = smov [#allocation11]   ;;  %s2704_s30 = scalar_lea.hbm %s3350_s8, 256 }
  0x52   : > { %s498_s17 = sshll.u32 %s2824_s0, 4  ;;  %p2705_p4 = scmp.ne.s32.totalorder %s3350_s8, %s2704_s30  ;;  %s499_s17 = int_to_ptr.vmem [resolvable:$true] %s498_s17 }
  0x53   : > { %p2711_p11 = scmp.lt.u32.totalorder %s2704_s30, %s3350_s8 }
  0x54   : > { %p2707_p8 = pnand %p2705_p4, %p3001_p1 }
  0x56   : > { %p2708_p10 = pneg %p2707_p8 }
  0x58   : > { %p2713_p0 = pnand %p2711_p11, %p2708_p10 }
  0x5a   : > { %2716 = shalt.err (!%p2713_p0)
}
  0x5b   : > { %s2717_s25 = scalar_lea.vmem %s499_s17, 256  ;;  %p2725_p6 = scmp.lt.s32.totalorder %s499_s17, %s499_s17 }
  0x5c   : > { %p2718_p2 = scmp.ne.s32.totalorder %s499_s17, %s2717_s25  ;;  %p2726_p7 = scmp.lt.s32.totalorder %s2717_s25, %s2717_s25 }
  0x5e   : > { %p2720_p3 = pnand %p2718_p2, %p3001_p1  ;;  %p2727_p9 = por %p2726_p7, %p2725_p6 }
  0x60   : > { %p2721_p5 = pneg %p2720_p3 }
  0x62   : > { %p2728_p12 = pnand %p2727_p9, %p2721_p5 }
  0x64   : > { %2731 = shalt.err (!%p2728_p12)
}
  0x65   : > { %2532 = dma.hbm_to_vmem [thread:$0]  (!%p2989_p13), %s3350_s8, 256, %s499_s17, [#allocation10], %s2822_s26, %s2822_s26, %s2823_s18  }
  0x66   : > { %p3395_p4 = scmp.ne.s32.totalorder %s3390_s20, 0 }
  0x67   : > { %p3396_p1 = scmp.ne.s32.totalorder (!%p3395_p4), %s3391_s21, 0 }
  0x68   : > { %561 = sbr.rel (%p3395_p4) target bundleno = 2543 (0x9ef), region = 84 }
  0x6f   : > { %2785 = dma.done.wait (%p3396_p1), [#allocation7], 256  }
  0x70   : > { %2787 = vsyncadd (%p3396_p1), [#allocation7], 4294967040 }
  0x71   : > { %2789 = dma.done.wait (%p3396_p1), [#allocation10], 512  }
  0x72   : > { %2791 = vsyncadd (%p3396_p1), [#allocation10], 4294966784  ;;  %p633_p8 = scmp.lt.s32.totalorder %s2810_s24, 1  ;;  %vm685_vm0 = vcmask 261120   ;;  %v2825_v0 = vmov 0.0   ;;  %vm2826_vm1 = vmmov 0   ;;  %v744_v24 = vlaneseq }
  0x73   : > { %2417 = vmatprep.subr.bf16.mxu1 %v2825_v0  ;;  %2421 = vmatprep.mubr.msk.bf16.mxu1 %vm2826_vm1, %v2825_v0  ;;  %1965 = vst.msk [vmem:[#allocation5] sm:$0xff] %vm685_vm0, %v2825_v0  ;;  %v2608_v1 = vld [vmem:[#allocation6] sm:$0xff]   ;;  %v2609_v2 = vld [vmem:[#allocation6 + $0x8] sm:$0xff]   ;;  %v2610_v4 = vld [vmem:[%s3344_s2] sm:$0xff]   ;;  %s3397_s16 = sld [smem:[#allocation25_spill]]  ;;  %s2827_s25 = smov 104  }
  0x74   : > { %s634_s29 = scalar_select %p633_p8, %s2810_s24, 1  ;;  %2433 = vmatprep.subr.bf16.mxu0 %v2825_v0  ;;  %2435 = vmatprep.mubr.msk.bf16.mxu0 %vm2826_vm1, %v2825_v0  ;;  %v2611_v7 = vld [vmem:[%s3344_s2 + $0x8] sm:$0xff]   ;;  %v2338_v9 = vld [vmem:[%s3347_s5] ss:$0 sm:$0xff]  ;;  %v2831_v22 = vmov 1983009808  }
  0x75   : > { %2418 = vmatpush3.bf16.msra.mxu1 %v2608_v1  ;;  %s2828_s6 = smov 120   ;;  %v2346_v15 = vld [vmem:[%s3345_s3] ss:$0 sm:$0xff]  ;;  %s2830_s20 = smov 96   ;;  %v742_v23 = vunpack.c.l.s4 %v2831_v22  ;;  %v2832_v25 = vmov 1934713408  }
  0x76   : > { %s2336_s21 = sshll.u32 %s634_s29, 3  ;;  %2419 = vmatprep.subr.bf16.mxu1 %v2825_v0  ;;  %v774_v26 = vunpack.c.l.s4 %v2832_v25  ;;  %v745_v28 = vshrl.u32 %v744_v24, 7  ;;  %vm959_vm2 = vcmask 60416   ;;  %vm1271_vm3 = vcmask 64512   ;;  %s2833_s28 = smov 16  }
  0x77   : > { %s643_s26 = scalar_lea.vmem %s3343_s1, %s2336_s21  ;;  %v743_v27 = vunpack.c.0.s8 %v742_v23  ;;  %vm1519_vm4 = vcmask 1043456   ;;  %s2835_s18 = smov 24   ;;  %vm1862_vm5 = vcmask 130048   ;;  %vm1864_vm6 = vcmask 195584  }
  0x78   : > { %v660_v3 = vld [vmem:[%s643_s26] sm:$0xff]  ;;  %v775_v31 = vunpack.c.0.s8 %v774_v26  ;;  %s2834_s26 = smov 8   ;;  %vm2070_vm7 = vcmask 523264   ;;  %s3398_s22 = sld [smem:[#allocation17_spill]] }
  0x79   : > { %v665_v5 = vpack.c.bf16 %v660_v3, %v660_v3  ;;  %2420 = vmatpush3.bf16.msra.mxu1 %v2609_v2  ;;  %s639_s19 = scalar_lea.vmem %s3397_s16, %s2336_s21  ;;  %s2829_s21 = smov 112   ;;  %v3114_v32 = vsub.s32 %v743_v27, %v745_v28 }
  0x7a   : > { %2425 = vmatprep.subr.bf16.mxu1 %v2825_v0  ;;  %v3094_v6 = vld [vmem:[%s639_s19] sm:$0xff]  ;;  %v3116_v38 = vsub.s32 %v775_v31, %v745_v28  ;;  %s3399_s16 = sld [smem:[#allocation22_spill]]  ;;  %s3400_s27 = sld [smem:[#allocation27_spill]] }
  0x7b   : > { %v1048_v8 = vpack.c.bf16 %v3094_v6, %v3094_v6 }
  0x7c   : > { %2422 = vmatmul.mubr.msk.bf16.vlgmr.msra.gmra.mrb[0].mxu1 %vm685_vm0, %v665_v5 }
  0x7d   : > { %2426 = vmatpush3.bf16.msra.mxu1 %v2610_v4  ;;  %2429 = vmatprep.mubr.msk.bf16.mxu1 %vm2826_vm1, %v2825_v0 }
  0x7e   : > { %2427 = vmatprep.subr.bf16.mxu1 %v2825_v0  ;;  %s630_s0 = sand.u32 1, %s3398_s22  }
  0x7f   : > { %s2335_s17 = sshll.u32 %s630_s0, 3 }
  0x80   : > { %s632_s14 = scalar_lea.vmem [#allocation12], %s2335_s17  ;;  %p3403_p10 = scmp.ne.s32.totalorder %s3399_s16, 0 }
  0x81   : > { %2428 = vmatpush3.bf16.msra.mxu1 %v2611_v7  ;;  %s2176_s29 = sshll.u32 %s632_s14, 4  ;;  %s3296_s29 = int_to_ptr.vmem [resolvable:$true] %s2176_s29 }
  0x82   : > { %2439 = vmatprep.subr.bf16.mxu1 %v2825_v0  ;;  %s2732_s22 = scalar_lea.vmem %s3296_s29, 128 }
  0x83   : > { %p2733_p13 = scmp.ne.s32.totalorder %s3296_s29, %s2732_s22 }
  0x84   : > { %2430 = vmatmul.mubr.msk.bf16.vlgmr.msra.gmra.mrb[4].mxu1 %vm685_vm0, %v1048_v8 }
  0x85   : > { %2441 = vmatprep.mubr.msk.bf16.mxu1 %vm2826_vm1, %v2825_v0  ;;  %p2734_p11 = pnand %p2733_p13, %p3403_p10 }
  0x87   : > { %p2735_p0 = pneg %p2734_p11 }
 0x14f   : > { %v723_v10 = vpop.f32.mrb[0].mxu1 }
 0x150   : > { %v724_v11 = vadd.f32 %v2338_v9, %v723_v10  ;;  %v2423_v12 = vpop.f32.mrb[1].mxu1 }
 0x151   : > { %v726_v13 = vpop.f32.mrb[2].mxu1 }
 0x152   : > { %736 = vrot.lane.b32.xlu1 %v724_v11, %s2827_s25  ;;  %730 = vrot.lane.b32.xlu0 %v724_v11, %s2828_s6  ;;  %v2424_v14 = vpop.f32.mrb[3].mxu1 }
 0x156   : > { %733 = vrot.lane.b32.xlu0 %v724_v11, %s2829_s21 }
 0x157   : > { %v1106_v16 = vpop.f32.mrb[4].mxu1 }
 0x158   : > { %v1107_v17 = vadd.f32 %v2346_v15, %v1106_v16  ;;  %v2431_v18 = vpop.f32.mrb[5].mxu1 }
 0x159   : > { %v1109_v19 = vpop.f32.mrb[6].mxu1 }
 0x15a   : > { %v1112_v20 = vmul.f32 0.35355338, %v1107_v17  ;;  %v2432_v21 = vpop.f32.mrb[7].mxu1 }
 0x15c   : > { %1117 = vrot.lane.b32.xlu0 %v1112_v20, %s2829_s21  ;;  %1114 = vrot.lane.b32.xlu1 %v1112_v20, %s2828_s6  ;;  %s2381_s6 = sshll.u32 %s2810_s24, 7  ;;  %s2836_s24 = smov [#allocation12]  }
 0x15d   : > { %s2736_s17 = sshll.u32 %s2836_s24, 4  ;;  %s2737_s17 = int_to_ptr.vmem [resolvable:$false] %s2736_s17 }
 0x15e   : > { %s2738_s19 = scalar_lea.vmem %s2737_s17, 256  ;;  %p2739_p2 = scmp.lt.s32.totalorder %s3296_s29, %s2737_s17 }
 0x15f   : > { %p2740_p3 = scmp.lt.s32.totalorder %s2738_s19, %s2732_s22 }
 0x160   : > { %807 = vrot.lane.b32.xlu0 %v724_v11, %s2830_s20  ;;  %1120 = vrot.lane.b32.xlu1 %v1112_v20, %s2827_s25  ;;  %s3401_s25 = sld [smem:[#allocation28_spill]] }
 0x161   : > { %p2741_p5 = por %p2740_p3, %p2739_p2 }
 0x163   : > { %p2742_p6 = pnand %p2741_p5, %p2735_p0 }
 0x1c4   : > { %v737_v29 = vpop.permute.xlu1 %736  ;;  %v731_v30 = vpop.permute.xlu0 %730 }
 0x1c5   : > { %809 = vrot.lane.b32.xlu1 %v731_v30, %s2830_s20  ;;  %v755_v33 = vcombine.low %v731_v30, %v737_v29  ;;  %v756_v34 = vcombine.high %v731_v30, %v737_v29 }
 0x1c7   : > { %v763_v39 = vrot.slane %v755_v33, %v3114_v32  ;;  %v770_v40 = vrot.slane %v756_v34, %v3114_v32 }
 0x1c8   : > { %v734_v35 = vpop.permute.xlu0 %733 }
 0x1c9   : > { %v739_v36 = vcombine.low %v724_v11, %v734_v35  ;;  %v740_v37 = vcombine.high %v724_v11, %v734_v35  ;;  %811 = vrot.lane.b32.xlu0 %v734_v35, %s2830_s20  ;;  %813 = vrot.lane.b32.xlu1 %v737_v29, %s2830_s20 }
 0x1cb   : > { %v747_v41 = vrot.slane %v739_v36, %v3114_v32  ;;  %v754_v42 = vrot.slane %v740_v37, %v3114_v32 }
 0x1cd   : > { %v771_v43 = vcombine.low %v747_v41, %v763_v39  ;;  %v772_v44 = vcombine.high %v747_v41, %v763_v39  ;;  %v787_v45 = vcombine.low %v754_v42, %v770_v40  ;;  %v788_v46 = vcombine.high %v754_v42, %v770_v40 }
 0x1ce   : > { %v1115_v47 = vpop.permute.xlu1 %1114  ;;  %v1118_v52 = vpop.permute.xlu0 %1117 }
 0x1cf   : > { %v779_v48 = vrot.slane %v771_v43, %v3116_v38  ;;  %v786_v49 = vrot.slane %v772_v44, %v3116_v38  ;;  %v795_v50 = vrot.slane %v787_v45, %v3116_v38  ;;  %v802_v51 = vrot.slane %v788_v46, %v3116_v38 }
 0x1d0   : > { %v1123_v57 = vcombine.low %v1112_v20, %v1118_v52  ;;  %v1124_v58 = vcombine.high %v1112_v20, %v1118_v52 }
 0x1d1   : > { %v887_v53 = vcombine.low %v779_v48, %v786_v49  ;;  %v2342_v54 = vcombine.high %v779_v48, %v786_v49  ;;  %v903_v55 = vcombine.low %v795_v50, %v802_v51  ;;  %v2343_v56 = vcombine.high %v795_v50, %v802_v51 }
 0x1d2   : > { %v1121_v59 = vpop.permute.xlu1 %1120  ;;  %v1131_v8 = vrot.slane %v1123_v57, %v3114_v32  ;;  %v1138_v9 = vrot.slane %v1124_v58, %v3114_v32 }
 0x1d3   : > { %v894_v60 = vrot.slane %v887_v53, %v3114_v32  ;;  %v902_v61 = vrot.slane %v2342_v54, %v3114_v32  ;;  %v910_v62 = vrot.slane %v903_v55, %v3114_v32  ;;  %v918_v63 = vrot.slane %v2343_v56, %v3114_v32 }
 0x1d4   : > { %v1139_v1 = vcombine.low %v1115_v47, %v1121_v59  ;;  %v1140_v2 = vcombine.high %v1115_v47, %v1121_v59 }
 0x1d5   : > { %v919_v3 = vcombine.low %v894_v60, %v902_v61  ;;  %v920_v4 = vcombine.high %v894_v60, %v902_v61  ;;  %v935_v5 = vcombine.low %v910_v62, %v918_v63  ;;  %v936_v7 = vcombine.high %v910_v62, %v918_v63 }
 0x1d6   : > { %v1147_v10 = vrot.slane %v1139_v1, %v3114_v32  ;;  %v1154_v11 = vrot.slane %v1140_v2, %v3114_v32 }
 0x1d7   : > { %v927_v12 = vrot.slane %v919_v3, %v3116_v38  ;;  %v934_v13 = vrot.slane %v920_v4, %v3116_v38  ;;  %v943_v14 = vrot.slane %v935_v5, %v3116_v38  ;;  %v950_v15 = vrot.slane %v936_v7, %v3116_v38  ;;  %v808_v3 = vpop.permute.xlu0 %807 }
 0x1d8   : > { %v1155_v16 = vcombine.low %v1131_v8, %v1147_v10  ;;  %v1156_v17 = vcombine.high %v1131_v8, %v1147_v10  ;;  %v1171_v18 = vcombine.low %v1138_v9, %v1154_v11  ;;  %v1172_v19 = vcombine.high %v1138_v9, %v1154_v11 }
 0x1d9   : > { %v951_v20 = vcombine.low %v927_v12, %v943_v14  ;;  %v952_v21 = vcombine.high %v927_v12, %v943_v14  ;;  %v953_v22 = vcombine.low %v934_v13, %v950_v15  ;;  %v954_v23 = vcombine.high %v934_v13, %v950_v15 }
 0x1da   : > { %v1163_v24 = vrot.slane %v1155_v16, %v3116_v38  ;;  %v1170_v25 = vrot.slane %v1156_v17, %v3116_v38  ;;  %v1179_v26 = vrot.slane %v1171_v18, %v3116_v38  ;;  %v1186_v27 = vrot.slane %v1172_v19, %v3116_v38 }
 0x1db   : > { %v955_v28 = vpack.c.bf16 %v951_v20, %v951_v20  ;;  %v956_v29 = vpack.c.bf16 %v952_v21, %v952_v21  ;;  %v957_v30 = vpack.c.bf16 %v953_v22, %v953_v22  ;;  %v958_v31 = vpack.c.bf16 %v954_v23, %v954_v23 }
 0x1dc   : > { %v1191_v33 = vcombine.low %v1163_v24, %v1170_v25  ;;  %v2350_v34 = vcombine.high %v1163_v24, %v1170_v25  ;;  %v1207_v35 = vcombine.low %v1179_v26, %v1186_v27  ;;  %v2351_v36 = vcombine.high %v1179_v26, %v1186_v27 }
 0x1dd   : > { %960 = vst.msk [vmem:[#allocation2] sm:$0xf] %vm959_vm2, %v955_v28  ;;  %961 = vst.msk [vmem:[#allocation2 + $0x4] sm:$0xf] %vm959_vm2, %v956_v29 }
 0x1de   : > { %962 = vst.msk [vmem:[#allocation2 + $0x8] sm:$0xf] %vm959_vm2, %v957_v30  ;;  %963 = vst.msk [vmem:[#allocation2 + $0xc] sm:$0xf] %vm959_vm2, %v958_v31  ;;  %v1198_v37 = vrot.slane %v1191_v33, %v3114_v32  ;;  %v1206_v39 = vrot.slane %v2350_v34, %v3114_v32  ;;  %v1214_v40 = vrot.slane %v1207_v35, %v3114_v32 }
 0x1df   : > { %v1222_v41 = vrot.slane %v2351_v36, %v3114_v32 }
 0x1e0   : > { %v1223_v42 = vcombine.low %v1198_v37, %v1206_v39  ;;  %v1224_v50 = vcombine.high %v1198_v37, %v1206_v39 }
 0x1e1   : > { %v1239_v43 = vcombine.low %v1214_v40, %v1222_v41  ;;  %v1240_v51 = vcombine.high %v1214_v40, %v1222_v41 }
 0x1e2   : > { %v1231_v44 = vrot.slane %v1223_v42, %v3116_v38  ;;  %v1238_v58 = vrot.slane %v1224_v50, %v3116_v38 }
 0x1e3   : > { %v1247_v45 = vrot.slane %v1239_v43, %v3116_v38  ;;  %v1254_v59 = vrot.slane %v1240_v51, %v3116_v38 }
 0x1e4   : > { %v1263_v46 = vld [vmem:[#allocation2] sm:$0xf]  ;;  %v1264_v47 = vld [vmem:[#allocation2 + $0x4] sm:$0xf] }
 0x1e5   : > { %v1276_v48 = vsel %vm1271_vm3, %v1263_v46, 0  ;;  %v1322_v49 = vsel %vm1271_vm3, %v1264_v47, 0  ;;  %v1255_v52 = vcombine.low %v1231_v44, %v1247_v45  ;;  %v1256_v53 = vcombine.high %v1231_v44, %v1247_v45  ;;  %v1265_v54 = vld [vmem:[#allocation2 + $0x8] sm:$0xf]  ;;  %v1266_v55 = vld [vmem:[#allocation2 + $0xc] sm:$0xf] }
 0x1e6   : > { %2434 = vmatpush3.bf16.xpose.msra.mxu0 %v1276_v48  ;;  %2440 = vmatpush3.bf16.xpose.msra.mxu1 %v1322_v49  ;;  %v1368_v60 = vsel %vm1271_vm3, %v1265_v54, 0  ;;  %v1414_v61 = vsel %vm1271_vm3, %v1266_v55, 0  ;;  %v1257_v62 = vcombine.low %v1238_v58, %v1254_v59  ;;  %v1258_v63 = vcombine.high %v1238_v58, %v1254_v59 }
 0x1e7   : > { %2445 = vmatprep.subr.bf16.mxu0 %v2825_v0  ;;  %2451 = vmatprep.subr.bf16.mxu1 %v2825_v0  ;;  %v1259_v56 = vpack.c.bf16 %v1255_v52, %v1255_v52  ;;  %v1260_v57 = vpack.c.bf16 %v1256_v53, %v1256_v53 }
 0x1e8   : > { %v1261_v1 = vpack.c.bf16 %v1257_v62, %v1257_v62  ;;  %v1262_v2 = vpack.c.bf16 %v1258_v63, %v1258_v63 }
 0x1ed   : > { %2436 = vmatmul.mubr.msk.bf16.vlgmr.msra.gmra.mrb[0].mxu0 %vm1271_vm3, %v1259_v56  ;;  %2442 = vmatmul.mubr.msk.bf16.vlgmr.msra.gmra.mrb[8].mxu1 %vm1271_vm3, %v1260_v57 }
 0x1ee   : > { %2446 = vmatpush3.bf16.xpose.msra.mxu0 %v1368_v60  ;;  %2452 = vmatpush3.bf16.xpose.msra.mxu1 %v1414_v61 }
 0x1ef   : > { %2447 = vmatprep.mubr.msk.bf16.mxu0 %vm2826_vm1, %v2825_v0  ;;  %2453 = vmatprep.mubr.msk.bf16.mxu1 %vm2826_vm1, %v2825_v0 }
 0x1f0   : > { %2457 = vmatprep.subr.bf16.mxu0 %v2825_v0  ;;  %2463 = vmatprep.subr.bf16.mxu1 %v2825_v0 }
 0x1f5   : > { %2448 = vmatmul.mubr.msk.bf16.vlgmr.msra.gmra.mrb[4].mxu0 %vm1271_vm3, %v1261_v1  ;;  %2454 = vmatmul.mubr.msk.bf16.vlgmr.msra.gmra.mrb[12].mxu1 %vm1271_vm3, %v1262_v2 }
 0x1f6   : > { %2459 = vmatprep.mubr.msk.bf16.mxu0 %vm2826_vm1, %v2825_v0  ;;  %2465 = vmatprep.mubr.msk.bf16.mxu1 %vm2826_vm1, %v2825_v0 }
 0x237   : > { %v810_v4 = vpop.permute.xlu1 %809 }
 0x23b   : > { %v812_v5 = vpop.permute.xlu0 %811  ;;  %v814_v7 = vpop.permute.xlu1 %813 }
 0x23c   : > { %v819_v8 = vcombine.low %v808_v3, %v812_v5  ;;  %v820_v9 = vcombine.high %v808_v3, %v812_v5  ;;  %v835_v10 = vcombine.low %v810_v4, %v814_v7  ;;  %v836_v11 = vcombine.high %v810_v4, %v814_v7 }
 0x23e   : > { %v827_v12 = vrot.slane %v819_v8, %v3114_v32  ;;  %v834_v13 = vrot.slane %v820_v9, %v3114_v32  ;;  %v843_v14 = vrot.slane %v835_v10, %v3114_v32  ;;  %v850_v15 = vrot.slane %v836_v11, %v3114_v32 }
 0x240   : > { %v851_v16 = vcombine.low %v827_v12, %v843_v14  ;;  %v852_v17 = vcombine.high %v827_v12, %v843_v14  ;;  %v867_v18 = vcombine.low %v834_v13, %v850_v15  ;;  %v868_v19 = vcombine.high %v834_v13, %v850_v15 }
 0x242   : > { %v859_v20 = vrot.slane %v851_v16, %v3116_v38  ;;  %v866_v21 = vrot.slane %v852_v17, %v3116_v38  ;;  %v875_v22 = vrot.slane %v867_v18, %v3116_v38  ;;  %v882_v23 = vrot.slane %v868_v19, %v3116_v38 }
 0x244   : > { %v964_v24 = vcombine.low %v859_v20, %v866_v21  ;;  %v2344_v25 = vcombine.high %v859_v20, %v866_v21  ;;  %v980_v26 = vcombine.low %v875_v22, %v882_v23  ;;  %v2345_v27 = vcombine.high %v875_v22, %v882_v23 }
 0x246   : > { %v971_v28 = vrot.slane %v964_v24, %v3114_v32  ;;  %v979_v29 = vrot.slane %v2344_v25, %v3114_v32  ;;  %v987_v30 = vrot.slane %v980_v26, %v3114_v32  ;;  %v995_v31 = vrot.slane %v2345_v27, %v3114_v32 }
 0x248   : > { %v996_v33 = vcombine.low %v971_v28, %v979_v29  ;;  %v997_v34 = vcombine.high %v971_v28, %v979_v29  ;;  %v1012_v35 = vcombine.low %v987_v30, %v995_v31  ;;  %v1013_v36 = vcombine.high %v987_v30, %v995_v31 }
 0x24a   : > { %v1004_v37 = vrot.slane %v996_v33, %v3116_v38  ;;  %v1011_v39 = vrot.slane %v997_v34, %v3116_v38  ;;  %v1020_v40 = vrot.slane %v1012_v35, %v3116_v38  ;;  %v1027_v41 = vrot.slane %v1013_v36, %v3116_v38 }
 0x24c   : > { %v1028_v42 = vcombine.low %v1004_v37, %v1020_v40  ;;  %v1029_v43 = vcombine.high %v1004_v37, %v1020_v40  ;;  %v1030_v44 = vcombine.low %v1011_v39, %v1027_v41  ;;  %v1031_v45 = vcombine.high %v1011_v39, %v1027_v41 }
 0x24e   : > { %v1032_v46 = vpack.c.bf16 %v1028_v42, %v1028_v42  ;;  %v1033_v47 = vpack.c.bf16 %v1029_v43, %v1029_v43  ;;  %v1034_v48 = vpack.c.bf16 %v1030_v44, %v1030_v44  ;;  %v1035_v49 = vpack.c.bf16 %v1031_v45, %v1031_v45 }
 0x250   : > { %1036 = vst.msk [vmem:[#allocation3] sm:$0xf] %vm959_vm2, %v1032_v46  ;;  %1037 = vst.msk [vmem:[#allocation3 + $0x4] sm:$0xf] %vm959_vm2, %v1033_v47 }
 0x251   : > { %1038 = vst.msk [vmem:[#allocation3 + $0x8] sm:$0xf] %vm959_vm2, %v1034_v48  ;;  %1039 = vst.msk [vmem:[#allocation3 + $0xc] sm:$0xf] %vm959_vm2, %v1035_v49 }
 0x257   : > { %v1267_v50 = vld [vmem:[#allocation3] sm:$0xf]  ;;  %v1268_v51 = vld [vmem:[#allocation3 + $0x4] sm:$0xf] }
 0x258   : > { %v1521_v52 = vsel %vm1519_vm4, %v1267_v50, 0  ;;  %v1567_v53 = vsel %vm1519_vm4, %v1268_v51, 0  ;;  %v1269_v25 = vld [vmem:[#allocation3 + $0x8] sm:$0xf]  ;;  %v1270_v29 = vld [vmem:[#allocation3 + $0xc] sm:$0xf] }
 0x259   : > { %2458 = vmatpush3.bf16.msra.mxu0 %v1521_v52  ;;  %2464 = vmatpush3.bf16.msra.mxu1 %v1567_v53  ;;  %v1613_v33 = vsel %vm1519_vm4, %v1269_v25, 0  ;;  %v1659_v34 = vsel %vm1519_vm4, %v1270_v29, 0 }
 0x25a   : > { %2469 = vmatprep.subr.bf16.mxu0 %v2825_v0  ;;  %2475 = vmatprep.subr.bf16.mxu1 %v2825_v0 }
 0x2c0   : > { %v1312_v54 = vpop.f32.mrb[0].mxu0  ;;  %v1358_v55 = vpop.f32.mrb[8].mxu1 }
 0x2c1   : > { %v2437_v56 = vpop.f32.mrb[1].mxu0  ;;  %v2443_v57 = vpop.f32.mrb[9].mxu1  ;;  %v1456_v58 = vsel %vm1271_vm3, %v1312_v54, -inf  ;;  %v1459_v59 = vsel %vm1271_vm3, %v1358_v55, -inf }
 0x2c2   : > { %1457 = vmax.xlane.f32.xlu0 %v1456_v58  ;;  %v1315_v60 = vpop.f32.mrb[2].mxu0  ;;  %1460 = vmax.xlane.f32.xlu1 %v1459_v59  ;;  %v1361_v61 = vpop.f32.mrb[10].mxu1 }
 0x2c3   : > { %v2438_v62 = vpop.f32.mrb[3].mxu0  ;;  %v2444_v63 = vpop.f32.mrb[11].mxu1 }
 0x2c8   : > { %v1404_v1 = vpop.f32.mrb[4].mxu0  ;;  %v1450_v2 = vpop.f32.mrb[12].mxu1 }
 0x2c9   : > { %v2449_v3 = vpop.f32.mrb[5].mxu0  ;;  %v2455_v4 = vpop.f32.mrb[13].mxu1  ;;  %v1462_v5 = vsel %vm1271_vm3, %v1404_v1, -inf  ;;  %v1465_v11 = vsel %vm1271_vm3, %v1450_v2, -inf }
 0x2ca   : > { %1463 = vmax.xlane.f32.xlu0 %v1462_v5  ;;  %v1407_v7 = vpop.f32.mrb[6].mxu0  ;;  %v1453_v8 = vpop.f32.mrb[14].mxu1 }
 0x2cb   : > { %v2450_v9 = vpop.f32.mrb[7].mxu0  ;;  %v2456_v10 = vpop.f32.mrb[15].mxu1 }
 0x2ce   : > { %1466 = vmax.xlane.f32.xlu0 %v1465_v11 }
 0x34f   : > { %v1458_v12 = vpop.xlane.xlu0 %1457  ;;  %v1461_v13 = vpop.xlane.xlu1 %1460 }
 0x350   : > { %v1480_v14 = vsub.f32 %v1312_v54, %v1458_v12  ;;  %v1481_v15 = vsub.f32 %v1358_v55, %v1461_v13  ;;  %v1468_v42 = vsub.f32 -inf, %v1458_v12  ;;  %v1469_v45 = vsub.f32 -inf, %v1461_v13 }
 0x352   : > { %v1484_v16 = vmul.f32 1.442695, %v1480_v14  ;;  %v1486_v17 = vmul.f32 1.442695, %v1481_v15  ;;  %v1472_v43 = vmul.f32 1.442695, %v1468_v42 }
 0x353   : > { %v1474_v48 = vmul.f32 1.442695, %v1469_v45 }
 0x354   : > { %2620 = vpow2.f32 %v1484_v16 }
 0x355   : > { %2622 = vpow2.f32 %v1486_v17 }
 0x357   : > { %v1464_v18 = vpop.xlane.xlu0 %1463 }
 0x358   : > { %v1482_v19 = vsub.f32 %v1404_v1, %v1464_v18  ;;  %v1470_v44 = vsub.f32 -inf, %v1464_v18 }
 0x35a   : > { %v1488_v20 = vmul.f32 1.442695, %v1482_v19  ;;  %v1476_v46 = vmul.f32 1.442695, %v1470_v44 }
 0x35b   : > { %v1467_v21 = vpop.xlane.xlu0 %1466 }
 0x35c   : > { %v1483_v22 = vsub.f32 %v1450_v2, %v1467_v21  ;;  %2624 = vpow2.f32 %v1488_v20  ;;  %v1471_v47 = vsub.f32 -inf, %v1467_v21 }
 0x35e   : > { %v1490_v23 = vmul.f32 1.442695, %v1483_v22  ;;  %v2621_v24 = vpop.eup %2620  ;;  %v1478_v49 = vmul.f32 1.442695, %v1471_v47 }
 0x35f   : > { %v1496_v26 = vsel %vm1271_vm3, %v2621_v24, 0.0  ;;  %v1512_v27 = vpack.c.bf16 %v2621_v24, %v2621_v24  ;;  %v2623_v28 = vpop.eup %2622 }
 0x360   : > { %2626 = vpow2.f32 %v1490_v23  ;;  %1497 = vadd.xlane.f32.xlu1 %v1496_v26  ;;  %v1499_v30 = vsel %vm1271_vm3, %v2623_v28, 0.0  ;;  %v1513_v31 = vpack.c.bf16 %v2623_v28, %v2623_v28 }
 0x361   : > { %2460 = vmatmul.mubr.msk.bf16.vlgmr.msra.gmra.mrb[8].mxu0 %vm1271_vm3, %v1512_v27  ;;  %1500 = vadd.xlane.f32.xlu0 %v1499_v30  ;;  %2628 = vpow2.f32 %v1472_v43 }
 0x362   : > { %2470 = vmatpush3.bf16.msra.mxu0 %v1613_v33  ;;  %2466 = vmatmul.mubr.msk.bf16.vlgmr.msra.gmra.mrb[16].mxu1 %vm1271_vm3, %v1513_v31  ;;  %2630 = vpow2.f32 %v1476_v46  ;;  %v2612_v46 = vld [vmem:[#allocation9] sm:$0xff]  }
 0x363   : > { %2471 = vmatprep.mubr.msk.bf16.mxu0 %vm2826_vm1, %v2825_v0  ;;  %2476 = vmatpush3.bf16.msra.mxu1 %v1659_v34  ;;  %2632 = vpow2.f32 %v1474_v48 }
 0x364   : > { %2477 = vmatprep.mubr.msk.bf16.mxu1 %vm2826_vm1, %v2825_v0  ;;  %2481 = vmatprep.subr.bf16.mxu0 %v2825_v0  ;;  %2634 = vpow2.f32 %v1478_v49 }
 0x365   : > { %2489 = vmatprep.subr.bf16.mxu1 %v2825_v0 }
 0x366   : > { %v2625_v35 = vpop.eup %2624 }
 0x367   : > { %v1502_v36 = vsel %vm1271_vm3, %v2625_v35, 0.0  ;;  %v1514_v37 = vpack.c.bf16 %v2625_v35, %v2625_v35 }
 0x368   : > { %1503 = vadd.xlane.f32.xlu1 %v1502_v36 }
 0x369   : > { %2472 = vmatmul.mubr.msk.bf16.vlgmr.msra.gmra.mrb[12].mxu0 %vm1271_vm3, %v1514_v37 }
 0x36a   : > { %v2627_v39 = vpop.eup %2626  ;;  %2485 = vmatprep.mubr.msk.bf16.mxu0 %vm2826_vm1, %v2825_v0  ;;  %2482 = vmatpush3.bf16.msra.mxu0 %v2612_v46  ;;  %v2368_v46 = vld [vmem:[%s3351_s9] ss:$0 sm:$0xff] }
 0x36b   : > { %v1505_v40 = vsel %vm1271_vm3, %v2627_v39, 0.0  ;;  %v1515_v41 = vpack.c.bf16 %v2627_v39, %v2627_v39  ;;  %v2629_v50 = vpop.eup %2628  ;;  %2483 = vmatprep.subr.bf16.mxu0 %v2825_v0 }
 0x36c   : > { %1506 = vadd.xlane.f32.xlu0 %v1505_v40  ;;  %v1492_v52 = vmul.f32 0.0, %v2629_v50  ;;  %v2631_v54 = vpop.eup %2630 }
 0x36d   : > { %2478 = vmatmul.mubr.msk.bf16.vlgmr.msra.gmra.mrb[20].mxu1 %vm1271_vm3, %v1515_v41  ;;  %v2633_v57 = vpop.eup %2632  ;;  %v1494_v58 = vmul.f32 0.0, %v2631_v54 }
 0x36e   : > { %2493 = vmatprep.mubr.msk.bf16.mxu1 %vm2826_vm1, %v2825_v0  ;;  %v2635_v59 = vpop.eup %2634  ;;  %v1493_v61 = vmul.f32 0.0, %v2633_v57 }
 0x36f   : > { %v1495_v63 = vmul.f32 0.0, %v2635_v59  ;;  %v2613_v59 = vld [vmem:[#allocation9 + $0x8] sm:$0xff]  }
 0x370   : > { %2484 = vmatpush3.bf16.msra.mxu0 %v2613_v59  ;;  %v2377_v59 = vld [vmem:[%s3353_s11] ss:$0 sm:$0xff] }
 0x371   : > { %2497 = vmatprep.subr.bf16.mxu0 %v2825_v0 }
 0x3ed   : > { %v1498_v51 = vpop.xlane.xlu1 %1497 }
 0x3ee   : > { %v1508_v53 = vadd.f32 %v1498_v51, %v1492_v52  ;;  %v1501_v55 = vpop.xlane.xlu0 %1500 }
 0x3ef   : > { %v1509_v1 = vadd.f32 %v1501_v55, %v1493_v61 }
 0x3f0   : > { %2636 = vrcp.f32 %v1508_v53 }
 0x3f5   : > { %v1504_v56 = vpop.xlane.xlu1 %1503 }
 0x3f6   : > { %v1510_v60 = vadd.f32 %v1504_v56, %v1494_v58 }
 0x3f8   : > { %2638 = vrcp.f32 %v1510_v60 }
 0x3f9   : > { %v1507_v62 = vpop.xlane.xlu0 %1506  ;;  %2640 = vrcp.f32 %v1509_v1 }
 0x3fa   : > { %v1511_v2 = vadd.f32 %v1507_v62, %v1495_v63  ;;  %v2637_v7 = vpop.eup %2636 }
 0x3fc   : > { %2642 = vrcp.f32 %v1511_v2 }
 0x402   : > { %v2639_v18 = vpop.eup %2638 }
 0x403   : > { %v2641_v24 = vpop.eup %2640 }
 0x406   : > { %v2643_v29 = vpop.eup %2642 }
 0x434   : > { %v1557_v3 = vpop.f32.mrb[8].mxu0 }
 0x435   : > { %v1701_v4 = vadd.f32 %v1557_v3, %v1492_v52  ;;  %v2461_v5 = vpop.f32.mrb[9].mxu0  ;;  %v1603_v8 = vpop.f32.mrb[16].mxu1 }
 0x436   : > { %v1560_v9 = vpop.f32.mrb[10].mxu0  ;;  %v2467_v11 = vpop.f32.mrb[17].mxu1  ;;  %v1702_v20 = vadd.f32 %v1603_v8, %v1493_v61 }
 0x437   : > { %v1709_v10 = vmul.f32 %v2637_v7, %v1701_v4  ;;  %v2462_v12 = vpop.f32.mrb[11].mxu0  ;;  %v1606_v13 = vpop.f32.mrb[18].mxu1 }
 0x438   : > { %v2468_v14 = vpop.f32.mrb[19].mxu1  ;;  %v1710_v31 = vmul.f32 %v2641_v24, %v1702_v20 }
 0x43c   : > { %v1649_v15 = vpop.f32.mrb[12].mxu0 }
 0x43d   : > { %v1703_v16 = vadd.f32 %v1649_v15, %v1494_v58  ;;  %v2473_v17 = vpop.f32.mrb[13].mxu0  ;;  %v2362_v15 = vld [vmem:[%s3349_s7] ss:$0 sm:$0xff] }
 0x43e   : > { %v1652_v19 = vpop.f32.mrb[14].mxu0 }
 0x43f   : > { %v1711_v21 = vmul.f32 %v2639_v18, %v1703_v16  ;;  %v2474_v22 = vpop.f32.mrb[15].mxu0 }
 0x440   : > { %v1695_v23 = vpop.f32.mrb[20].mxu1 }
 0x441   : > { %v1713_v25 = vcombine.low %v1709_v10, %v1711_v21  ;;  %v1714_v26 = vcombine.high %v1709_v10, %v1711_v21  ;;  %v1704_v27 = vadd.f32 %v1695_v23, %v1495_v63  ;;  %v2479_v28 = vpop.f32.mrb[21].mxu1 }
 0x442   : > { %v1698_v30 = vpop.f32.mrb[22].mxu1  ;;  %v2614_v28 = vld [vmem:[#allocation11] sm:$0xff]  }
 0x443   : > { %v1712_v33 = vmul.f32 %v2643_v29, %v1704_v27  ;;  %v2480_v34 = vpop.f32.mrb[23].mxu1  ;;  %v1721_v37 = vrot.slane %v1713_v25, %v3114_v32  ;;  %v1728_v39 = vrot.slane %v1714_v26, %v3114_v32  ;;  %2490 = vmatpush3.bf16.msra.mxu1 %v2614_v28  ;;  %v2615_v29 = vld [vmem:[#allocation11 + $0x8] sm:$0xff]   ;;  %v2617_v30 = vld [vmem:[%s3352_s10 + $0x8] sm:$0xff]  }
 0x444   : > { %2491 = vmatprep.subr.bf16.mxu1 %v2825_v0 }
 0x445   : > { %v1729_v35 = vcombine.low %v1710_v31, %v1712_v33  ;;  %v1730_v36 = vcombine.high %v1710_v31, %v1712_v33 }
 0x447   : > { %v1737_v40 = vrot.slane %v1729_v35, %v3114_v32  ;;  %v1744_v41 = vrot.slane %v1730_v36, %v3114_v32  ;;  %2492 = vmatpush3.bf16.msra.mxu1 %v2615_v29  ;;  %v2366_v36 = vld [vmem:[%s3354_s12] ss:$0 sm:$0xff] }
 0x449   : > { %v1745_v42 = vcombine.low %v1721_v37, %v1737_v40  ;;  %v1746_v43 = vcombine.high %v1721_v37, %v1737_v40  ;;  %v1761_v44 = vcombine.low %v1728_v39, %v1744_v41  ;;  %v1762_v45 = vcombine.high %v1728_v39, %v1744_v41  ;;  %v2367_v39 = vld [vmem:[%s3355_s13] ss:$0 sm:$0xff] }
 0x44b   : > { %v1753_v47 = vrot.slane %v1745_v42, %v3116_v38  ;;  %v1760_v48 = vrot.slane %v1746_v43, %v3116_v38  ;;  %v1769_v49 = vrot.slane %v1761_v44, %v3116_v38  ;;  %v1776_v50 = vrot.slane %v1762_v45, %v3116_v38  ;;  %v2618_v44 = vld [vmem:[%s3352_s10 + $0x10] sm:$0xff]   ;;  %v2619_v45 = vld [vmem:[%s3352_s10 + $0x18] sm:$0xff]  }
 0x44d   : > { %v1781_v51 = vcombine.low %v1753_v47, %v1760_v48  ;;  %v2360_v52 = vcombine.high %v1753_v47, %v1760_v48  ;;  %v1797_v53 = vcombine.low %v1769_v49, %v1776_v50  ;;  %v2361_v54 = vcombine.high %v1769_v49, %v1776_v50 }
 0x44f   : > { %v1788_v55 = vrot.slane %v1781_v51, %v3114_v32  ;;  %v1796_v56 = vrot.slane %v2360_v52, %v3114_v32  ;;  %v1804_v57 = vrot.slane %v1797_v53, %v3114_v32  ;;  %v1812_v58 = vrot.slane %v2361_v54, %v3114_v32  ;;  %v2036_v54 = vld [vmem:[#allocation5] sm:$0xff] }
 0x451   : > { %v1814_v60 = vcombine.high %v1788_v55, %v1796_v56  ;;  %v1830_v61 = vcombine.high %v1804_v57, %v1812_v58  ;;  %v1813_v62 = vcombine.low %v1788_v55, %v1796_v56  ;;  %v1829_v63 = vcombine.low %v1804_v57, %v1812_v58 }
 0x453   : > { %v1828_v1 = vrot.slane %v1814_v60, %v3116_v38  ;;  %v1844_v2 = vrot.slane %v1830_v61, %v3116_v38  ;;  %v1821_v3 = vrot.slane %v1813_v62, %v3116_v38  ;;  %v1837_v4 = vrot.slane %v1829_v63, %v3116_v38 }
 0x455   : > { %v1847_v5 = vcombine.low %v1828_v1, %v1844_v2  ;;  %v1846_v7 = vcombine.high %v1821_v3, %v1837_v4  ;;  %v1848_v8 = vcombine.high %v1828_v1, %v1844_v2  ;;  %v1845_v32 = vcombine.low %v1821_v3, %v1837_v4 }
 0x457   : > { %1854 = vrot.lane.b32.xlu0 %v1847_v5, %s2833_s28  ;;  %1850 = vrot.lane.b32.xlu1 %v1846_v7, %s2834_s26  ;;  %s3402_s28 = sld [smem:[#allocation29_spill]] }
 0x45b   : > { %1858 = vrot.lane.b32.xlu1 %v1848_v8, %s2835_s18  ;;  %s2162_s18 = scalar_lea.sflag [#allocation8], %s630_s0 }
 0x45d   : > { %s3294_s26 = scalar_lea.hbm %s3402_s28, %s2381_s6 }
 0x4c9   : > { %v1851_v9 = vpop.permute.xlu1 %1850  ;;  %v1855_v10 = vpop.permute.xlu0 %1854 }
 0x4ca   : > { %v1861_v11 = vsel %vm1271_vm3, %v1845_v32, %v1851_v9 }
 0x4cb   : > { %v1863_v13 = vsel %vm1862_vm5, %v1861_v11, %v1855_v10  ;;  %v2378_v10 = vld [vmem:[%s3400_s27] ss:$0 sm:$0xff] }
 0x4cd   : > { %v1859_v12 = vpop.permute.xlu1 %1858 }
 0x4ce   : > { %v1865_v14 = vsel %vm1864_vm6, %v1863_v13, %v1859_v12  ;;  %v2379_v12 = vld [vmem:[%s3401_s25] ss:$0 sm:$0xff] }
 0x4cf   : > { %v1870_v38 = vpack.c.bf16 %v1865_v14, %v1865_v14 }
 0x4d1   : > { %2486 = vmatmul.mubr.msk.bf16.vlgmr.msra.gmra.mrb[16].mxu0 %vm685_vm0, %v1870_v38 }
 0x4d2   : > { %2505 = vmatprep.mubr.msk.bf16.mxu0 %vm2826_vm1, %v2825_v0 }
 0x5a4   : > { %v1927_v16 = vpop.f32.mrb[16].mxu0 }
 0x5a5   : > { %v1928_v17 = vadd.f32 %v2362_v15, %v1927_v16  ;;  %v2487_v18 = vpop.f32.mrb[17].mxu0 }
 0x5a6   : > { %v1930_v19 = vpop.f32.mrb[18].mxu0 }
 0x5a7   : > { %v2488_v20 = vpop.f32.mrb[19].mxu0  ;;  %v1933_v21 = vadd.f32 %v1928_v17, %v3094_v6  ;;  %v2616_v6 = vld [vmem:[%s3352_s10] sm:$0xff]  }
 0x5a8   : > { %2498 = vmatpush3.bf16.msra.mxu0 %v2616_v6 }
 0x5a9   : > { %v1936_v22 = vsel %vm685_vm0, %v1933_v21, 0.0  ;;  %2499 = vmatprep.subr.bf16.mxu0 %v2825_v0 }
 0x5aa   : > { %1937 = vadd.xlane.f32.xlu1 %v1936_v22 }
 0x5ac   : > { %2500 = vmatpush3.bf16.msra.mxu0 %v2617_v30 }
 0x5ad   : > { %2501 = vmatprep.subr.bf16.mxu0 %v2825_v0 }
 0x5b0   : > { %2502 = vmatpush3.bf16.msra.mxu0 %v2618_v44 }
 0x5b1   : > { %2503 = vmatprep.subr.bf16.mxu0 %v2825_v0 }
 0x5b4   : > { %2504 = vmatpush3.bf16.msra.mxu0 %v2619_v45 }
 0x637   : > { %v1938_v23 = vpop.xlane.xlu1 %1937 }
 0x638   : > { %v1940_v24 = vmul.f32 0.03125, %v1938_v23 }
 0x63a   : > { %v1941_v25 = vsub.f32 %v1933_v21, %v1940_v24 }
 0x63c   : > { %v1942_v26 = vmul.f32 %v1941_v25, %v1941_v25 }
 0x63e   : > { %v1943_v27 = vsel %vm685_vm0, %v1942_v26, 0.0 }
 0x63f   : > { %1944 = vadd.xlane.f32.xlu0 %v1943_v27 }
 0x6cc   : > { %v1945_v31 = vpop.xlane.xlu0 %1944 }
 0x6cd   : > { %v1946_v33 = vmul.f32 0.03125, %v1945_v31 }
 0x6cf   : > { %v1947_v34 = vadd.f32 1e-05, %v1946_v33 }
 0x6d1   : > { %2644 = vrsqrt.f32 %v1947_v34 }
 0x6db   : > { %v2645_v35 = vpop.eup %2644 }
 0x6dc   : > { %v1949_v37 = vmul.f32 %v2645_v35, %v1941_v25 }
 0x6de   : > { %v1956_v40 = vmul.f32 %v2366_v36, %v1949_v37 }
 0x6e0   : > { %v1963_v41 = vadd.f32 %v2367_v39, %v1956_v40 }
 0x6e2   : > { %1964 = vst.msk [vmem:[#allocation4] sm:$0xff] %vm685_vm0, %v1963_v41 }
 0x6e9   : > { %v1966_v42 = vld [vmem:[#allocation4] sm:$0xff] }
 0x6ea   : > { %v1971_v43 = vpack.c.bf16 %v1966_v42, %v1966_v42 }
 0x6ec   : > { %2494 = vmatmul.mubr.msk.bf16.vlgmr.msra.gmra.mrb[24].mxu1 %vm685_vm0, %v1971_v43 }
 0x7bf   : > { %v2029_v47 = vpop.f32.mrb[24].mxu1 }
 0x7c0   : > { %v2030_v48 = vadd.f32 %v2368_v46, %v2029_v47  ;;  %v2495_v49 = vpop.f32.mrb[25].mxu1 }
 0x7c1   : > { %v2032_v50 = vpop.f32.mrb[26].mxu1 }
 0x7c2   : > { %v2035_v51 = vmax.f32 %v2030_v48, 0.0  ;;  %v2496_v52 = vpop.f32.mrb[27].mxu1 }
 0x7c4   : > { %v2045_v53 = vpack.c.bf16 %v2035_v51, %v2035_v51 }
 0x7c6   : > { %2506 = vmatmul.mubr.msk.bf16.vlgmr.msra.gmra.mrb[20].mxu0 %vm2070_vm7, %v2045_v53 }
 0x899   : > { %v2108_v0 = vpop.f32.mrb[20].mxu0 }
 0x89a   : > { %v2114_v55 = vadd.f32 %v2108_v0, %v2036_v54  ;;  %v2507_v56 = vpop.f32.mrb[21].mxu0 }
 0x89b   : > { %v2111_v57 = vpop.f32.mrb[22].mxu0 }
 0x89c   : > { %2115 = vst.msk [vmem:[#allocation5] sm:$0xff] %vm685_vm0, %v2114_v55  ;;  %v2508_v58 = vpop.f32.mrb[23].mxu0 }
 0x8a3   : > { %v2119_v60 = vld [vmem:[#allocation5] sm:$0xff] }
 0x8a4   : > { %v2127_v61 = vadd.f32 %v2377_v59, %v2119_v60 }
 0x8a6   : > { %v2129_v62 = vadd.f32 %v2127_v61, %v1966_v42 }
 0x8a8   : > { %v2132_v63 = vsel %vm685_vm0, %v2129_v62, 0.0 }
 0x8a9   : > { %2133 = vadd.xlane.f32.xlu0 %v2132_v63 }
 0x936   : > { %v2134_v1 = vpop.xlane.xlu0 %2133 }
 0x937   : > { %v2136_v2 = vmul.f32 0.03125, %v2134_v1 }
 0x939   : > { %v2137_v3 = vsub.f32 %v2129_v62, %v2136_v2 }
 0x93b   : > { %v2138_v4 = vmul.f32 %v2137_v3, %v2137_v3 }
 0x93d   : > { %v2139_v5 = vsel %vm685_vm0, %v2138_v4, 0.0 }
 0x93e   : > { %2140 = vadd.xlane.f32.xlu1 %v2139_v5 }
 0x9cb   : > { %v2141_v7 = vpop.xlane.xlu1 %2140 }
 0x9cc   : > { %v2142_v8 = vmul.f32 0.03125, %v2141_v7 }
 0x9ce   : > { %v2143_v32 = vadd.f32 1e-05, %v2142_v8 }
 0x9d0   : > { %2646 = vrsqrt.f32 %v2143_v32 }
 0x9da   : > { %v2647_v9 = vpop.eup %2646 }
 0x9db   : > { %v2145_v11 = vmul.f32 %v2647_v9, %v2137_v3 }
 0x9dd   : > { %v2152_v13 = vmul.f32 %v2378_v10, %v2145_v11 }
 0x9df   : > { %v2159_v14 = vadd.f32 %v2379_v12, %v2152_v13 }
 0x9e1   : > { %2160 = vst.msk [vmem:[%s632_s14] sm:$0xff] %vm685_vm0, %v2159_v14 }
 0x9e2   : > { %2745 = shalt.err (!%p2742_p6)
}
 0x9e3   : > { %s2746_s0 = scalar_lea.hbm %s3294_s26, 128  ;;  %s2750_s23 = scalar_lea.hbm %s3402_s28, 256 }
 0x9e4   : > { %p2747_p7 = scmp.ne.s32.totalorder %s3294_s26, %s2746_s0  ;;  %p2751_p4 = scmp.lt.u32.totalorder %s3294_s26, %s3402_s28 }
 0x9e5   : > { %p2752_p1 = scmp.lt.u32.totalorder %s2750_s23, %s2746_s0  ;;  %p2754_p13 = scmp.lt.u32.totalorder %s2746_s0, %s3294_s26 }
 0x9e6   : > { %p2748_p9 = pnand %p2747_p7, %p3403_p10 }
 0x9e7   : > { %p2753_p8 = por %p2752_p1, %p2751_p4 }
 0x9e8   : > { %p2749_p12 = pneg %p2748_p9 }
 0x9e9   : > { %p2755_p11 = por %p2754_p13, %p2753_p8 }
 0x9eb   : > { %p2756_p0 = pnand %p2755_p11, %p2749_p12 }
 0x9ed   : > { %2759 = shalt.err (!%p2756_p0)
}
 0x9ee   : > { %2521 = dma.vmem_to_hbm [thread:$0]  (%p3403_p10), %s3296_s29, 128, %s3294_s26, %s2162_s18  }
 0x9ef PF: > { %s3404_s6 = sld [smem:[#allocation20_spill]]  ;;  %s3405_s14 = sld [smem:[#allocation16_spill]] }
 0x9f0   : > { %s3406_s21 = sld [smem:[#allocation23_spill]] }
 0x9f5   : > { %p2543_p2 = scmp.ge.s32.totalorder %s3404_s6, 2  ;;  %s2188_s20 = sand.u32 1, %s3405_s14  }
 0x9f6   : > { %p3407_p3 = scmp.ne.s32.totalorder %s3406_s21, 0  ;;  %s2189_s22 = scalar_lea.sflag [#allocation8], %s2188_s20 }
 0x9f8   : > { %p2534_p5 = pnand %p2543_p2, %p3407_p3 }
 0x9fa   : > { %2793 = dma.done.wait (!%p2534_p5), %s2189_s22, 128  }
 0x9fb   : > { %2795 = vsyncadd (!%p2534_p5), %s2189_s22, 4294967168  ;;  %s31_s26 = sadd.s32 1, %s3404_s6   ;;  %s3408_s21 = sld [smem:[#allocation17_spill]] }
 0x9fc   : > { %p28_p6 = scmp.ge.s32.totalorder %s31_s26, 4   ;;  %s3409_s22 = sld [smem:[#allocation18_spill]] }
 0x9fd   : > { %s3410_s23 = sld [smem:[#allocation24_spill]]  ;;  %s3411_s24 = sld [smem:[#allocation19_spill]] }
 0x9fe   : > { %s3412_s25 = sld [smem:[#allocation21_spill]]  ;;  %30 = sbr.rel (!%p28_p6) target bundleno = 12 (0xc), region = 154 }
 0xa05   :  { %2194 = vsyncpa [#allocation7], 1 }
 0xa06   :  { %2196 = vsyncpa [#allocation7 + $0x1], 1 }
 0xa07   :  { %2197 = vsyncpa [#allocation10], 1 }
 0xa08   :  { %2198 = vsyncpa [#allocation8], 1 }
 0xa09   :  { %2200 = vsyncpa [#allocation8 + $0x1], 1 }

</bundles_post_ra>
